<compile_context>
chip_gen: v7x
topology: tpu7x:2x2x1
jax: 0.10.0
libtpu: 0.0.40
codegen_flags: <defaults>
</compile_context>

<pallas_src>
import jax
import jax.numpy as jnp
from jax import lax
from jax.experimental import pallas as pl
from jax.experimental.pallas import tpu as pltpu


def _round_up(x, m):
    return (x + m - 1) // m * m


def _vmem_budget_bytes():
    """~3/4 of per-core VMEM (≈48 MiB on v7x, ≈96 MiB on v5e/v6e)."""
    cap = 64 * 1024 * 1024  # conservative fallback = v7x per-TC VMEM
    try:
        cap = int(pltpu.get_tpu_info().vmem_capacity_bytes)
    except Exception:
        pass
    return (3 * cap) // 4


def decoder_forward(params, hidden, target, sos=0, *, matmul_dtype=jnp.float32,
                    t_chunk=None, batch_tile=None, o_tile=None, rows_tile=None):
    """Teacher-forcing forward: log-probs (batch, max_length, output_size)."""
    # TODO(synk): the target=None sampling path (torch.multinomial / topk) is not
    # implemented; torch.multinomial is stochastic with no matching Pallas equivalent.
    h0, c0 = hidden
    num_layers, batch, H = h0.shape
    max_length = int(target.shape[1])
    vocab = params["embedding"].shape[0]
    output_size = params["fc_w_t"].shape[1]
    cdt = matmul_dtype
    f32 = jnp.float32

    # ------------------------- padding / tiling decisions -------------------------
    batch_p = _round_up(max(batch, 8), 8)
    if batch_tile is None:
        # Default: one batch tile.  On v7x (2 TensorCores) set batch_tile=batch_p//2
        # (batch_p % 16 == 0) to shard the recurrence across both cores.
        b_tile = batch_p
    else:
        b_tile = int(batch_tile)
    assert b_tile % 8 == 0 and batch_p % b_tile == 0
    n_bt = batch_p // b_tile

    budget = _vmem_budget_bytes()
    wbytes = jnp.dtype(cdt).itemsize
    if t_chunk is None:
        # Per-time-step VMEM: 2x token block + 2x htop out block + g_scr rows.
        per_t = b_tile * (2 * 128 * 4 + 2 * max(H, 128) * wbytes + 4 * H * 4)
        fixed = (vocab * 4 * H * wbytes                      # folded (V, 4H) table
                 + num_layers * 2 * H * 4 * H * wbytes       # w_cat
                 + num_layers * 4 * H * 4                    # biases
                 + 2 * num_layers * b_tile * max(H, 128) * 4  # state scratch
                 + (2 << 20))                                 # headroom
        t_chunk = max(1, min(64, max_length, max(budget - fixed, per_t) // per_t))
    t_chunk = int(max(1, t_chunk))
    t_pad = _round_up(max_length, t_chunk)
    num_chunks = t_pad // t_chunk

    # Output-class tiling for the FC + log-softmax kernel: 512-wide lane-dense tiles
    # when O is large (fills v6e/v7x 256-wide MXU), 128 minimum.
    o_base = _round_up(max(output_size, 128), 128)
    if o_tile is None:
        o_tile = 512 if o_base >= 512 else o_base
    o_tile = int(o_tile)
    o_pad = _round_up(o_base, o_tile)
    n_o = o_pad // o_tile

    rows_total = t_pad * batch_p
    if rows_tile is None:
        rows_tile = min(rows_total, 256)
    rows_tile = int(rows_tile)
    while rows_total % rows_tile:
        rows_tile -= 8
    rows_tile = max(rows_tile, 8)
    n_rt = rows_total // rows_tile

    # ------------------------- operand prep (plain XLA) -------------------------
    emb = params["embedding"].astype(f32)
    w_cat = params["w_cat"].astype(f32)              # (L, 2H, 4H) = [W_ih^T ; W_hh^T]
    b = params["b"].astype(f32)                      # (L, 1, 4H)
    # Fold embedding @ W_ih[0]^T + b[0] into one (V, 4H) table: the in-kernel prologue
    # becomes a single one-hot matmul into the layer-0 gate buffer.
    # TODO(synk): for large vocab, gather rows outside the kernel (or DMA row gather)
    # instead of the one-hot matmul.
    table = (emb @ w_cat[0, :H, :] + b[0]).astype(cdt)            # (V, 4H)
    w_cat_c = w_cat.astype(cdt)
    wfc = jnp.pad(params["fc_w_t"].astype(f32),
                  ((0, 0), (0, o_pad - output_size))).astype(cdt)  # (H, O_pad)
    bfc = jnp.pad(params["fc_b"].astype(f32)[None, :],
                  ((0, 0), (0, o_pad - output_size)),
                  constant_values=-1e30)                           # (1, O_pad) f32

    # Teacher forcing: token at step i is <sos> for i == 0, else target[:, i-1].
    tok = jnp.concatenate(
        [jnp.full((batch, 1), sos, jnp.int32),
         target[:, :max_length - 1].astype(jnp.int32)], axis=1)    # (B, T)
    tok = jnp.transpose(tok, (1, 0))                                # (T, B)
    tok = jnp.pad(tok, ((0, t_pad - max_length), (0, batch_p - batch)),
                  constant_values=sos)[..., None]                   # (T_pad, B_p, 1)

    h0p = jnp.pad(h0.astype(f32), ((0, 0), (0, batch_p - batch), (0, 0)))
    c0p = jnp.pad(c0.astype(f32), ((0, 0), (0, batch_p - batch), (0, 0)))

    # ============================ Kernel 1: recurrence ============================
    def lstm_kernel(tok_ref, h0_ref, c0_ref, tab_ref, wcat_ref, b_ref,
                    htop_ref, h_scr, c_scr, g_scr):
        chunk = pl.program_id(1)

        @pl.when(chunk == 0)
        def _init():          # fresh state at the start of every batch tile
            h_scr[...] = h0_ref[...]
            c_scr[...] = c0_ref[...]

        # Prologue: embedding lookup fused with layer-0 input projection + bias, for
        # all steps of the chunk at once (one one-hot matmul against the folded table).
        rows = t_chunk * b_tile
        tok_v = tok_ref[...].reshape(rows, 1)
        onehot = (tok_v == lax.broadcasted_iota(jnp.int32, (rows, vocab), 1)).astype(cdt)
        g_all = jnp.dot(onehot, tab_ref[...], preferred_element_type=f32)
        g_scr[...] = g_all.reshape(t_chunk, b_tile, 4 * H)

        # Pre-broadcast upper-layer biases once (JAX does not CSE broadcast_in_dim).
        b_up = [jnp.broadcast_to(b_ref[l], (b_tile, 4 * H))
                for l in range(1, num_layers)]

        def cell(gates, c_prev):
            # PyTorch gate order (i, f, g, o).  NOTE: for production H % 128 == 0 these
            # slices are lane-tile aligned; for H < 128 they cost XLU lane rotates.
            i_g = jax.nn.sigmoid(gates[:, 0 * H:1 * H])
            f_g = jax.nn.sigmoid(gates[:, 1 * H:2 * H])
            g_g = jnp.tanh(gates[:, 2 * H:3 * H])
            o_g = jax.nn.sigmoid(gates[:, 3 * H:4 * H])
            c_new = f_g * c_prev + i_g * g_g
            return o_g * jnp.tanh(c_new), c_new

        # Wavefront (diagonal) schedule over the chunk.  The loop is statically
        # unrolled (t_chunk is small by construction); weight operands are sliced from
        # the refs at the dot site so they are not held live in vregs across the loop.
        # TODO(synk): when H % 128 == 0, stage [x; h_l] into a (b_tile, 2H) buffer and
        # use a single dot against wcat_ref[l] to halve MXU pushes per upper layer.
        pipe = [None] * max(num_layers - 1, 0)
        for s in range(t_chunk + num_layers - 1):
            new_pipe = list(pipe)
            for l in range(num_layers):
                t = s - l
                if t < 0 or t >= t_chunk:
                    continue
                h_prev = h_scr[l].astype(cdt)
                if l == 0:
                    gates = g_scr[t] + jnp.dot(h_prev, wcat_ref[0, H:, :],
                                               preferred_element_type=f32)
                else:
                    gates = (jnp.dot(pipe[l - 1].astype(cdt), wcat_ref[l, :H, :],
                                     preferred_element_type=f32)
                             + jnp.dot(h_prev, wcat_ref[l, H:, :],
                                       preferred_element_type=f32)
                             + b_up[l - 1])
                h_new, c_new = cell(gates, c_scr[l])
                h_scr[l] = h_new
                c_scr[l] = c_new
                if l == num_layers - 1:
                    htop_ref[t] = h_new.astype(htop_ref.dtype)
                else:
                    new_pipe[l] = h_new
            pipe = new_pipe

    lstm_grid = pltpu.PrefetchScalarGridSpec(
        num_scalar_prefetch=0,
        grid=(n_bt, num_chunks),
        in_specs=[
            pl.BlockSpec((t_chunk, b_tile, 1), lambda bt, i: (i, bt, 0)),
            pl.BlockSpec((num_layers, b_tile, H), lambda bt, i: (0, bt, 0)),
            pl.BlockSpec((num_layers, b_tile, H), lambda bt, i: (0, bt, 0)),
            pl.BlockSpec((vocab, 4 * H), lambda bt, i: (0, 0)),
            pl.BlockSpec((num_layers, 2 * H, 4 * H), lambda bt, i: (0, 0, 0)),
            pl.BlockSpec((num_layers, 1, 4 * H), lambda bt, i: (0, 0, 0)),
        ],
        out_specs=pl.BlockSpec((t_chunk, b_tile, H), lambda bt, i: (i, bt, 0)),
        scratch_shapes=[
            pltpu.VMEM((num_layers, b_tile, H), f32),       # h state
            pltpu.VMEM((num_layers, b_tile, H), f32),       # c state
            pltpu.VMEM((t_chunk, b_tile, 4 * H), f32),      # hoisted layer-0 gates
        ],
    )
    htop = pl.pallas_call(
        lstm_kernel,
        out_shape=jax.ShapeDtypeStruct((t_pad, batch_p, H), cdt),
        grid_spec=lstm_grid,
        compiler_params=pltpu.CompilerParams(
            dimension_semantics=("parallel", "arbitrary"),
            vmem_limit_bytes=int(budget)),
    )(tok, h0p, c0p, table, w_cat_c, b)

    # ======================= Kernel 2: FC + log-softmax =======================
    def fc_kernel(x_ref, wfc_ref, bfc_ref, out_ref, lse_scr):
        j = pl.program_id(1)
        x = x_ref[...].astype(wfc_ref.dtype)                      # (rows_tile, H)

        def tile_logits(start):
            w = wfc_ref[:, pl.ds(start, o_tile)]
            bb = bfc_ref[:, pl.ds(start, o_tile)]
            return jnp.dot(x, w, preferred_element_type=f32) + bb

        if n_o == 1:
            logits = tile_logits(0)
            m = jnp.max(logits, axis=-1, keepdims=True)
            lse = m + jnp.log(jnp.sum(jnp.exp(logits - m), axis=-1, keepdims=True))
            out_ref[...] = logits - lse
        else:
            @pl.when(j == 0)
            def _stats():
                # Pass 1: streaming max / sum-exp over all O tiles; only one
                # (rows_tile, o_tile) logits tile is ever live in VMEM.
                m = jnp.full((rows_tile, 1), -jnp.inf, f32)
                l = jnp.zeros((rows_tile, 1), f32)
                for k in range(n_o):
                    lg = tile_logits(k * o_tile)
                    m_new = jnp.maximum(m, jnp.max(lg, axis=-1, keepdims=True))
                    l = l * jnp.exp(m - m_new) + jnp.sum(jnp.exp(lg - m_new),
                                                         axis=-1, keepdims=True)
                    m = m_new
                lse_scr[...] = m + jnp.log(l)

            # Pass 2 (every O tile): recompute this tile's logits and normalize.
            start = pl.multiple_of(j * o_tile, 128)
            out_ref[...] = tile_logits(start) - lse_scr[...]

    fc_grid = pltpu.PrefetchScalarGridSpec(
        num_scalar_prefetch=0,
        grid=(n_rt, n_o),
        in_specs=[
            pl.BlockSpec((rows_tile, H), lambda i, j: (i, 0)),
            pl.BlockSpec((H, o_pad), lambda i, j: (0, 0)),
            pl.BlockSpec((1, o_pad), lambda i, j: (0, 0)),
        ],
        out_specs=pl.BlockSpec((rows_tile, o_tile), lambda i, j: (i, j)),
        scratch_shapes=[pltpu.VMEM((rows_tile, 1), f32)],
    )
    out = pl.pallas_call(
        fc_kernel,
        out_shape=jax.ShapeDtypeStruct((rows_total, o_pad), f32),
        grid_spec=fc_grid,
        compiler_params=pltpu.CompilerParams(
            dimension_semantics=("parallel", "arbitrary"),
            vmem_limit_bytes=int(budget)),
    )(htop.reshape(rows_total, H), wfc, bfc)

    out = out.reshape(t_pad, batch_p, o_pad)[:max_length, :batch, :output_size]
    return jnp.transpose(out, (1, 0, 2))                           # (B, T, O)


def init_params(key, input_size, hidden_size, output_size, num_layers):
    ks = jax.random.split(key, 7)
    emb = jax.random.normal(ks[0], (input_size, hidden_size), jnp.float32) * 0.1
    w_ih = jax.random.normal(ks[1], (num_layers, 4 * hidden_size, hidden_size), jnp.float32) * 0.1
    w_hh = jax.random.normal(ks[2], (num_layers, 4 * hidden_size, hidden_size), jnp.float32) * 0.1
    b_ih = jax.random.normal(ks[3], (num_layers, 4 * hidden_size), jnp.float32) * 0.1
    b_hh = jax.random.normal(ks[4], (num_layers, 4 * hidden_size), jnp.float32) * 0.1
    fc_w = jax.random.normal(ks[5], (output_size, hidden_size), jnp.float32) * 0.1
    fc_b = jax.random.normal(ks[6], (output_size,), jnp.float32) * 0.1
    w_ih_t = jnp.transpose(w_ih, (0, 2, 1))                 # (L, H, 4H)
    w_hh_t = jnp.transpose(w_hh, (0, 2, 1))                 # (L, H, 4H)
    return {
        "embedding": emb,
        "w_cat": jnp.concatenate([w_ih_t, w_hh_t], axis=1),  # (L, 2H, 4H)
        "b": (b_ih + b_hh)[:, None, :],                      # (L, 1, 4H)
        "fc_w_t": jnp.transpose(fc_w),                       # (H, O)
        "fc_b": fc_b,                                        # (O,)
    }


def decoder_ref(params, hidden, target, sos=0):
    """Pure-JAX reference of the same teacher-forcing forward."""
    h, c = hidden
    num_layers, batch, H = h.shape
    max_length = target.shape[1]
    w_ih = params["w_cat"][:, :H, :]
    w_hh = params["w_cat"][:, H:, :]
    outputs = []
    tok = jnp.full((batch,), sos, jnp.int32)
    for i in range(max_length):
        x = params["embedding"][tok]
        new_h, new_c = [], []
        for layer in range(num_layers):
            gates = x @ w_ih[layer] + h[layer] @ w_hh[layer] + params["b"][layer]
            i_g = jax.nn.sigmoid(gates[:, 0 * H:1 * H])
            f_g = jax.nn.sigmoid(gates[:, 1 * H:2 * H])
            g_g = jnp.tanh(gates[:, 2 * H:3 * H])
            o_g = jax.nn.sigmoid(gates[:, 3 * H:4 * H])
            c_new = f_g * c[layer] + i_g * g_g
            h_new = o_g * jnp.tanh(c_new)
            new_h.append(h_new)
            new_c.append(c_new)
            x = h_new
        h = jnp.stack(new_h)
        c = jnp.stack(new_c)
        logits = x @ params["fc_w_t"] + params["fc_b"]
        outputs.append(logits[:, None, :])
        tok = target[:, i].astype(jnp.int32)
    acts_logits = jnp.concatenate(outputs, axis=1)
    return jax.nn.log_softmax(acts_logits, axis=-1)


if __name__ == "__main__":
    # Full-precision XLA matmuls for the reference / wrapper-side folds so the f32
    # self-test tolerance is meaningful against the kernel's f32 MXU math.
    jax.config.update("jax_default_matmul_precision", "highest")

    vocab = 11
    hidden_size = 32
    output_size = 200
    num_layers = 2
    max_length = 9
    batch = 10
    sos = 0

    key = jax.random.PRNGKey(0)
    kp, kh, kc, kt = jax.random.split(key, 4)
    params = init_params(kp, vocab, hidden_size, output_size, num_layers)
    h0 = jax.random.normal(kh, (num_layers, batch, hidden_size), jnp.float32)
    c0 = jax.random.normal(kc, (num_layers, batch, hidden_size), jnp.float32)
    target = jax.random.randint(kt, (batch, max_length), 0, vocab, dtype=jnp.int32)

    ref = decoder_ref(params, (h0, c0), target, sos=sos)

    # Run 1: f32 matmuls, chunked time loop (t padding), 2 batch tiles (the v7x
    # dual-TC "parallel" axis), and 2 output tiles (streaming two-pass softmax).
    out = decoder_forward(params, (h0, c0), target, sos=sos,
                          matmul_dtype=jnp.float32, t_chunk=4, batch_tile=8,
                          o_tile=128)
    out = jax.block_until_ready(out)
    assert out.shape == (batch, max_length, output_size)
    assert bool(jnp.all(jnp.isfinite(out)))
    assert bool(jnp.allclose(out, ref, atol=1e-3, rtol=1e-3)), "f32 mismatch vs reference"

    # Run 2: bf16 matmul operands (f32 accumulation / f32 cell math), auto tiling.
    out_bf = decoder_forward(params, (h0, c0), target, sos=sos,
                             matmul_dtype=jnp.bfloat16)
    out_bf = jax.block_until_ready(out_bf)
    assert out_bf.shape == (batch, max_length, output_size)
    assert bool(jnp.all(jnp.isfinite(out_bf)))
    assert bool(jnp.allclose(out_bf, ref, atol=1.5e-1, rtol=1.5e-1)), "bf16 mismatch vs reference"

    print("KERNEL_OK")
</pallas_src>

<mosaic_0001>
module attributes {stable_mosaic.version = 11 : i64} {
  func.func @lstm_kernel(%arg0: i32, %arg1: i32, %arg2: memref<4x8x1xi32, #tpu.memory_space<vmem>>, %arg3: memref<2x8x32xf32, #tpu.memory_space<vmem>>, %arg4: memref<2x8x32xf32, #tpu.memory_space<vmem>>, %arg5: memref<11x128xf32, #tpu.memory_space<vmem>>, %arg6: memref<2x64x128xf32, #tpu.memory_space<vmem>>, %arg7: memref<2x1x128xf32, #tpu.memory_space<vmem>>, %arg8: memref<4x8x32xf32, #tpu.memory_space<vmem>>, %arg9: memref<2x8x32xf32, #tpu.memory_space<vmem>>, %arg10: memref<2x8x32xf32, #tpu.memory_space<vmem>>, %arg11: memref<4x8x128xf32, #tpu.memory_space<vmem>>) attributes {dimension_semantics = [#tpu.dimension_semantics<parallel>, #tpu.dimension_semantics<arbitrary>], iteration_bounds = array<i64: 2, 3>, scalar_prefetch = 0 : i64, scratch_operands = 3 : i64, tpu.core_type = #tpu.core_type<tc>, window_params = [{transform_indices = @transform_0, window_bounds = array<i64: 4, 8, 1>}, {transform_indices = @transform_1, window_bounds = array<i64: 2, 8, 32>}, {transform_indices = @transform_2, window_bounds = array<i64: 2, 8, 32>}, {pipeline_mode = #tpu.pipeline_mode<synchronous>, transform_indices = @transform_3, window_bounds = array<i64: 11, 128>}, {pipeline_mode = #tpu.pipeline_mode<synchronous>, transform_indices = @transform_4, window_bounds = array<i64: 2, 64, 128>}, {pipeline_mode = #tpu.pipeline_mode<synchronous>, transform_indices = @transform_5, window_bounds = array<i64: 2, 1, 128>}, {transform_indices = @transform_6, window_bounds = array<i64: 4, 8, 32>}]} {
    %c0_i32 = arith.constant 0 : i32
    %0 = arith.cmpi eq, %arg1, %c0_i32 : i32
    %1 = arith.extui %0 : i1 to i32
    %c0_i32_0 = arith.constant 0 : i32
    %2 = arith.cmpi ne, %1, %c0_i32_0 : i32
    scf.if %2 {
      %c0_199 = arith.constant 0 : index
      %c0_200 = arith.constant 0 : index
      %c0_201 = arith.constant 0 : index
      %366 = vector.load %arg3[%c0_199, %c0_200, %c0_201] : memref<2x8x32xf32, #tpu.memory_space<vmem>>, vector<2x8x32xf32>
      %c0_202 = arith.constant 0 : index
      %c0_203 = arith.constant 0 : index
      %c0_204 = arith.constant 0 : index
      %367 = vector.load %arg9[%c0_202, %c0_203, %c0_204] : memref<2x8x32xf32, #tpu.memory_space<vmem>>, vector<2x8x32xf32>
      tpu.vector_store %arg9[%c0_202, %c0_203, %c0_204], %366 {strides = array<i32>} : memref<2x8x32xf32, #tpu.memory_space<vmem>>, vector<2x8x32xf32>,
      %c0_205 = arith.constant 0 : index
      %c0_206 = arith.constant 0 : index
      %c0_207 = arith.constant 0 : index
      %368 = vector.load %arg4[%c0_205, %c0_206, %c0_207] : memref<2x8x32xf32, #tpu.memory_space<vmem>>, vector<2x8x32xf32>
      %c0_208 = arith.constant 0 : index
      %c0_209 = arith.constant 0 : index
      %c0_210 = arith.constant 0 : index
      %369 = vector.load %arg10[%c0_208, %c0_209, %c0_210] : memref<2x8x32xf32, #tpu.memory_space<vmem>>, vector<2x8x32xf32>
      tpu.vector_store %arg10[%c0_208, %c0_209, %c0_210], %368 {strides = array<i32>} : memref<2x8x32xf32, #tpu.memory_space<vmem>>, vector<2x8x32xf32>,
    } else {
    }
    %c0 = arith.constant 0 : index
    %c0_1 = arith.constant 0 : index
    %c0_2 = arith.constant 0 : index
    %3 = vector.load %arg2[%c0, %c0_1, %c0_2] : memref<4x8x1xi32, #tpu.memory_space<vmem>>, vector<4x8x1xi32>
    %4 = vector.shape_cast %3 : vector<4x8x1xi32> to vector<32x1xi32>
    %5 = tpu.iota {dimensions = array<i32: 1>} : vector<32x11xi32>
    %6 = vector.broadcast %4 : vector<32x1xi32> to vector<32x11xi32>
    %7 = arith.cmpi eq, %6, %5 : vector<32x11xi32>
    %8 = arith.extui %7 : vector<32x11xi1> to vector<32x11xi32>
    %9 = arith.sitofp %8 : vector<32x11xi32> to vector<32x11xf32>
    %c0_3 = arith.constant 0 : index
    %c0_4 = arith.constant 0 : index
    %10 = vector.load %arg5[%c0_3, %c0_4] : memref<11x128xf32, #tpu.memory_space<vmem>>, vector<11x128xf32>
    %cst = arith.constant dense<0.000000e+00> : vector<32x128xf32>
    %11 = tpu.matmul %9, %10, %cst {dimension_numbers = #tpu.dot_dimension_numbers<[1], [0], [0], [1], [0, 0, 1, 1], [], []>, precision = #tpu.contract_precision<fp32>} : vector<32x11xf32>, vector<11x128xf32>, vector<32x128xf32> -> vector<32x128xf32>
    %12 = vector.shape_cast %11 : vector<32x128xf32> to vector<4x8x128xf32>
    %c0_5 = arith.constant 0 : index
    %c0_6 = arith.constant 0 : index
    %c0_7 = arith.constant 0 : index
    %13 = vector.load %arg11[%c0_5, %c0_6, %c0_7] : memref<4x8x128xf32, #tpu.memory_space<vmem>>, vector<4x8x128xf32>
    tpu.vector_store %arg11[%c0_5, %c0_6, %c0_7], %12 {strides = array<i32>} : memref<4x8x128xf32, #tpu.memory_space<vmem>>, vector<4x8x128xf32>,
    %c1 = arith.constant 1 : index
    %c0_8 = arith.constant 0 : index
    %c0_9 = arith.constant 0 : index
    %14 = vector.load %arg7[%c1, %c0_8, %c0_9] : memref<2x1x128xf32, #tpu.memory_space<vmem>>, vector<1x1x128xf32>
    %15 = vector.shape_cast %14 : vector<1x1x128xf32> to vector<1x128xf32>
    %16 = vector.shape_cast %15 : vector<1x128xf32> to vector<1x128xf32>
    %17 = vector.broadcast %16 : vector<1x128xf32> to vector<8x128xf32>
    %c0_10 = arith.constant 0 : index
    %c0_11 = arith.constant 0 : index
    %c0_12 = arith.constant 0 : index
    %18 = vector.load %arg9[%c0_10, %c0_11, %c0_12] : memref<2x8x32xf32, #tpu.memory_space<vmem>>, vector<1x8x32xf32>
    %19 = vector.shape_cast %18 : vector<1x8x32xf32> to vector<8x32xf32>
    %c0_13 = arith.constant 0 : index
    %c0_14 = arith.constant 0 : index
    %c0_15 = arith.constant 0 : index
    %20 = vector.load %arg11[%c0_13, %c0_14, %c0_15] : memref<4x8x128xf32, #tpu.memory_space<vmem>>, vector<1x8x128xf32>
    %21 = vector.shape_cast %20 : vector<1x8x128xf32> to vector<8x128xf32>
    %c0_16 = arith.constant 0 : index
    %c32 = arith.constant 32 : index
    %c0_17 = arith.constant 0 : index
    %22 = vector.load %arg6[%c0_16, %c32, %c0_17] : memref<2x64x128xf32, #tpu.memory_space<vmem>>, vector<1x32x128xf32>
    %23 = vector.shape_cast %22 : vector<1x32x128xf32> to vector<32x128xf32>
    %cst_18 = arith.constant dense<0.000000e+00> : vector<8x128xf32>
    %24 = tpu.matmul %19, %23, %cst_18 {dimension_numbers = #tpu.dot_dimension_numbers<[1], [0], [0], [1], [0, 0, 1, 1], [], []>, precision = #tpu.contract_precision<fp32>} : vector<8x32xf32>, vector<32x128xf32>, vector<8x128xf32> -> vector<8x128xf32>
    %25 = arith.addf %21, %24 : vector<8x128xf32>
    %c0_19 = arith.constant 0 : index
    %c0_20 = arith.constant 0 : index
    %c0_21 = arith.constant 0 : index
    %26 = vector.load %arg10[%c0_19, %c0_20, %c0_21] : memref<2x8x32xf32, #tpu.memory_space<vmem>>, vector<1x8x32xf32>
    %27 = vector.shape_cast %26 : vector<1x8x32xf32> to vector<8x32xf32>
    %28 = vector.extract_strided_slice %25 {offsets = [0, 0], sizes = [8, 32], strides = [1, 1]} : vector<8x128xf32> to vector<8x32xf32>
    %29 = arith.negf %28 : vector<8x32xf32>
    %30 = math.exp %29 : vector<8x32xf32>
    %cst_22 = arith.constant 1.000000e+00 : f32
    %31 = vector.broadcast %cst_22 : f32 to vector<8x32xf32>
    %32 = arith.addf %31, %30 : vector<8x32xf32>
    %33 = arith.divf %31, %32 : vector<8x32xf32>
    %34 = vector.extract_strided_slice %25 {offsets = [0, 32], sizes = [8, 32], strides = [1, 1]} : vector<8x128xf32> to vector<8x32xf32>
    %35 = arith.negf %34 : vector<8x32xf32>
    %36 = math.exp %35 : vector<8x32xf32>
    %cst_23 = arith.constant 1.000000e+00 : f32
    %37 = vector.broadcast %cst_23 : f32 to vector<8x32xf32>
    %38 = arith.addf %37, %36 : vector<8x32xf32>
    %39 = arith.divf %37, %38 : vector<8x32xf32>
    %40 = vector.extract_strided_slice %25 {offsets = [0, 64], sizes = [8, 32], strides = [1, 1]} : vector<8x128xf32> to vector<8x32xf32>
    %41 = math.tanh %40 : vector<8x32xf32>
    %42 = vector.extract_strided_slice %25 {offsets = [0, 96], sizes = [8, 32], strides = [1, 1]} : vector<8x128xf32> to vector<8x32xf32>
    %43 = arith.negf %42 : vector<8x32xf32>
    %44 = math.exp %43 : vector<8x32xf32>
    %cst_24 = arith.constant 1.000000e+00 : f32
    %45 = vector.broadcast %cst_24 : f32 to vector<8x32xf32>
    %46 = arith.addf %45, %44 : vector<8x32xf32>
    %47 = arith.divf %45, %46 : vector<8x32xf32>
    %48 = arith.mulf %39, %27 : vector<8x32xf32>
    %49 = arith.mulf %33, %41 : vector<8x32xf32>
    %50 = arith.addf %48, %49 : vector<8x32xf32>
    %51 = math.tanh %50 : vector<8x32xf32>
    %52 = arith.mulf %47, %51 : vector<8x32xf32>
    %c0_25 = arith.constant 0 : index
    %c0_26 = arith.constant 0 : index
    %c0_27 = arith.constant 0 : index
    %53 = vector.load %arg9[%c0_25, %c0_26, %c0_27] : memref<2x8x32xf32, #tpu.memory_space<vmem>>, vector<1x8x32xf32>
    %54 = vector.shape_cast %53 : vector<1x8x32xf32> to vector<8x32xf32>
    %55 = vector.shape_cast %52 : vector<8x32xf32> to vector<1x8x32xf32>
    tpu.vector_store %arg9[%c0_25, %c0_26, %c0_27], %55 {strides = array<i32>} : memref<2x8x32xf32, #tpu.memory_space<vmem>>, vector<1x8x32xf32>,
    %c0_28 = arith.constant 0 : index
    %c0_29 = arith.constant 0 : index
    %c0_30 = arith.constant 0 : index
    %56 = vector.load %arg10[%c0_28, %c0_29, %c0_30] : memref<2x8x32xf32, #tpu.memory_space<vmem>>, vector<1x8x32xf32>
    %57 = vector.shape_cast %56 : vector<1x8x32xf32> to vector<8x32xf32>
    %58 = vector.shape_cast %50 : vector<8x32xf32> to vector<1x8x32xf32>
    tpu.vector_store %arg10[%c0_28, %c0_29, %c0_30], %58 {strides = array<i32>} : memref<2x8x32xf32, #tpu.memory_space<vmem>>, vector<1x8x32xf32>,
    %c0_31 = arith.constant 0 : index
    %c0_32 = arith.constant 0 : index
    %c0_33 = arith.constant 0 : index
    %59 = vector.load %arg9[%c0_31, %c0_32, %c0_33] : memref<2x8x32xf32, #tpu.memory_space<vmem>>, vector<1x8x32xf32>
    %60 = vector.shape_cast %59 : vector<1x8x32xf32> to vector<8x32xf32>
    %c1_34 = arith.constant 1 : index
    %c0_35 = arith.constant 0 : index
    %c0_36 = arith.constant 0 : index
    %61 = vector.load %arg11[%c1_34, %c0_35, %c0_36] : memref<4x8x128xf32, #tpu.memory_space<vmem>>, vector<1x8x128xf32>
    %62 = vector.shape_cast %61 : vector<1x8x128xf32> to vector<8x128xf32>
    %c0_37 = arith.constant 0 : index
    %c32_38 = arith.constant 32 : index
    %c0_39 = arith.constant 0 : index
    %63 = vector.load %arg6[%c0_37, %c32_38, %c0_39] : memref<2x64x128xf32, #tpu.memory_space<vmem>>, vector<1x32x128xf32>
    %64 = vector.shape_cast %63 : vector<1x32x128xf32> to vector<32x128xf32>
    %cst_40 = arith.constant dense<0.000000e+00> : vector<8x128xf32>
    %65 = tpu.matmul %60, %64, %cst_40 {dimension_numbers = #tpu.dot_dimension_numbers<[1], [0], [0], [1], [0, 0, 1, 1], [], []>, precision = #tpu.contract_precision<fp32>} : vector<8x32xf32>, vector<32x128xf32>, vector<8x128xf32> -> vector<8x128xf32>
    %66 = arith.addf %62, %65 : vector<8x128xf32>
    %c0_41 = arith.constant 0 : index
    %c0_42 = arith.constant 0 : index
    %c0_43 = arith.constant 0 : index
    %67 = vector.load %arg10[%c0_41, %c0_42, %c0_43] : memref<2x8x32xf32, #tpu.memory_space<vmem>>, vector<1x8x32xf32>
    %68 = vector.shape_cast %67 : vector<1x8x32xf32> to vector<8x32xf32>
    %69 = vector.extract_strided_slice %66 {offsets = [0, 0], sizes = [8, 32], strides = [1, 1]} : vector<8x128xf32> to vector<8x32xf32>
    %70 = arith.negf %69 : vector<8x32xf32>
    %71 = math.exp %70 : vector<8x32xf32>
    %cst_44 = arith.constant 1.000000e+00 : f32
    %72 = vector.broadcast %cst_44 : f32 to vector<8x32xf32>
    %73 = arith.addf %72, %71 : vector<8x32xf32>
    %74 = arith.divf %72, %73 : vector<8x32xf32>
    %75 = vector.extract_strided_slice %66 {offsets = [0, 32], sizes = [8, 32], strides = [1, 1]} : vector<8x128xf32> to vector<8x32xf32>
    %76 = arith.negf %75 : vector<8x32xf32>
    %77 = math.exp %76 : vector<8x32xf32>
    %cst_45 = arith.constant 1.000000e+00 : f32
    %78 = vector.broadcast %cst_45 : f32 to vector<8x32xf32>
    %79 = arith.addf %78, %77 : vector<8x32xf32>
    %80 = arith.divf %78, %79 : vector<8x32xf32>
    %81 = vector.extract_strided_slice %66 {offsets = [0, 64], sizes = [8, 32], strides = [1, 1]} : vector<8x128xf32> to vector<8x32xf32>
    %82 = math.tanh %81 : vector<8x32xf32>
    %83 = vector.extract_strided_slice %66 {offsets = [0, 96], sizes = [8, 32], strides = [1, 1]} : vector<8x128xf32> to vector<8x32xf32>
    %84 = arith.negf %83 : vector<8x32xf32>
    %85 = math.exp %84 : vector<8x32xf32>
    %cst_46 = arith.constant 1.000000e+00 : f32
    %86 = vector.broadcast %cst_46 : f32 to vector<8x32xf32>
    %87 = arith.addf %86, %85 : vector<8x32xf32>
    %88 = arith.divf %86, %87 : vector<8x32xf32>
    %89 = arith.mulf %80, %68 : vector<8x32xf32>
    %90 = arith.mulf %74, %82 : vector<8x32xf32>
    %91 = arith.addf %89, %90 : vector<8x32xf32>
    %92 = math.tanh %91 : vector<8x32xf32>
    %93 = arith.mulf %88, %92 : vector<8x32xf32>
    %c0_47 = arith.constant 0 : index
    %c0_48 = arith.constant 0 : index
    %c0_49 = arith.constant 0 : index
    %94 = vector.load %arg9[%c0_47, %c0_48, %c0_49] : memref<2x8x32xf32, #tpu.memory_space<vmem>>, vector<1x8x32xf32>
    %95 = vector.shape_cast %94 : vector<1x8x32xf32> to vector<8x32xf32>
    %96 = vector.shape_cast %93 : vector<8x32xf32> to vector<1x8x32xf32>
    tpu.vector_store %arg9[%c0_47, %c0_48, %c0_49], %96 {strides = array<i32>} : memref<2x8x32xf32, #tpu.memory_space<vmem>>, vector<1x8x32xf32>,
    %c0_50 = arith.constant 0 : index
    %c0_51 = arith.constant 0 : index
    %c0_52 = arith.constant 0 : index
    %97 = vector.load %arg10[%c0_50, %c0_51, %c0_52] : memref<2x8x32xf32, #tpu.memory_space<vmem>>, vector<1x8x32xf32>
    %98 = vector.shape_cast %97 : vector<1x8x32xf32> to vector<8x32xf32>
    %99 = vector.shape_cast %91 : vector<8x32xf32> to vector<1x8x32xf32>
    tpu.vector_store %arg10[%c0_50, %c0_51, %c0_52], %99 {strides = array<i32>} : memref<2x8x32xf32, #tpu.memory_space<vmem>>, vector<1x8x32xf32>,
    %c1_53 = arith.constant 1 : index
    %c0_54 = arith.constant 0 : index
    %c0_55 = arith.constant 0 : index
    %100 = vector.load %arg9[%c1_53, %c0_54, %c0_55] : memref<2x8x32xf32, #tpu.memory_space<vmem>>, vector<1x8x32xf32>
    %101 = vector.shape_cast %100 : vector<1x8x32xf32> to vector<8x32xf32>
    %c1_56 = arith.constant 1 : index
    %c0_57 = arith.constant 0 : index
    %c0_58 = arith.constant 0 : index
    %102 = vector.load %arg6[%c1_56, %c0_57, %c0_58] : memref<2x64x128xf32, #tpu.memory_space<vmem>>, vector<1x32x128xf32>
    %103 = vector.shape_cast %102 : vector<1x32x128xf32> to vector<32x128xf32>
    %cst_59 = arith.constant dense<0.000000e+00> : vector<8x128xf32>
    %104 = tpu.matmul %52, %103, %cst_59 {dimension_numbers = #tpu.dot_dimension_numbers<[1], [0], [0], [1], [0, 0, 1, 1], [], []>, precision = #tpu.contract_precision<fp32>} : vector<8x32xf32>, vector<32x128xf32>, vector<8x128xf32> -> vector<8x128xf32>
    %c1_60 = arith.constant 1 : index
    %c32_61 = arith.constant 32 : index
    %c0_62 = arith.constant 0 : index
    %105 = vector.load %arg6[%c1_60, %c32_61, %c0_62] : memref<2x64x128xf32, #tpu.memory_space<vmem>>, vector<1x32x128xf32>
    %106 = vector.shape_cast %105 : vector<1x32x128xf32> to vector<32x128xf32>
    %cst_63 = arith.constant dense<0.000000e+00> : vector<8x128xf32>
    %107 = tpu.matmul %101, %106, %cst_63 {dimension_numbers = #tpu.dot_dimension_numbers<[1], [0], [0], [1], [0, 0, 1, 1], [], []>, precision = #tpu.contract_precision<fp32>} : vector<8x32xf32>, vector<32x128xf32>, vector<8x128xf32> -> vector<8x128xf32>
    %108 = arith.addf %104, %107 : vector<8x128xf32>
    %109 = arith.addf %108, %17 : vector<8x128xf32>
    %c1_64 = arith.constant 1 : index
    %c0_65 = arith.constant 0 : index
    %c0_66 = arith.constant 0 : index
    %110 = vector.load %arg10[%c1_64, %c0_65, %c0_66] : memref<2x8x32xf32, #tpu.memory_space<vmem>>, vector<1x8x32xf32>
    %111 = vector.shape_cast %110 : vector<1x8x32xf32> to vector<8x32xf32>
    %112 = vector.extract_strided_slice %109 {offsets = [0, 0], sizes = [8, 32], strides = [1, 1]} : vector<8x128xf32> to vector<8x32xf32>
    %113 = arith.negf %112 : vector<8x32xf32>
    %114 = math.exp %113 : vector<8x32xf32>
    %cst_67 = arith.constant 1.000000e+00 : f32
    %115 = vector.broadcast %cst_67 : f32 to vector<8x32xf32>
    %116 = arith.addf %115, %114 : vector<8x32xf32>
    %117 = arith.divf %115, %116 : vector<8x32xf32>
    %118 = vector.extract_strided_slice %109 {offsets = [0, 32], sizes = [8, 32], strides = [1, 1]} : vector<8x128xf32> to vector<8x32xf32>
    %119 = arith.negf %118 : vector<8x32xf32>
    %120 = math.exp %119 : vector<8x32xf32>
    %cst_68 = arith.constant 1.000000e+00 : f32
    %121 = vector.broadcast %cst_68 : f32 to vector<8x32xf32>
    %122 = arith.addf %121, %120 : vector<8x32xf32>
    %123 = arith.divf %121, %122 : vector<8x32xf32>
    %124 = vector.extract_strided_slice %109 {offsets = [0, 64], sizes = [8, 32], strides = [1, 1]} : vector<8x128xf32> to vector<8x32xf32>
    %125 = math.tanh %124 : vector<8x32xf32>
    %126 = vector.extract_strided_slice %109 {offsets = [0, 96], sizes = [8, 32], strides = [1, 1]} : vector<8x128xf32> to vector<8x32xf32>
    %127 = arith.negf %126 : vector<8x32xf32>
    %128 = math.exp %127 : vector<8x32xf32>
    %cst_69 = arith.constant 1.000000e+00 : f32
    %129 = vector.broadcast %cst_69 : f32 to vector<8x32xf32>
    %130 = arith.addf %129, %128 : vector<8x32xf32>
    %131 = arith.divf %129, %130 : vector<8x32xf32>
    %132 = arith.mulf %123, %111 : vector<8x32xf32>
    %133 = arith.mulf %117, %125 : vector<8x32xf32>
    %134 = arith.addf %132, %133 : vector<8x32xf32>
    %135 = math.tanh %134 : vector<8x32xf32>
    %136 = arith.mulf %131, %135 : vector<8x32xf32>
    %c1_70 = arith.constant 1 : index
    %c0_71 = arith.constant 0 : index
    %c0_72 = arith.constant 0 : index
    %137 = vector.load %arg9[%c1_70, %c0_71, %c0_72] : memref<2x8x32xf32, #tpu.memory_space<vmem>>, vector<1x8x32xf32>
    %138 = vector.shape_cast %137 : vector<1x8x32xf32> to vector<8x32xf32>
    %139 = vector.shape_cast %136 : vector<8x32xf32> to vector<1x8x32xf32>
    tpu.vector_store %arg9[%c1_70, %c0_71, %c0_72], %139 {strides = array<i32>} : memref<2x8x32xf32, #tpu.memory_space<vmem>>, vector<1x8x32xf32>,
    %c1_73 = arith.constant 1 : index
    %c0_74 = arith.constant 0 : index
    %c0_75 = arith.constant 0 : index
    %140 = vector.load %arg10[%c1_73, %c0_74, %c0_75] : memref<2x8x32xf32, #tpu.memory_space<vmem>>, vector<1x8x32xf32>
    %141 = vector.shape_cast %140 : vector<1x8x32xf32> to vector<8x32xf32>
    %142 = vector.shape_cast %134 : vector<8x32xf32> to vector<1x8x32xf32>
    tpu.vector_store %arg10[%c1_73, %c0_74, %c0_75], %142 {strides = array<i32>} : memref<2x8x32xf32, #tpu.memory_space<vmem>>, vector<1x8x32xf32>,
    %c0_76 = arith.constant 0 : index
    %c0_77 = arith.constant 0 : index
    %c0_78 = arith.constant 0 : index
    %143 = vector.load %arg8[%c0_76, %c0_77, %c0_78] : memref<4x8x32xf32, #tpu.memory_space<vmem>>, vector<1x8x32xf32>
    %144 = vector.shape_cast %143 : vector<1x8x32xf32> to vector<8x32xf32>
    %145 = vector.shape_cast %136 : vector<8x32xf32> to vector<1x8x32xf32>
    tpu.vector_store %arg8[%c0_76, %c0_77, %c0_78], %145 {strides = array<i32>} : memref<4x8x32xf32, #tpu.memory_space<vmem>>, vector<1x8x32xf32>,
    %c0_79 = arith.constant 0 : index
    %c0_80 = arith.constant 0 : index
    %c0_81 = arith.constant 0 : index
    %146 = vector.load %arg9[%c0_79, %c0_80, %c0_81] : memref<2x8x32xf32, #tpu.memory_space<vmem>>, vector<1x8x32xf32>
    %147 = vector.shape_cast %146 : vector<1x8x32xf32> to vector<8x32xf32>
    %c2 = arith.constant 2 : index
    %c0_82 = arith.constant 0 : index
    %c0_83 = arith.constant 0 : index
    %148 = vector.load %arg11[%c2, %c0_82, %c0_83] : memref<4x8x128xf32, #tpu.memory_space<vmem>>, vector<1x8x128xf32>
    %149 = vector.shape_cast %148 : vector<1x8x128xf32> to vector<8x128xf32>
    %c0_84 = arith.constant 0 : index
    %c32_85 = arith.constant 32 : index
    %c0_86 = arith.constant 0 : index
    %150 = vector.load %arg6[%c0_84, %c32_85, %c0_86] : memref<2x64x128xf32, #tpu.memory_space<vmem>>, vector<1x32x128xf32>
    %151 = vector.shape_cast %150 : vector<1x32x128xf32> to vector<32x128xf32>
    %cst_87 = arith.constant dense<0.000000e+00> : vector<8x128xf32>
    %152 = tpu.matmul %147, %151, %cst_87 {dimension_numbers = #tpu.dot_dimension_numbers<[1], [0], [0], [1], [0, 0, 1, 1], [], []>, precision = #tpu.contract_precision<fp32>} : vector<8x32xf32>, vector<32x128xf32>, vector<8x128xf32> -> vector<8x128xf32>
    %153 = arith.addf %149, %152 : vector<8x128xf32>
    %c0_88 = arith.constant 0 : index
    %c0_89 = arith.constant 0 : index
    %c0_90 = arith.constant 0 : index
    %154 = vector.load %arg10[%c0_88, %c0_89, %c0_90] : memref<2x8x32xf32, #tpu.memory_space<vmem>>, vector<1x8x32xf32>
    %155 = vector.shape_cast %154 : vector<1x8x32xf32> to vector<8x32xf32>
    %156 = vector.extract_strided_slice %153 {offsets = [0, 0], sizes = [8, 32], strides = [1, 1]} : vector<8x128xf32> to vector<8x32xf32>
    %157 = arith.negf %156 : vector<8x32xf32>
    %158 = math.exp %157 : vector<8x32xf32>
    %cst_91 = arith.constant 1.000000e+00 : f32
    %159 = vector.broadcast %cst_91 : f32 to vector<8x32xf32>
    %160 = arith.addf %159, %158 : vector<8x32xf32>
    %161 = arith.divf %159, %160 : vector<8x32xf32>
    %162 = vector.extract_strided_slice %153 {offsets = [0, 32], sizes = [8, 32], strides = [1, 1]} : vector<8x128xf32> to vector<8x32xf32>
    %163 = arith.negf %162 : vector<8x32xf32>
    %164 = math.exp %163 : vector<8x32xf32>
    %cst_92 = arith.constant 1.000000e+00 : f32
    %165 = vector.broadcast %cst_92 : f32 to vector<8x32xf32>
    %166 = arith.addf %165, %164 : vector<8x32xf32>
    %167 = arith.divf %165, %166 : vector<8x32xf32>
    %168 = vector.extract_strided_slice %153 {offsets = [0, 64], sizes = [8, 32], strides = [1, 1]} : vector<8x128xf32> to vector<8x32xf32>
    %169 = math.tanh %168 : vector<8x32xf32>
    %170 = vector.extract_strided_slice %153 {offsets = [0, 96], sizes = [8, 32], strides = [1, 1]} : vector<8x128xf32> to vector<8x32xf32>
    %171 = arith.negf %170 : vector<8x32xf32>
    %172 = math.exp %171 : vector<8x32xf32>
    %cst_93 = arith.constant 1.000000e+00 : f32
    %173 = vector.broadcast %cst_93 : f32 to vector<8x32xf32>
    %174 = arith.addf %173, %172 : vector<8x32xf32>
    %175 = arith.divf %173, %174 : vector<8x32xf32>
    %176 = arith.mulf %167, %155 : vector<8x32xf32>
    %177 = arith.mulf %161, %169 : vector<8x32xf32>
    %178 = arith.addf %176, %177 : vector<8x32xf32>
    %179 = math.tanh %178 : vector<8x32xf32>
    %180 = arith.mulf %175, %179 : vector<8x32xf32>
    %c0_94 = arith.constant 0 : index
    %c0_95 = arith.constant 0 : index
    %c0_96 = arith.constant 0 : index
    %181 = vector.load %arg9[%c0_94, %c0_95, %c0_96] : memref<2x8x32xf32, #tpu.memory_space<vmem>>, vector<1x8x32xf32>
    %182 = vector.shape_cast %181 : vector<1x8x32xf32> to vector<8x32xf32>
    %183 = vector.shape_cast %180 : vector<8x32xf32> to vector<1x8x32xf32>
    tpu.vector_store %arg9[%c0_94, %c0_95, %c0_96], %183 {strides = array<i32>} : memref<2x8x32xf32, #tpu.memory_space<vmem>>, vector<1x8x32xf32>,
    %c0_97 = arith.constant 0 : index
    %c0_98 = arith.constant 0 : index
    %c0_99 = arith.constant 0 : index
    %184 = vector.load %arg10[%c0_97, %c0_98, %c0_99] : memref<2x8x32xf32, #tpu.memory_space<vmem>>, vector<1x8x32xf32>
    %185 = vector.shape_cast %184 : vector<1x8x32xf32> to vector<8x32xf32>
    %186 = vector.shape_cast %178 : vector<8x32xf32> to vector<1x8x32xf32>
    tpu.vector_store %arg10[%c0_97, %c0_98, %c0_99], %186 {strides = array<i32>} : memref<2x8x32xf32, #tpu.memory_space<vmem>>, vector<1x8x32xf32>,
    %c1_100 = arith.constant 1 : index
    %c0_101 = arith.constant 0 : index
    %c0_102 = arith.constant 0 : index
    %187 = vector.load %arg9[%c1_100, %c0_101, %c0_102] : memref<2x8x32xf32, #tpu.memory_space<vmem>>, vector<1x8x32xf32>
    %188 = vector.shape_cast %187 : vector<1x8x32xf32> to vector<8x32xf32>
    %c1_103 = arith.constant 1 : index
    %c0_104 = arith.constant 0 : index
    %c0_105 = arith.constant 0 : index
    %189 = vector.load %arg6[%c1_103, %c0_104, %c0_105] : memref<2x64x128xf32, #tpu.memory_space<vmem>>, vector<1x32x128xf32>
    %190 = vector.shape_cast %189 : vector<1x32x128xf32> to vector<32x128xf32>
    %cst_106 = arith.constant dense<0.000000e+00> : vector<8x128xf32>
    %191 = tpu.matmul %93, %190, %cst_106 {dimension_numbers = #tpu.dot_dimension_numbers<[1], [0], [0], [1], [0, 0, 1, 1], [], []>, precision = #tpu.contract_precision<fp32>} : vector<8x32xf32>, vector<32x128xf32>, vector<8x128xf32> -> vector<8x128xf32>
    %c1_107 = arith.constant 1 : index
    %c32_108 = arith.constant 32 : index
    %c0_109 = arith.constant 0 : index
    %192 = vector.load %arg6[%c1_107, %c32_108, %c0_109] : memref<2x64x128xf32, #tpu.memory_space<vmem>>, vector<1x32x128xf32>
    %193 = vector.shape_cast %192 : vector<1x32x128xf32> to vector<32x128xf32>
    %cst_110 = arith.constant dense<0.000000e+00> : vector<8x128xf32>
    %194 = tpu.matmul %188, %193, %cst_110 {dimension_numbers = #tpu.dot_dimension_numbers<[1], [0], [0], [1], [0, 0, 1, 1], [], []>, precision = #tpu.contract_precision<fp32>} : vector<8x32xf32>, vector<32x128xf32>, vector<8x128xf32> -> vector<8x128xf32>
    %195 = arith.addf %191, %194 : vector<8x128xf32>
    %196 = arith.addf %195, %17 : vector<8x128xf32>
    %c1_111 = arith.constant 1 : index
    %c0_112 = arith.constant 0 : index
    %c0_113 = arith.constant 0 : index
    %197 = vector.load %arg10[%c1_111, %c0_112, %c0_113] : memref<2x8x32xf32, #tpu.memory_space<vmem>>, vector<1x8x32xf32>
    %198 = vector.shape_cast %197 : vector<1x8x32xf32> to vector<8x32xf32>
    %199 = vector.extract_strided_slice %196 {offsets = [0, 0], sizes = [8, 32], strides = [1, 1]} : vector<8x128xf32> to vector<8x32xf32>
    %200 = arith.negf %199 : vector<8x32xf32>
    %201 = math.exp %200 : vector<8x32xf32>
    %cst_114 = arith.constant 1.000000e+00 : f32
    %202 = vector.broadcast %cst_114 : f32 to vector<8x32xf32>
    %203 = arith.addf %202, %201 : vector<8x32xf32>
    %204 = arith.divf %202, %203 : vector<8x32xf32>
    %205 = vector.extract_strided_slice %196 {offsets = [0, 32], sizes = [8, 32], strides = [1, 1]} : vector<8x128xf32> to vector<8x32xf32>
    %206 = arith.negf %205 : vector<8x32xf32>
    %207 = math.exp %206 : vector<8x32xf32>
    %cst_115 = arith.constant 1.000000e+00 : f32
    %208 = vector.broadcast %cst_115 : f32 to vector<8x32xf32>
    %209 = arith.addf %208, %207 : vector<8x32xf32>
    %210 = arith.divf %208, %209 : vector<8x32xf32>
    %211 = vector.extract_strided_slice %196 {offsets = [0, 64], sizes = [8, 32], strides = [1, 1]} : vector<8x128xf32> to vector<8x32xf32>
    %212 = math.tanh %211 : vector<8x32xf32>
    %213 = vector.extract_strided_slice %196 {offsets = [0, 96], sizes = [8, 32], strides = [1, 1]} : vector<8x128xf32> to vector<8x32xf32>
    %214 = arith.negf %213 : vector<8x32xf32>
    %215 = math.exp %214 : vector<8x32xf32>
    %cst_116 = arith.constant 1.000000e+00 : f32
    %216 = vector.broadcast %cst_116 : f32 to vector<8x32xf32>
    %217 = arith.addf %216, %215 : vector<8x32xf32>
    %218 = arith.divf %216, %217 : vector<8x32xf32>
    %219 = arith.mulf %210, %198 : vector<8x32xf32>
    %220 = arith.mulf %204, %212 : vector<8x32xf32>
    %221 = arith.addf %219, %220 : vector<8x32xf32>
    %222 = math.tanh %221 : vector<8x32xf32>
    %223 = arith.mulf %218, %222 : vector<8x32xf32>
    %c1_117 = arith.constant 1 : index
    %c0_118 = arith.constant 0 : index
    %c0_119 = arith.constant 0 : index
    %224 = vector.load %arg9[%c1_117, %c0_118, %c0_119] : memref<2x8x32xf32, #tpu.memory_space<vmem>>, vector<1x8x32xf32>
    %225 = vector.shape_cast %224 : vector<1x8x32xf32> to vector<8x32xf32>
    %226 = vector.shape_cast %223 : vector<8x32xf32> to vector<1x8x32xf32>
    tpu.vector_store %arg9[%c1_117, %c0_118, %c0_119], %226 {strides = array<i32>} : memref<2x8x32xf32, #tpu.memory_space<vmem>>, vector<1x8x32xf32>,
    %c1_120 = arith.constant 1 : index
    %c0_121 = arith.constant 0 : index
    %c0_122 = arith.constant 0 : index
    %227 = vector.load %arg10[%c1_120, %c0_121, %c0_122] : memref<2x8x32xf32, #tpu.memory_space<vmem>>, vector<1x8x32xf32>
    %228 = vector.shape_cast %227 : vector<1x8x32xf32> to vector<8x32xf32>
    %229 = vector.shape_cast %221 : vector<8x32xf32> to vector<1x8x32xf32>
    tpu.vector_store %arg10[%c1_120, %c0_121, %c0_122], %229 {strides = array<i32>} : memref<2x8x32xf32, #tpu.memory_space<vmem>>, vector<1x8x32xf32>,
    %c1_123 = arith.constant 1 : index
    %c0_124 = arith.constant 0 : index
    %c0_125 = arith.constant 0 : index
    %230 = vector.load %arg8[%c1_123, %c0_124, %c0_125] : memref<4x8x32xf32, #tpu.memory_space<vmem>>, vector<1x8x32xf32>
    %231 = vector.shape_cast %230 : vector<1x8x32xf32> to vector<8x32xf32>
    %232 = vector.shape_cast %223 : vector<8x32xf32> to vector<1x8x32xf32>
    tpu.vector_store %arg8[%c1_123, %c0_124, %c0_125], %232 {strides = array<i32>} : memref<4x8x32xf32, #tpu.memory_space<vmem>>, vector<1x8x32xf32>,
    %c0_126 = arith.constant 0 : index
    %c0_127 = arith.constant 0 : index
    %c0_128 = arith.constant 0 : index
    %233 = vector.load %arg9[%c0_126, %c0_127, %c0_128] : memref<2x8x32xf32, #tpu.memory_space<vmem>>, vector<1x8x32xf32>
    %234 = vector.shape_cast %233 : vector<1x8x32xf32> to vector<8x32xf32>
    %c3 = arith.constant 3 : index
    %c0_129 = arith.constant 0 : index
    %c0_130 = arith.constant 0 : index
    %235 = vector.load %arg11[%c3, %c0_129, %c0_130] : memref<4x8x128xf32, #tpu.memory_space<vmem>>, vector<1x8x128xf32>
    %236 = vector.shape_cast %235 : vector<1x8x128xf32> to vector<8x128xf32>
    %c0_131 = arith.constant 0 : index
    %c32_132 = arith.constant 32 : index
    %c0_133 = arith.constant 0 : index
    %237 = vector.load %arg6[%c0_131, %c32_132, %c0_133] : memref<2x64x128xf32, #tpu.memory_space<vmem>>, vector<1x32x128xf32>
    %238 = vector.shape_cast %237 : vector<1x32x128xf32> to vector<32x128xf32>
    %cst_134 = arith.constant dense<0.000000e+00> : vector<8x128xf32>
    %239 = tpu.matmul %234, %238, %cst_134 {dimension_numbers = #tpu.dot_dimension_numbers<[1], [0], [0], [1], [0, 0, 1, 1], [], []>, precision = #tpu.contract_precision<fp32>} : vector<8x32xf32>, vector<32x128xf32>, vector<8x128xf32> -> vector<8x128xf32>
    %240 = arith.addf %236, %239 : vector<8x128xf32>
    %c0_135 = arith.constant 0 : index
    %c0_136 = arith.constant 0 : index
    %c0_137 = arith.constant 0 : index
    %241 = vector.load %arg10[%c0_135, %c0_136, %c0_137] : memref<2x8x32xf32, #tpu.memory_space<vmem>>, vector<1x8x32xf32>
    %242 = vector.shape_cast %241 : vector<1x8x32xf32> to vector<8x32xf32>
    %243 = vector.extract_strided_slice %240 {offsets = [0, 0], sizes = [8, 32], strides = [1, 1]} : vector<8x128xf32> to vector<8x32xf32>
    %244 = arith.negf %243 : vector<8x32xf32>
    %245 = math.exp %244 : vector<8x32xf32>
    %cst_138 = arith.constant 1.000000e+00 : f32
    %246 = vector.broadcast %cst_138 : f32 to vector<8x32xf32>
    %247 = arith.addf %246, %245 : vector<8x32xf32>
    %248 = arith.divf %246, %247 : vector<8x32xf32>
    %249 = vector.extract_strided_slice %240 {offsets = [0, 32], sizes = [8, 32], strides = [1, 1]} : vector<8x128xf32> to vector<8x32xf32>
    %250 = arith.negf %249 : vector<8x32xf32>
    %251 = math.exp %250 : vector<8x32xf32>
    %cst_139 = arith.constant 1.000000e+00 : f32
    %252 = vector.broadcast %cst_139 : f32 to vector<8x32xf32>
    %253 = arith.addf %252, %251 : vector<8x32xf32>
    %254 = arith.divf %252, %253 : vector<8x32xf32>
    %255 = vector.extract_strided_slice %240 {offsets = [0, 64], sizes = [8, 32], strides = [1, 1]} : vector<8x128xf32> to vector<8x32xf32>
    %256 = math.tanh %255 : vector<8x32xf32>
    %257 = vector.extract_strided_slice %240 {offsets = [0, 96], sizes = [8, 32], strides = [1, 1]} : vector<8x128xf32> to vector<8x32xf32>
    %258 = arith.negf %257 : vector<8x32xf32>
    %259 = math.exp %258 : vector<8x32xf32>
    %cst_140 = arith.constant 1.000000e+00 : f32
    %260 = vector.broadcast %cst_140 : f32 to vector<8x32xf32>
    %261 = arith.addf %260, %259 : vector<8x32xf32>
    %262 = arith.divf %260, %261 : vector<8x32xf32>
    %263 = arith.mulf %254, %242 : vector<8x32xf32>
    %264 = arith.mulf %248, %256 : vector<8x32xf32>
    %265 = arith.addf %263, %264 : vector<8x32xf32>
    %266 = math.tanh %265 : vector<8x32xf32>
    %267 = arith.mulf %262, %266 : vector<8x32xf32>
    %c0_141 = arith.constant 0 : index
    %c0_142 = arith.constant 0 : index
    %c0_143 = arith.constant 0 : index
    %268 = vector.load %arg9[%c0_141, %c0_142, %c0_143] : memref<2x8x32xf32, #tpu.memory_space<vmem>>, vector<1x8x32xf32>
    %269 = vector.shape_cast %268 : vector<1x8x32xf32> to vector<8x32xf32>
    %270 = vector.shape_cast %267 : vector<8x32xf32> to vector<1x8x32xf32>
    tpu.vector_store %arg9[%c0_141, %c0_142, %c0_143], %270 {strides = array<i32>} : memref<2x8x32xf32, #tpu.memory_space<vmem>>, vector<1x8x32xf32>,
    %c0_144 = arith.constant 0 : index
    %c0_145 = arith.constant 0 : index
    %c0_146 = arith.constant 0 : index
    %271 = vector.load %arg10[%c0_144, %c0_145, %c0_146] : memref<2x8x32xf32, #tpu.memory_space<vmem>>, vector<1x8x32xf32>
    %272 = vector.shape_cast %271 : vector<1x8x32xf32> to vector<8x32xf32>
    %273 = vector.shape_cast %265 : vector<8x32xf32> to vector<1x8x32xf32>
    tpu.vector_store %arg10[%c0_144, %c0_145, %c0_146], %273 {strides = array<i32>} : memref<2x8x32xf32, #tpu.memory_space<vmem>>, vector<1x8x32xf32>,
    %c1_147 = arith.constant 1 : index
    %c0_148 = arith.constant 0 : index
    %c0_149 = arith.constant 0 : index
    %274 = vector.load %arg9[%c1_147, %c0_148, %c0_149] : memref<2x8x32xf32, #tpu.memory_space<vmem>>, vector<1x8x32xf32>
    %275 = vector.shape_cast %274 : vector<1x8x32xf32> to vector<8x32xf32>
    %c1_150 = arith.constant 1 : index
    %c0_151 = arith.constant 0 : index
    %c0_152 = arith.constant 0 : index
    %276 = vector.load %arg6[%c1_150, %c0_151, %c0_152] : memref<2x64x128xf32, #tpu.memory_space<vmem>>, vector<1x32x128xf32>
    %277 = vector.shape_cast %276 : vector<1x32x128xf32> to vector<32x128xf32>
    %cst_153 = arith.constant dense<0.000000e+00> : vector<8x128xf32>
    %278 = tpu.matmul %180, %277, %cst_153 {dimension_numbers = #tpu.dot_dimension_numbers<[1], [0], [0], [1], [0, 0, 1, 1], [], []>, precision = #tpu.contract_precision<fp32>} : vector<8x32xf32>, vector<32x128xf32>, vector<8x128xf32> -> vector<8x128xf32>
    %c1_154 = arith.constant 1 : index
    %c32_155 = arith.constant 32 : index
    %c0_156 = arith.constant 0 : index
    %279 = vector.load %arg6[%c1_154, %c32_155, %c0_156] : memref<2x64x128xf32, #tpu.memory_space<vmem>>, vector<1x32x128xf32>
    %280 = vector.shape_cast %279 : vector<1x32x128xf32> to vector<32x128xf32>
    %cst_157 = arith.constant dense<0.000000e+00> : vector<8x128xf32>
    %281 = tpu.matmul %275, %280, %cst_157 {dimension_numbers = #tpu.dot_dimension_numbers<[1], [0], [0], [1], [0, 0, 1, 1], [], []>, precision = #tpu.contract_precision<fp32>} : vector<8x32xf32>, vector<32x128xf32>, vector<8x128xf32> -> vector<8x128xf32>
    %282 = arith.addf %278, %281 : vector<8x128xf32>
    %283 = arith.addf %282, %17 : vector<8x128xf32>
    %c1_158 = arith.constant 1 : index
    %c0_159 = arith.constant 0 : index
    %c0_160 = arith.constant 0 : index
    %284 = vector.load %arg10[%c1_158, %c0_159, %c0_160] : memref<2x8x32xf32, #tpu.memory_space<vmem>>, vector<1x8x32xf32>
    %285 = vector.shape_cast %284 : vector<1x8x32xf32> to vector<8x32xf32>
    %286 = vector.extract_strided_slice %283 {offsets = [0, 0], sizes = [8, 32], strides = [1, 1]} : vector<8x128xf32> to vector<8x32xf32>
    %287 = arith.negf %286 : vector<8x32xf32>
    %288 = math.exp %287 : vector<8x32xf32>
    %cst_161 = arith.constant 1.000000e+00 : f32
    %289 = vector.broadcast %cst_161 : f32 to vector<8x32xf32>
    %290 = arith.addf %289, %288 : vector<8x32xf32>
    %291 = arith.divf %289, %290 : vector<8x32xf32>
    %292 = vector.extract_strided_slice %283 {offsets = [0, 32], sizes = [8, 32], strides = [1, 1]} : vector<8x128xf32> to vector<8x32xf32>
    %293 = arith.negf %292 : vector<8x32xf32>
    %294 = math.exp %293 : vector<8x32xf32>
    %cst_162 = arith.constant 1.000000e+00 : f32
    %295 = vector.broadcast %cst_162 : f32 to vector<8x32xf32>
    %296 = arith.addf %295, %294 : vector<8x32xf32>
    %297 = arith.divf %295, %296 : vector<8x32xf32>
    %298 = vector.extract_strided_slice %283 {offsets = [0, 64], sizes = [8, 32], strides = [1, 1]} : vector<8x128xf32> to vector<8x32xf32>
    %299 = math.tanh %298 : vector<8x32xf32>
    %300 = vector.extract_strided_slice %283 {offsets = [0, 96], sizes = [8, 32], strides = [1, 1]} : vector<8x128xf32> to vector<8x32xf32>
    %301 = arith.negf %300 : vector<8x32xf32>
    %302 = math.exp %301 : vector<8x32xf32>
    %cst_163 = arith.constant 1.000000e+00 : f32
    %303 = vector.broadcast %cst_163 : f32 to vector<8x32xf32>
    %304 = arith.addf %303, %302 : vector<8x32xf32>
    %305 = arith.divf %303, %304 : vector<8x32xf32>
    %306 = arith.mulf %297, %285 : vector<8x32xf32>
    %307 = arith.mulf %291, %299 : vector<8x32xf32>
    %308 = arith.addf %306, %307 : vector<8x32xf32>
    %309 = math.tanh %308 : vector<8x32xf32>
    %310 = arith.mulf %305, %309 : vector<8x32xf32>
    %c1_164 = arith.constant 1 : index
    %c0_165 = arith.constant 0 : index
    %c0_166 = arith.constant 0 : index
    %311 = vector.load %arg9[%c1_164, %c0_165, %c0_166] : memref<2x8x32xf32, #tpu.memory_space<vmem>>, vector<1x8x32xf32>
    %312 = vector.shape_cast %311 : vector<1x8x32xf32> to vector<8x32xf32>
    %313 = vector.shape_cast %310 : vector<8x32xf32> to vector<1x8x32xf32>
    tpu.vector_store %arg9[%c1_164, %c0_165, %c0_166], %313 {strides = array<i32>} : memref<2x8x32xf32, #tpu.memory_space<vmem>>, vector<1x8x32xf32>,
    %c1_167 = arith.constant 1 : index
    %c0_168 = arith.constant 0 : index
    %c0_169 = arith.constant 0 : index
    %314 = vector.load %arg10[%c1_167, %c0_168, %c0_169] : memref<2x8x32xf32, #tpu.memory_space<vmem>>, vector<1x8x32xf32>
    %315 = vector.shape_cast %314 : vector<1x8x32xf32> to vector<8x32xf32>
    %316 = vector.shape_cast %308 : vector<8x32xf32> to vector<1x8x32xf32>
    tpu.vector_store %arg10[%c1_167, %c0_168, %c0_169], %316 {strides = array<i32>} : memref<2x8x32xf32, #tpu.memory_space<vmem>>, vector<1x8x32xf32>,
    %c2_170 = arith.constant 2 : index
    %c0_171 = arith.constant 0 : index
    %c0_172 = arith.constant 0 : index
    %317 = vector.load %arg8[%c2_170, %c0_171, %c0_172] : memref<4x8x32xf32, #tpu.memory_space<vmem>>, vector<1x8x32xf32>
    %318 = vector.shape_cast %317 : vector<1x8x32xf32> to vector<8x32xf32>
    %319 = vector.shape_cast %310 : vector<8x32xf32> to vector<1x8x32xf32>
    tpu.vector_store %arg8[%c2_170, %c0_171, %c0_172], %319 {strides = array<i32>} : memref<4x8x32xf32, #tpu.memory_space<vmem>>, vector<1x8x32xf32>,
    %c1_173 = arith.constant 1 : index
    %c0_174 = arith.constant 0 : index
    %c0_175 = arith.constant 0 : index
    %320 = vector.load %arg9[%c1_173, %c0_174, %c0_175] : memref<2x8x32xf32, #tpu.memory_space<vmem>>, vector<1x8x32xf32>
    %321 = vector.shape_cast %320 : vector<1x8x32xf32> to vector<8x32xf32>
    %c1_176 = arith.constant 1 : index
    %c0_177 = arith.constant 0 : index
    %c0_178 = arith.constant 0 : index
    %322 = vector.load %arg6[%c1_176, %c0_177, %c0_178] : memref<2x64x128xf32, #tpu.memory_space<vmem>>, vector<1x32x128xf32>
    %323 = vector.shape_cast %322 : vector<1x32x128xf32> to vector<32x128xf32>
    %cst_179 = arith.constant dense<0.000000e+00> : vector<8x128xf32>
    %324 = tpu.matmul %267, %323, %cst_179 {dimension_numbers = #tpu.dot_dimension_numbers<[1], [0], [0], [1], [0, 0, 1, 1], [], []>, precision = #tpu.contract_precision<fp32>} : vector<8x32xf32>, vector<32x128xf32>, vector<8x128xf32> -> vector<8x128xf32>
    %c1_180 = arith.constant 1 : index
    %c32_181 = arith.constant 32 : index
    %c0_182 = arith.constant 0 : index
    %325 = vector.load %arg6[%c1_180, %c32_181, %c0_182] : memref<2x64x128xf32, #tpu.memory_space<vmem>>, vector<1x32x128xf32>
    %326 = vector.shape_cast %325 : vector<1x32x128xf32> to vector<32x128xf32>
    %cst_183 = arith.constant dense<0.000000e+00> : vector<8x128xf32>
    %327 = tpu.matmul %321, %326, %cst_183 {dimension_numbers = #tpu.dot_dimension_numbers<[1], [0], [0], [1], [0, 0, 1, 1], [], []>, precision = #tpu.contract_precision<fp32>} : vector<8x32xf32>, vector<32x128xf32>, vector<8x128xf32> -> vector<8x128xf32>
    %328 = arith.addf %324, %327 : vector<8x128xf32>
    %329 = arith.addf %328, %17 : vector<8x128xf32>
    %c1_184 = arith.constant 1 : index
    %c0_185 = arith.constant 0 : index
    %c0_186 = arith.constant 0 : index
    %330 = vector.load %arg10[%c1_184, %c0_185, %c0_186] : memref<2x8x32xf32, #tpu.memory_space<vmem>>, vector<1x8x32xf32>
    %331 = vector.shape_cast %330 : vector<1x8x32xf32> to vector<8x32xf32>
    %332 = vector.extract_strided_slice %329 {offsets = [0, 0], sizes = [8, 32], strides = [1, 1]} : vector<8x128xf32> to vector<8x32xf32>
    %333 = arith.negf %332 : vector<8x32xf32>
    %334 = math.exp %333 : vector<8x32xf32>
    %cst_187 = arith.constant 1.000000e+00 : f32
    %335 = vector.broadcast %cst_187 : f32 to vector<8x32xf32>
    %336 = arith.addf %335, %334 : vector<8x32xf32>
    %337 = arith.divf %335, %336 : vector<8x32xf32>
    %338 = vector.extract_strided_slice %329 {offsets = [0, 32], sizes = [8, 32], strides = [1, 1]} : vector<8x128xf32> to vector<8x32xf32>
    %339 = arith.negf %338 : vector<8x32xf32>
    %340 = math.exp %339 : vector<8x32xf32>
    %cst_188 = arith.constant 1.000000e+00 : f32
    %341 = vector.broadcast %cst_188 : f32 to vector<8x32xf32>
    %342 = arith.addf %341, %340 : vector<8x32xf32>
    %343 = arith.divf %341, %342 : vector<8x32xf32>
    %344 = vector.extract_strided_slice %329 {offsets = [0, 64], sizes = [8, 32], strides = [1, 1]} : vector<8x128xf32> to vector<8x32xf32>
    %345 = math.tanh %344 : vector<8x32xf32>
    %346 = vector.extract_strided_slice %329 {offsets = [0, 96], sizes = [8, 32], strides = [1, 1]} : vector<8x128xf32> to vector<8x32xf32>
    %347 = arith.negf %346 : vector<8x32xf32>
    %348 = math.exp %347 : vector<8x32xf32>
    %cst_189 = arith.constant 1.000000e+00 : f32
    %349 = vector.broadcast %cst_189 : f32 to vector<8x32xf32>
    %350 = arith.addf %349, %348 : vector<8x32xf32>
    %351 = arith.divf %349, %350 : vector<8x32xf32>
    %352 = arith.mulf %343, %331 : vector<8x32xf32>
    %353 = arith.mulf %337, %345 : vector<8x32xf32>
    %354 = arith.addf %352, %353 : vector<8x32xf32>
    %355 = math.tanh %354 : vector<8x32xf32>
    %356 = arith.mulf %351, %355 : vector<8x32xf32>
    %c1_190 = arith.constant 1 : index
    %c0_191 = arith.constant 0 : index
    %c0_192 = arith.constant 0 : index
    %357 = vector.load %arg9[%c1_190, %c0_191, %c0_192] : memref<2x8x32xf32, #tpu.memory_space<vmem>>, vector<1x8x32xf32>
    %358 = vector.shape_cast %357 : vector<1x8x32xf32> to vector<8x32xf32>
    %359 = vector.shape_cast %356 : vector<8x32xf32> to vector<1x8x32xf32>
    tpu.vector_store %arg9[%c1_190, %c0_191, %c0_192], %359 {strides = array<i32>} : memref<2x8x32xf32, #tpu.memory_space<vmem>>, vector<1x8x32xf32>,
    %c1_193 = arith.constant 1 : index
    %c0_194 = arith.constant 0 : index
    %c0_195 = arith.constant 0 : index
    %360 = vector.load %arg10[%c1_193, %c0_194, %c0_195] : memref<2x8x32xf32, #tpu.memory_space<vmem>>, vector<1x8x32xf32>
    %361 = vector.shape_cast %360 : vector<1x8x32xf32> to vector<8x32xf32>
    %362 = vector.shape_cast %354 : vector<8x32xf32> to vector<1x8x32xf32>
    tpu.vector_store %arg10[%c1_193, %c0_194, %c0_195], %362 {strides = array<i32>} : memref<2x8x32xf32, #tpu.memory_space<vmem>>, vector<1x8x32xf32>,
    %c3_196 = arith.constant 3 : index
    %c0_197 = arith.constant 0 : index
    %c0_198 = arith.constant 0 : index
    %363 = vector.load %arg8[%c3_196, %c0_197, %c0_198] : memref<4x8x32xf32, #tpu.memory_space<vmem>>, vector<1x8x32xf32>
    %364 = vector.shape_cast %363 : vector<1x8x32xf32> to vector<8x32xf32>
    %365 = vector.shape_cast %356 : vector<8x32xf32> to vector<1x8x32xf32>
    tpu.vector_store %arg8[%c3_196, %c0_197, %c0_198], %365 {strides = array<i32>} : memref<4x8x32xf32, #tpu.memory_space<vmem>>, vector<1x8x32xf32>,
    return
  }
  func.func @transform_0(%arg0: i32, %arg1: i32) -> (i32, i32, i32) {
    %c0_i32 = arith.constant 0 : i32
    %c0_i32_0 = arith.constant 0 : i32
    return %arg1, %arg0, %c0_i32 : i32, i32, i32
  }
  func.func @transform_1(%arg0: i32, %arg1: i32) -> (i32, i32, i32) {
    %c0_i32 = arith.constant 0 : i32
    %c0_i32_0 = arith.constant 0 : i32
    %c0_i32_1 = arith.constant 0 : i32
    return %c0_i32, %arg0, %c0_i32_0 : i32, i32, i32
  }
  func.func @transform_2(%arg0: i32, %arg1: i32) -> (i32, i32, i32) {
    %c0_i32 = arith.constant 0 : i32
    %c0_i32_0 = arith.constant 0 : i32
    %c0_i32_1 = arith.constant 0 : i32
    return %c0_i32, %arg0, %c0_i32_0 : i32, i32, i32
  }
  func.func @transform_3(%arg0: i32, %arg1: i32) -> (i32, i32) {
    %c0_i32 = arith.constant 0 : i32
    %c0_i32_0 = arith.constant 0 : i32
    %c0_i32_1 = arith.constant 0 : i32
    return %c0_i32, %c0_i32_0 : i32, i32
  }
  func.func @transform_4(%arg0: i32, %arg1: i32) -> (i32, i32, i32) {
    %c0_i32 = arith.constant 0 : i32
    %c0_i32_0 = arith.constant 0 : i32
    %c0_i32_1 = arith.constant 0 : i32
    %c0_i32_2 = arith.constant 0 : i32
    return %c0_i32, %c0_i32_0, %c0_i32_1 : i32, i32, i32
  }
  func.func @transform_5(%arg0: i32, %arg1: i32) -> (i32, i32, i32) {
    %c0_i32 = arith.constant 0 : i32
    %c0_i32_0 = arith.constant 0 : i32
    %c0_i32_1 = arith.constant 0 : i32
    %c0_i32_2 = arith.constant 0 : i32
    return %c0_i32, %c0_i32_0, %c0_i32_1 : i32, i32, i32
  }
  func.func @transform_6(%arg0: i32, %arg1: i32) -> (i32, i32, i32) {
    %c0_i32 = arith.constant 0 : i32
    %c0_i32_0 = arith.constant 0 : i32
    return %arg1, %arg0, %c0_i32 : i32, i32, i32
  }
}

</mosaic_0001>

<bundles_post_ra>
// kernel: tpu_custom_call.1
= control target key start
LH: loop header
LB: loop body
LE: loop exit
PB: predicated region body
PF: predicated region fallthrough
CT: control target
= control target key end

     0   :  { %s10779_s0 = inlined_call_operand.vmem [shape: s32[12,16,1], index: 0, kind: input, shape index: {}]   ;;  %s10780_s1 = inlined_call_operand.vmem [shape: f32[2,16,32], index: 1, kind: input, shape index: {}]   ;;  %s10781_s2 = inlined_call_operand.vmem [shape: f32[2,16,32], index: 2, kind: input, shape index: {}]   ;;  %s10782_s3 = inlined_call_operand.vmem [shape: f32[11,128], index: 3, kind: input, shape index: {}]   ;;  %s10783_s4 = inlined_call_operand.vmem [shape: f32[2,64,128], index: 4, kind: input, shape index: {}]   ;;  %s10784_s5 = inlined_call_operand.vmem [shape: f32[2,1,128], index: 5, kind: input, shape index: {}]   ;;  %s10785_s6 = inlined_call_operand.hbm [shape: f32[12,16,32], index: 6, kind: output, shape index: {}]  }
   0x1   :  { %10789 = sst [smem:[#allocation15_spill]] %s10779_s0 }
   0x2   :  { %11 = vsyncpa [#allocation9], 0 }
   0x3   :  { %13 = vsyncpa [#allocation9 + $0x1], 0  ;;  %s9649_s21 = smov 0   ;;  %s9651_s22 = smov 0  }
   0x4   :  { %s9653_s23 = smov 0   ;;  %s9655_s24 = smov 0  }
   0x5   :  { %s9657_s25 = smov 0   ;;  %s9659_s26 = smov 0  }
   0x6   :  { %s9661_s27 = smov 0   ;;  %s9663_s28 = smov 0  }
   0x7   :  { %s9665_s29 = smov 0   ;;  %s9667_s30 = smov 0  }
   0x8 LB: > { %10790 = sst [smem:[#allocation11_spill]] %s9593_s28  ;;  %s7476_s7 = sadd.s32 4294967295, %s9601_s30   ;;  %s9601_s30 = sphi %s9667_s30, %s19_s30   ;;  %s9597_s29 = sphi %s9665_s29, %s10809_s29   ;;  %s9593_s28 = sphi %s9663_s28, %s10801_s28   ;;  %s9589_s27 = sphi %s9661_s27, %s10808_s27   ;;  %s9585_s26 = sphi %s9659_s26, %s10800_s26   ;;  %s9581_s25 = sphi %s9657_s25, %s10807_s25   ;;  %s9577_s24 = sphi %s9655_s24, %s10806_s24   ;;  %s9573_s23 = sphi %s9653_s23, %s10805_s23   ;;  %s9569_s22 = sphi %s9651_s22, %s10804_s22   ;;  %s9565_s21 = sphi %s9649_s21, %s10803_s21  }
   0x9   : > { %s7477_s8 = sadd.s32 4294967294, %s9601_s30   ;;  %s28_s9 = sadd.s32 1, %s9593_s28 }
   0xa   : > { %s31_s10 = sadd.s32 1, %s9597_s29  ;;  %p29_p0 = scmp.ge.s32.totalorder %s28_s9, 3 }
   0xb   : > { %s40_s11 = sadd.s32 1, %s9581_s25  ;;  %p47_p1 = scmp.ne.s32.totalorder %s9581_s25, %s9577_s24 }
   0xc   : > { %p48_p2 = scmp.eq.s32.totalorder %s9601_s30, 0  ;;  %s10811_s9 = smov (%p29_p0, %s28_s9), 0 }
   0xd   : > { %10791 = sst [smem:[#allocation12_spill]] %s10811_s9  ;;  %s10813_s10 = smov (!%p29_p0, %s31_s10), %s9597_s29 }
   0xe   : > { %s35_s12 = ssub.s32 %s9593_s28, %s10811_s9  ;;  %p9712_p3 = por %p48_p2, %p47_p1 }
   0xf   : > { %p33_p4 = scmp.ge.s32.totalorder %s10813_s10, 2  ;;  %s66_s14 = sadd.s32 1, %s9573_s23 }
  0x10   : > { %p73_p5 = scmp.ne.s32.totalorder %s9573_s23, %s9569_s22  ;;  %p194_p6 = scmp.eq.s32.totalorder %s7476_s7, 5 }
  0x11   : > { %s10815_s10 = smov (%p33_p4, %s10813_s10), 0  ;;  %p199_p9 = scmp.ne.s32.totalorder %s9577_s24, %s9565_s21 }
  0x12   : > { %10793 = sst [smem:[#allocation13_spill]] %s10815_s10  ;;  %p9721_p7 = por %p73_p5, %p48_p2 }
  0x13   : > { %p9725_p8 = por %p194_p6, %p47_p1  ;;  %s36_s17 = ssub.s32 %s9597_s29, %s10815_s10 }
  0x14   : > { %s37_s18 = sor.u32 %s36_s17, %s35_s12  ;;  %p64_p10 = scmp.eq.s32.totalorder %s36_s17, 0 }
  0x15   : > { %p38_p11 = scmp.eq.s32.totalorder %s37_s18, 0  ;;  %p200_p12 = scmp.eq.s32.totalorder %s7477_s8, 5 }
  0x16   : > { %s9734_s19 = scalar_select %p64_p10, %s9573_s23, %s66_s14  }
  0x17   : > { %s9737_s20 = scalar_select %p38_p11, %s9581_s25, %s40_s11  }
  0x18   : > { %p9739_p13 = por %p200_p12, %p199_p9  ;;  %p7479_p0 = scmp.ge.s32.totalorder %s9601_s30, 6 }
  0x19   : > { %10796 = sst [smem:[#allocation14_spill]] %s9737_s20 }
  0x1a   : > { %225 = sbr.rel (%p7479_p0) target bundleno = 59 (0x3b), region = 28 }
  0x21   : > { %228 = sbr.rel (!%p9712_p3) target bundleno = 45 (0x2d), region = 32  ;;  %s230_s12 = sand.u32 (%p9712_p3), 1, %s9581_s25  }
  0x22   : > { %s7561_s17 = sshll.u32 (%p9712_p3), %s9593_s28, 3  ;;  %s7480_s8 = sshll.u32 (%p9712_p3), %s230_s12, 5 }
  0x23   : > { %s235_s14 = sadd.s32 (%p9712_p3), %s9597_s29, %s7561_s17  ;;  %s10798_s0 = sld [smem:[#allocation15_spill]] (%p9712_p3) }
  0x24   : > { %s7483_s18 = sshll.u32 (%p9712_p3), %s235_s14, 3  ;;  %s232_s20 = scalar_lea.vmem (%p9712_p3), [#allocation5], %s7480_s8 }
  0x29   : > { %s237_s9 = scalar_lea.vmem %s10798_s0, %s7483_s18 }
  0x2a   : > { %v271_v0 = vld [vmem:[%s237_s9] sm:$0xff]  ;;  %v273_v1 = vld [vmem:[%s237_s9 + $0x10] sm:$0xff] }
  0x2b   : > { %v275_v2 = vld [vmem:[%s237_s9 + $0x20] sm:$0xff]  ;;  %272 = vst [vmem:[%s232_s20] sm:$0xff] %v271_v0  ;;  %274 = vst [vmem:[%s232_s20 + $0x8] sm:$0xff] %v273_v1  ;;  %v277_v3 = vld [vmem:[%s237_s9 + $0x30] sm:$0xff] }
  0x2c   : > { %276 = vst [vmem:[%s232_s20 + $0x10] sm:$0xff] %v275_v2  ;;  %278 = vst [vmem:[%s232_s20 + $0x18] sm:$0xff] %v277_v3 }
  0x2d PF: > { %284 = sbr.rel (!%p9721_p7) target bundleno = 52 (0x34), region = 70  ;;  %s286_s13 = sand.u32 (%p9721_p7), 1, %s9573_s23  }
  0x2e   : > { %s7485_s12 = sshll.u32 (%p9721_p7), %s9597_s29, 3  ;;  %s7484_s17 = sshll.u32 (%p9721_p7), %s286_s13, 4 }
  0x2f   : > { %s290_s18 = scalar_lea.vmem (%p9721_p7), %s10780_s1, %s7485_s12  ;;  %s288_s8 = scalar_lea.vmem (%p9721_p7), [#allocation6], %s7484_s17 }
  0x30   : > { %v320_v4 = vld [vmem:[%s290_s18] sm:$0xff] (%p9721_p7)  ;;  %v322_v5 = vld [vmem:[%s290_s18 + $0x10] sm:$0xff] (%p9721_p7) }
  0x31   : > { %321 = vst [vmem:[%s288_s8] sm:$0xff] (%p9721_p7), %v320_v4  ;;  %323 = vst [vmem:[%s288_s8 + $0x8] sm:$0xff] (%p9721_p7), %v322_v5 }
  0x34 PF: > { %329 = sbr.rel (!%p9721_p7) target bundleno = 59 (0x3b), region = 108  ;;  %s331_s9 = sand.u32 (%p9721_p7), 1, %s9573_s23  }
  0x35   : > { %s7487_s20 = sshll.u32 (%p9721_p7), %s9597_s29, 3  ;;  %s7486_s11 = sshll.u32 (%p9721_p7), %s331_s9, 4 }
  0x36   : > { %s335_s28 = scalar_lea.vmem (%p9721_p7), %s10781_s2, %s7487_s20  ;;  %s333_s12 = scalar_lea.vmem (%p9721_p7), [#allocation7], %s7486_s11 }
  0x37   : > { %v365_v6 = vld [vmem:[%s335_s28] sm:$0xff] (%p9721_p7)  ;;  %v367_v7 = vld [vmem:[%s335_s28 + $0x10] sm:$0xff] (%p9721_p7) }
  0x38   : > { %366 = vst [vmem:[%s333_s12] sm:$0xff] (%p9721_p7), %v365_v6  ;;  %368 = vst [vmem:[%s333_s12 + $0x8] sm:$0xff] (%p9721_p7), %v367_v7 }
  0x3b PF: > { %p7488_p1 = scmp.ge.s32.totalorder %s9601_s30, 1  ;;  %p373_p2 = scmp.lt.s32.totalorder %s9601_s30, 7 }
  0x3d   : > { %p374_p3 = pnand %p7488_p1, %p373_p2 }
  0x3e   : > { %s380_s15 = sand.u32 (!%p374_p3), 1, %s9577_s24   ;;  %s387_s17 = sand.u32 (!%p374_p3), 1, %s9569_s22  }
  0x3f   : > { %377 = sbr.rel (%p374_p3) target bundleno = 4109 (0x100d), region = 146  ;;  %s7489_s0 = sshll.u32 (!%p374_p3), %s380_s15, 5 }
  0x40   : > { %s7490_s10 = sshll.u32 (!%p374_p3), %s387_s17, 4  ;;  %s9772_s28 = scalar_lea.vmem (!%p374_p3), [#allocation5], %s7489_s0 }
  0x41   : > { %s389_s14 = scalar_lea.vmem (!%p374_p3), [#allocation6], %s7490_s10  ;;  %s396_s18 = scalar_lea.vmem (!%p374_p3), [#allocation7], %s7490_s10 }
  0x42   : > { %s9774_s8 = scalar_lea.vmem (!%p374_p3), [#allocation8], %s7489_s0  ;;  %p7493_p4 = scmp.ne.s32.totalorder (!%p374_p3), %s9585_s26, 0 }
  0x46   : > { %436 = sbr.rel (%p7493_p4) target bundleno = 77 (0x4d), region = 162  ;;  %v437_v8 = vld [vmem:[%s389_s14] sm:$0xff] (!%p7493_p4)  ;;  %vm439_vm0 = vcmask (!%p7493_p4), 261120   ;;  %v438_v9 = vld [vmem:[%s389_s14 + $0x8] sm:$0xff] (!%p7493_p4) }
  0x47   : > { %v442_v10 = vld [vmem:[%s396_s18] sm:$0xff] (!%p7493_p4)  ;;  %440 = vst.msk [vmem:[#allocation2] sm:$0xff] (!%p7493_p4), %vm439_vm0, %v437_v8  ;;  %441 = vst.msk [vmem:[#allocation2 + $0x8] sm:$0xff] (!%p7493_p4), %vm439_vm0, %v438_v9  ;;  %v443_v11 = vld [vmem:[%s396_s18 + $0x8] sm:$0xff] (!%p7493_p4) }
  0x48   : > { %444 = vst.msk [vmem:[#allocation3] sm:$0xff] (!%p7493_p4), %vm439_vm0, %v442_v10  ;;  %445 = vst.msk [vmem:[#allocation3 + $0x8] sm:$0xff] (!%p7493_p4), %vm439_vm0, %v443_v11 }
  0x4d PF: > { %v448_v12 = vld [vmem:[%s9772_s28 + $0x10] sm:$0xff]  ;;  %v446_v13 = vld [vmem:[%s9772_s28] sm:$0xff]  ;;  %v9603_v14 = vmov 0   ;;  %v1098_v16 = vld [vmem:[%s10783_s4 + $0x28] sm:$0xff]  ;;  %vm1101_vm1 = vcmask 261120   ;;  %v9604_v24 = vmov 0.0|0.0  }
  0x4e   : > { %9425 = vset.pattern.permute.xlu1 %v9603_v14  ;;  %9424 = vset.pattern.permute.xlu0 %v9603_v14  ;;  %v1097_v15 = vld [vmem:[%s10783_s4 + $0x20] sm:$0xff]  ;;  %v1109_v18 = vand.u32 4294901760, %v1098_v16  ;;  %v1099_v19 = vld [vmem:[%s10783_s4 + $0x30] sm:$0xff]  ;;  %v1100_v20 = vld [vmem:[%s10783_s4 + $0x38] sm:$0xff]  ;;  %vm9605_vm2 = vmmov 0   ;;  %v9606_v27 = vmov 0.0  }
  0x4f   : > { %459 = vperm.xlu1 %9425, %v448_v12   ;;  %453 = vperm.xlu0 %9424, %v446_v13   ;;  %v1106_v17 = vand.u32 4294901760, %v1097_v15  ;;  %v1095_v21 = vld [vmem:[#allocation2] sm:$0xff]  ;;  %v449_v22 = vld [vmem:[%s9772_s28 + $0x18] sm:$0xff]  ;;  %v447_v23 = vld [vmem:[%s9772_s28 + $0x8] sm:$0xff]  ;;  %v1112_v25 = vand.u32 4294901760, %v1099_v19  ;;  %v1115_v26 = vand.u32 4294901760, %v1100_v20  ;;  %v450_v12 = vlaneseq }
  0x50   : > { %8835 = vmatprep.subr.bf16.mxu1 %v9604_v24  ;;  %8027 = vmatprep.mubr.msk.f32.mxu1 %vm9605_vm2, %v9606_v27  ;;  %v1103_v28 = vsel %vm1101_vm1, %v1095_v21, 0  ;;  %v9801_v31 = vsub.f32 %v1098_v16, %v1109_v18  ;;  %v477_v41 = vld [vmem:[%s10782_s3 + $0x8] sm:$0x7]  ;;  %vm491_vm3 = vcmask 1042432   ;;  %v476_v45 = vld [vmem:[%s10782_s3] sm:$0xff]  ;;  %v1591_v11 = vld [vmem:[#allocation3] sm:$0xff] }
  0x51   : > { %v9797_v29 = vpack.c.bf16 %v1109_v18, %v1106_v17  ;;  %v9799_v30 = vsub.f32 %v1097_v15, %v1106_v17  ;;  %v9803_v32 = vand.u32 4294901760, %v1103_v28  ;;  %v9805_v33 = vsub.f32 %v1099_v19, %v1112_v25  ;;  %s9607_s22 = smov 32   ;;  %s9608_s9 = smov 64  }
  0x52   : > { %v9807_v34 = vsub.f32 %v1100_v20, %v1115_v26  ;;  %v1194_v37 = vand.u32 4294901760, %v9801_v31  ;;  %v9815_v38 = vpack.c.bf16 %v1115_v26, %v1112_v25  ;;  %v493_v48 = vsel %vm491_vm3, %v477_v41, 0  ;;  %s9609_s14 = smov 96   ;;  %s7562_s18 = sshll.u32 %s9585_s26, 3 }
  0x53   : > { %462 = vperm.xlu1 %9425, %v449_v22   ;;  %456 = vperm.xlu0 %9424, %v447_v23   ;;  %v9810_v35 = vsub.f32 %v1103_v28, %v9803_v32  ;;  %v1187_v36 = vand.u32 4294901760, %v9799_v30  ;;  %v1201_v39 = vand.u32 4294901760, %v9805_v33  ;;  %v496_v52 = vand.u32 4294901760, %v476_v45  ;;  %s7354_s20 = sadd.s32 %s9589_s27, %s7562_s18  ;;  %s7357_s13 = sshll.u32 %s9774_s8, 4  ;;  %s10713_s13 = int_to_ptr.vmem [resolvable:$true] %s7357_s13 }
  0x54   : > { %8837 = vmatpush3.bf16.msra.mxu1 %v9797_v29  ;;  %v1208_v40 = vand.u32 4294901760, %v9807_v34  ;;  %v1195_v44 = vsub.f32 %v9801_v31, %v1194_v37  ;;  %v499_v55 = vand.u32 4294901760, %v493_v48  ;;  %v9849_v3 = vpack.c.bf16 %v9801_v31, %v9799_v30  ;;  %s7558_s11 = sshll.u32 %s7354_s20, 7  ;;  %s10720_s26 = scalar_lea.sflag [#allocation9], %s380_s15 }
  0x55   : > { %8838 = vmatprep.subr.bf16.mxu1 %v9604_v24  ;;  %v1176_v42 = vand.u32 4294901760, %v9810_v35  ;;  %v1188_v43 = vsub.f32 %v9799_v30, %v1187_v36  ;;  %v1202_v46 = vsub.f32 %v9805_v33, %v1201_v39  ;;  %v604_v58 = vsub.f32 %v476_v45, %v496_v52  ;;  %s10711_s17 = scalar_lea.hbm %s10785_s6, %s7558_s11  ;;  %s9491_s27 = scalar_lea.vmem %s10713_s13, 512 }
  0x56   : > { %v1209_v47 = vsub.f32 %v9807_v34, %v1208_v40  ;;  %v1196_v51 = vand.u32 4294901760, %v1195_v44  ;;  %v9836_v59 = vpack.c.bf16 %v499_v55, %v496_v52  ;;  %v611_v60 = vsub.f32 %v493_v48, %v499_v55  ;;  %p9492_p5 = scmp.ne.s32.totalorder %s10713_s13, %s9491_s27 }
  0x57   : > { %v1177_v49 = vsub.f32 %v9810_v35, %v1176_v42  ;;  %v1189_v50 = vand.u32 4294901760, %v1188_v43  ;;  %v1203_v53 = vand.u32 4294901760, %v1202_v46  ;;  %v605_v61 = vand.u32 4294901760, %v604_v58  ;;  %1600 = vrot.lane.b32.xlu1 %v1591_v11, %s9607_s22  ;;  %v7521_v11 = vld [vmem:[%s10783_s4 + $0x78] sm:$0xff] }
  0x58   : > { %8840 = vmatpush3.bf16.msra.mxu1 %v9815_v38  ;;  %v1210_v54 = vand.u32 4294901760, %v1209_v47  ;;  %v612_v63 = vand.u32 4294901760, %v611_v60  ;;  %8812 = vmatprep.subr.bf16.mxu0 %v9836_v59  ;;  %v9855_v6 = vpack.c.bf16 %v611_v60, %v604_v58  ;;  %v9860_v7 = vpack.c.bf16 %v9807_v34, %v9805_v33  ;;  %p9493_p6 = pnand %p9492_p5, %p9725_p8 }
  0x59   : > { %v1178_v56 = vand.u32 4294901760, %v1177_v49  ;;  %8841 = vmatprep.subr.bf16.mxu1 %v9604_v24  ;;  %v9834_v57 = vpack.c.bf16 %v1196_v51, %v1189_v50  ;;  %v606_v0 = vsub.f32 %v604_v58, %v605_v61  ;;  %8814 = vmatpush3.bf16.msra.mxu0 %v9836_v59  ;;  %v9874_v8 = vpack.c.bf16 %v1194_v37, %v1187_v36 }
  0x5a   : > { %v9839_v62 = vpack.c.bf16 %v1210_v54, %v1203_v53  ;;  %v613_v1 = vsub.f32 %v611_v60, %v612_v63  ;;  %v9877_v9 = vpack.c.bf16 %v612_v63, %v605_v61  ;;  %v9880_v10 = vpack.c.bf16 %v1208_v40, %v1201_v39  ;;  %p9494_p7 = pneg %p9493_p6 }
  0x5b   : > { %8028 = vmatmul.mubr.f32.vlgmr.msra.gmra.mrb[0].mxu1 %v1178_v56  ;;  %v607_v2 = vand.u32 4294901760, %v606_v0  ;;  %v451_v13 = vand.u32 127, %v450_v12  ;;  %vm478_vm4 = vcmask 89088  }
  0x5c   : > { %8843 = vmatpush3.bf16.msra.mxu1 %v9834_v57  ;;  %8038 = vmatprep.mubr.msk.f32.mxu1 %vm9605_vm2, %v9606_v27  ;;  %v614_v4 = vand.u32 4294901760, %v613_v1 }
  0x5d   : > { %8844 = vmatprep.subr.bf16.mxu1 %v9604_v24 }
  0x5e   : > { %v9852_v5 = vpack.c.bf16 %v614_v4, %v607_v2  ;;  %v7518_v2 = vld [vmem:[%s10783_s4 + $0x60] sm:$0xff]  ;;  %v7519_v4 = vld [vmem:[%s10783_s4 + $0x68] sm:$0xff] }
  0x60   : > { %8846 = vmatpush3.bf16.msra.mxu1 %v9839_v62  ;;  %8816 = vmatprep.subr.bf16.mxu0 %v9852_v5 }
  0x61   : > { %8847 = vmatprep.subr.bf16.mxu1 %v9604_v24 }
  0x63   : > { %8039 = vmatmul.mubr.f32.vlgmr.msra.gmra.mrb[0].mxu1 %v9803_v32 }
  0x64   : > { %8849 = vmatpush3.bf16.msra.mxu1 %v9849_v3  ;;  %8049 = vmatprep.mubr.msk.f32.mxu1 %vm9605_vm2, %v9606_v27 }
  0x65   : > { %8850 = vmatprep.subr.bf16.mxu1 %v9604_v24 }
  0x68   : > { %8852 = vmatpush3.bf16.msra.mxu1 %v9860_v7 }
  0x69   : > { %8853 = vmatprep.subr.bf16.mxu1 %v9604_v24 }
  0x6b   : > { %8050 = vmatmul.mubr.f32.vlgmr.msra.gmra.mrb[0].mxu1 %v9810_v35 }
  0x6c   : > { %8855 = vmatpush3.bf16.msra.mxu1 %v9797_v29  ;;  %8060 = vmatprep.mubr.msk.f32.mxu1 %vm9605_vm2, %v9606_v27 }
  0x6d   : > { %8856 = vmatprep.subr.bf16.mxu1 %v9604_v24 }
  0x70   : > { %8858 = vmatpush3.bf16.msra.mxu1 %v9815_v38 }
  0x71   : > { %8859 = vmatprep.subr.bf16.mxu1 %v9604_v24 }
  0x73   : > { %8061 = vmatmul.mubr.f32.vlgmr.msra.gmra.mrb[0].mxu1 %v1176_v42 }
  0x74   : > { %8861 = vmatpush3.bf16.msra.mxu1 %v9874_v8  ;;  %8071 = vmatprep.mubr.msk.f32.mxu1 %vm9605_vm2, %v9606_v27 }
  0x75   : > { %8862 = vmatprep.subr.bf16.mxu1 %v9604_v24 }
  0x78   : > { %8864 = vmatpush3.bf16.msra.mxu1 %v9880_v10 }
  0x79   : > { %8865 = vmatprep.subr.bf16.mxu1 %v9604_v24 }
  0x7b   : > { %8072 = vmatmul.mubr.f32.vlgmr.msra.gmra.mrb[0].mxu1 %v9803_v32 }
  0x7c   : > { %8867 = vmatpush3.bf16.msra.mxu1 %v9797_v29  ;;  %8082 = vmatprep.mubr.msk.f32.mxu1 %vm9605_vm2, %v9606_v27 }
  0x7d   : > { %8868 = vmatprep.subr.bf16.mxu1 %v9604_v24 }
  0x80   : > { %8870 = vmatpush3.bf16.msra.mxu1 %v9815_v38 }
  0x81   : > { %8907 = vmatprep.subr.bf16.mxu1 %v9604_v24 }
  0x83   : > { %8083 = vmatmul.mubr.f32.vlgmr.msra.gmra.mrb[0].mxu1 %v9803_v32 }
  0x84   : > { %8159 = vmatprep.mubr.msk.f32.mxu1 %vm9605_vm2, %v9606_v27 }
  0xce   : > { %v460_v14 = vpop.permute.xlu1 %459  ;;  %v454_v15 = vpop.permute.xlu0 %453 }
  0xcf   : > { %vm466_vm5 = vcmp.eq.s32.totalorder %v460_v14, %v451_v13  ;;  %vm464_vm6 = vcmp.eq.s32.totalorder %v454_v15, %v451_v13  ;;  %v2189_v14 = vand.u32 4294901760, %v7521_v11 }
  0xd0   : > { %v7496_v16 = vsel %vm466_vm5, 1.0, %v9606_v27  ;;  %v7494_v17 = vsel %vm464_vm6, 1.0, %v9606_v27 }
  0xd1   : > { %v486_v18 = vsel %vm478_vm4, %v7496_v16, 0  ;;  %v480_v19 = vsel %vm478_vm4, %v7494_v17, 0 }
  0xd2   : > { %v583_v20 = vsub.f32 %v486_v18, %v486_v18  ;;  %v463_v21 = vpop.permute.xlu1 %462  ;;  %v457_v22 = vpop.permute.xlu0 %456  ;;  %v563_v23 = vsub.f32 %v480_v19, %v480_v19 }
  0xd3   : > { %vm467_vm7 = vcmp.eq.s32.totalorder %v463_v21, %v451_v13  ;;  %vm465_vm8 = vcmp.eq.s32.totalorder %v457_v22, %v451_v13  ;;  %v2166_v13 = vld [vmem:[#allocation2 + $0x8] sm:$0xff] }
  0xd4   : > { %v7497_v25 = vsel %vm467_vm7, 1.0, %v9606_v27  ;;  %v7495_v26 = vsel %vm465_vm8, 1.0, %v9606_v27  ;;  %v564_v28 = vand.u32 4294901760, %v563_v23  ;;  %v584_v32 = vand.u32 4294901760, %v583_v20 }
  0xd5   : > { %v489_v30 = vsel %vm478_vm4, %v7497_v25, 0  ;;  %v483_v31 = vsel %vm478_vm4, %v7495_v26, 0  ;;  %v2177_v15 = vsel %vm1101_vm1, %v2166_v13, 0 }
  0xd6   : > { %v593_v33 = vsub.f32 %v489_v30, %v489_v30  ;;  %v573_v34 = vsub.f32 %v483_v31, %v483_v31  ;;  %v565_v35 = vsub.f32 %v563_v23, %v564_v28  ;;  %v585_v40 = vsub.f32 %v583_v20, %v584_v32  ;;  %v1601_v61 = vpop.permute.xlu1 %1600 }
  0xd7   : > { %v9963_v21 = vand.u32 4294901760, %v2177_v15 }
  0xd8   : > { %v566_v36 = vand.u32 4294901760, %v565_v35  ;;  %v574_v37 = vand.u32 4294901760, %v573_v34  ;;  %v594_v39 = vand.u32 4294901760, %v593_v33  ;;  %v586_v44 = vand.u32 4294901760, %v585_v40 }
  0xda   : > { %7963 = vmatprep.mubr.f32.mxu0 %v566_v36  ;;  %v575_v41 = vsub.f32 %v573_v34, %v574_v37  ;;  %v595_v43 = vsub.f32 %v593_v33, %v594_v39 }
  0xdc   : > { %v576_v42 = vand.u32 4294901760, %v575_v41  ;;  %v596_v45 = vand.u32 4294901760, %v595_v43 }
  0xde   : > { %7964 = vmatmul.mubr.f32.vlgmr.msra.gmra.mrb[0].mxu0 %v576_v42 }
  0xdf   : > { %8818 = vmatpush3.bf16.msra.mxu0 %v9852_v5  ;;  %7966 = vmatprep.mubr.f32.mxu0 %v586_v44  ;;  %v7520_v5 = vld [vmem:[%s10783_s4 + $0x70] sm:$0xff] }
  0xe0   : > { %8820 = vmatprep.subr.bf16.mxu0 %v9855_v6  ;;  %v2186_v12 = vand.u32 4294901760, %v7520_v5 }
  0xe2   : > { %7967 = vmatmul.mubr.f32.gmra.mrb[2].mxu0 %v596_v45  ;;  %v9961_v19 = vsub.f32 %v7520_v5, %v2186_v12  ;;  %v9966_v22 = vpack.c.bf16 %v2189_v14, %v2186_v12 }
  0xe3   : > { %7973 = vmatprep.mubr.msk.f32.mxu0 %vm478_vm4, %v7494_v17 }
  0xe6   : > { %7974 = vmatmul.mubr.msk.f32.vlgmr.msra.gmra.mrb[0].mxu0 %vm478_vm4, %v7495_v26 }
  0xe7   : > { %8822 = vmatpush3.bf16.msra.mxu0 %v9855_v6  ;;  %7976 = vmatprep.mubr.msk.f32.mxu0 %vm478_vm4, %v7496_v16  ;;  %v2180_v6 = vand.u32 4294901760, %v7518_v2 }
  0xe8   : > { %8824 = vmatprep.subr.bf16.mxu0 %v9836_v59 }
  0xea   : > { %7977 = vmatmul.mubr.msk.f32.gmra.mrb[2].mxu0 %vm478_vm4, %v7497_v25 }
  0xeb   : > { %7983 = vmatprep.mubr.f32.mxu0 %v563_v23 }
  0xee   : > { %7984 = vmatmul.mubr.f32.vlgmr.msra.gmra.mrb[0].mxu0 %v573_v34 }
  0xef   : > { %8826 = vmatpush3.bf16.msra.mxu0 %v9836_v59  ;;  %7986 = vmatprep.mubr.f32.mxu0 %v583_v20  ;;  %v2281_v20 = vsub.f32 %v7521_v11, %v2189_v14 }
  0xf0   : > { %8828 = vmatprep.subr.bf16.mxu0 %v9877_v9 }
  0xf1   : > { %v2282_v30 = vand.u32 4294901760, %v2281_v20 }
  0xf2   : > { %7987 = vmatmul.mubr.f32.gmra.mrb[2].mxu0 %v593_v33 }
  0xf3   : > { %7993 = vmatprep.mubr.f32.mxu0 %v564_v28  ;;  %v2249_v28 = vsub.f32 %v2177_v15, %v9963_v21  ;;  %v2283_v36 = vsub.f32 %v2281_v20, %v2282_v30 }
  0xf5   : > { %v2250_v35 = vand.u32 4294901760, %v2249_v28  ;;  %v2284_v43 = vand.u32 4294901760, %v2283_v36 }
  0xf6   : > { %7994 = vmatmul.mubr.f32.vlgmr.msra.gmra.mrb[0].mxu0 %v574_v37 }
  0xf7   : > { %8830 = vmatpush3.bf16.msra.mxu0 %v9877_v9  ;;  %7996 = vmatprep.mubr.f32.mxu0 %v584_v32  ;;  %v2183_v9 = vand.u32 4294901760, %v7519_v4  ;;  %v2251_v40 = vsub.f32 %v2249_v28, %v2250_v35 }
  0xf8   : > { %8832 = vmatprep.subr.bf16.mxu0 %v9836_v59 }
  0xf9   : > { %v2267_v18 = vsub.f32 %v7519_v4, %v2183_v9  ;;  %v2252_v44 = vand.u32 4294901760, %v2251_v40 }
  0xfa   : > { %7997 = vmatmul.mubr.f32.gmra.mrb[2].mxu0 %v594_v39 }
  0xfb   : > { %8003 = vmatprep.mubr.msk.f32.mxu0 %vm478_vm4, %v7494_v17 }
  0xfe   : > { %8004 = vmatmul.mubr.msk.f32.vlgmr.msra.gmra.mrb[0].mxu0 %vm478_vm4, %v7495_v26 }
  0xff   : > { %8834 = vmatpush3.bf16.msra.mxu0 %v9836_v59  ;;  %8006 = vmatprep.mubr.msk.f32.mxu0 %vm478_vm4, %v7496_v16 }
 0x100   : > { %8871 = vmatprep.subr.bf16.mxu0 %v9604_v24 }
 0x102   : > { %8007 = vmatmul.mubr.msk.f32.gmra.mrb[2].mxu0 %vm478_vm4, %v7497_v25 }
 0x103   : > { %8013 = vmatprep.mubr.msk.f32.mxu0 %vm478_vm4, %v7494_v17  ;;  %v2260_v17 = vsub.f32 %v7518_v2, %v2180_v6 }
 0x105   : > { %v2261_v23 = vand.u32 4294901760, %v2260_v17 }
 0x106   : > { %8014 = vmatmul.mubr.msk.f32.vlgmr.msra.gmra.mrb[0].mxu0 %vm478_vm4, %v7495_v26  ;;  %v2275_v26 = vand.u32 4294901760, %v9961_v19 }
 0x107   : > { %8016 = vmatprep.mubr.msk.f32.mxu0 %vm478_vm4, %v7496_v16  ;;  %8873 = vmatpush3.bf16.msra.mxu0 %v9797_v29  ;;  %v9959_v16 = vpack.c.bf16 %v2183_v9, %v2180_v6  ;;  %v2262_v31 = vsub.f32 %v2260_v17, %v2261_v23 }
 0x108   : > { %8874 = vmatprep.subr.bf16.mxu0 %v9604_v24  ;;  %v2276_v33 = vsub.f32 %v9961_v19, %v2275_v26 }
 0x109   : > { %8909 = vmatpush3.bf16.msra.mxu1 %v9959_v16  ;;  %v2263_v37 = vand.u32 4294901760, %v2262_v31 }
 0x10a   : > { %8017 = vmatmul.mubr.msk.f32.gmra.mrb[2].mxu0 %vm478_vm4, %v7497_v25  ;;  %v2268_v25 = vand.u32 4294901760, %v2267_v18  ;;  %8910 = vmatprep.subr.bf16.mxu1 %v9604_v24  ;;  %v2277_v42 = vand.u32 4294901760, %v2276_v33 }
 0x10b   : > { %8876 = vmatpush3.bf16.msra.mxu0 %v9815_v38  ;;  %8093 = vmatprep.mubr.msk.f32.mxu0 %vm9605_vm2, %v9606_v27 }
 0x10c   : > { %8877 = vmatprep.subr.bf16.mxu0 %v9604_v24  ;;  %v2269_v32 = vsub.f32 %v2267_v18, %v2268_v25  ;;  %v9979_v45 = vpack.c.bf16 %v2284_v43, %v2277_v42 }
 0x10d   : > { %8912 = vmatpush3.bf16.msra.mxu1 %v9966_v22 }
 0x10e   : > { %v2270_v39 = vand.u32 4294901760, %v2269_v32  ;;  %8913 = vmatprep.subr.bf16.mxu1 %v9604_v24 }
 0x110   : > { %v9975_v41 = vpack.c.bf16 %v2270_v39, %v2263_v37  ;;  %8160 = vmatmul.mubr.f32.vlgmr.msra.gmra.mrb[2].mxu1 %v2252_v44 }
 0x111   : > { %8170 = vmatprep.mubr.msk.f32.mxu1 %vm9605_vm2, %v9606_v27 }
 0x112   : > { %8915 = vmatpush3.bf16.msra.mxu1 %v9975_v41 }
 0x113   : > { %8916 = vmatprep.subr.bf16.mxu1 %v9604_v24 }
 0x116   : > { %8918 = vmatpush3.bf16.msra.mxu1 %v9979_v45 }
 0x117   : > { %8919 = vmatprep.subr.bf16.mxu1 %v9604_v24 }
 0x119   : > { %8171 = vmatmul.mubr.f32.vlgmr.msra.gmra.mrb[4].mxu1 %v9963_v21 }
 0x11a   : > { %8181 = vmatprep.mubr.msk.f32.mxu1 %vm9605_vm2, %v9606_v27 }
 0x156   : > { %v1586_v46 = vpop.f32.mrb[0].mxu1 }
 0x157   : > { %v8084_v47 = vpop.f32.mrb[1].mxu1 }
 0x158   : > { %v9991_v47 = vpack.c.bf16 %v2281_v20, %v9961_v19 }
 0x1d9   : > { %v9934_v48 = vpop.f32.mrb[0].mxu0 }
 0x1da   : > { %v1061_v49 = vpop.f32.mrb[1].mxu0 }
 0x1db   : > { %v1590_v50 = vadd.f32 %v1586_v46, %v1061_v49  ;;  %v9985_v46 = vpack.c.bf16 %v2267_v18, %v2260_v17  ;;  %v10000_v49 = vld [vmem:[%s10783_s4 + $0x40] sm:$0xff] }
 0x1dd   : > { %9426 = vtanh.f32 %v1590_v50  ;;  %v9936_v51 = vpop.f32.mrb[2].mxu0  ;;  %v7512_v54 = vmul.f32 -1.442695, %v1590_v50  ;;  %8921 = vmatpush3.bf16.msra.mxu1 %v9985_v46  ;;  %v10006_v50 = vld [vmem:[%s10783_s4 + $0x48] sm:$0xff] }
 0x1de   : > { %v9938_v52 = vpop.f32.mrb[3].mxu0  ;;  %8922 = vmatprep.subr.bf16.mxu1 %v9604_v24 }
 0x1df   : > { %9428 = vpow2.f32 %v7512_v54  ;;  %v2670_v54 = vand.u32 4294901760, %v10006_v50 }
 0x1e1   : > { %8924 = vmatpush3.bf16.msra.mxu1 %v9991_v47 }
 0x1e2   : > { %8925 = vmatprep.subr.bf16.mxu1 %v9604_v24 }
 0x1e4   : > { %8182 = vmatmul.mubr.f32.vlgmr.msra.gmra.mrb[6].mxu1 %v2249_v28 }
 0x1e5   : > { %8927 = vmatpush3.bf16.msra.mxu1 %v9959_v16  ;;  %8192 = vmatprep.mubr.msk.f32.mxu1 %vm9605_vm2, %v9606_v27 }
 0x1e6   : > { %8928 = vmatprep.subr.bf16.mxu1 %v9604_v24 }
 0x1e7   : > { %v9427_v53 = vpop.eup %9426 }
 0x1e8   : > { %1605 = vrot.lane.b32.xlu0 %v9427_v53, %s9608_s9  ;;  %v2667_v53 = vand.u32 4294901760, %v10000_v49 }
 0x1e9   : > { %v9429_v55 = vpop.eup %9428  ;;  %8930 = vmatpush3.bf16.msra.mxu1 %v9966_v22 }
 0x1ea   : > { %v1595_v56 = vadd.f32 1.0, %v9429_v55  ;;  %v10017_v55 = vld [vmem:[%s10783_s4 + $0x50] sm:$0xff]  ;;  %8931 = vmatprep.subr.bf16.mxu1 %v9604_v24  ;;  %v10089_v37 = vpack.c.bf16 %v2670_v54, %v2667_v53 }
 0x1ec   : > { %9430 = vrcp.f32 %v1595_v56  ;;  %v10022_v56 = vld [vmem:[%s10783_s4 + $0x58] sm:$0xff]  ;;  %8193 = vmatmul.mubr.f32.vlgmr.msra.gmra.mrb[8].mxu1 %v2250_v35 }
 0x1ed   : > { %8203 = vmatprep.mubr.msk.f32.mxu1 %vm9605_vm2, %v9606_v27 }
 0x1f6   : > { %v9941_v58 = vpop.eup %9430 }
 0x1f7   : > { %v1603_v63 = vmul.f32 %v9941_v58, %v1601_v61  ;;  %v10031_v61 = vsub.f32 %v10006_v50, %v2670_v54 }
 0x1f9   : > { %v2755_v4 = vand.u32 4294901760, %v10031_v61 }
 0x1fb   : > { %v2756_v11 = vsub.f32 %v10031_v61, %v2755_v4 }
 0x1fd   : > { %v2757_v15 = vand.u32 4294901760, %v2756_v11 }
 0x25a   : > { %v1606_v59 = vpop.permute.xlu0 %1605 }
 0x25b   : > { %v1608_v60 = vmul.f32 %v9941_v58, %v1606_v59  ;;  %v10025_v59 = vsub.f32 %v10000_v49, %v2667_v53 }
 0x25d   : > { %1610 = vrot.lane.b32.xlu0 %v1608_v60, %s9607_s22  ;;  %v10028_v60 = vpack.c.bf16 %v2268_v25, %v2261_v23  ;;  %v2748_v2 = vand.u32 4294901760, %v10025_v59 }
 0x25f   : > { %8933 = vmatpush3.bf16.msra.mxu1 %v10028_v60  ;;  %v2749_v9 = vsub.f32 %v10025_v59, %v2748_v2 }
 0x260   : > { %8934 = vmatprep.subr.bf16.mxu1 %v9604_v24 }
 0x261   : > { %v2750_v14 = vand.u32 4294901760, %v2749_v9 }
 0x263   : > { %v10072_v19 = vpack.c.bf16 %v2757_v15, %v2750_v14 }
 0x2cf   : > { %v1611_v0 = vpop.permute.xlu0 %1610 }
 0x2d0   : > { %v1613_v1 = vadd.f32 %v1611_v0, %v1603_v63  ;;  %v2673_v63 = vand.u32 4294901760, %v10017_v55  ;;  %v2676_v0 = vand.u32 4294901760, %v10022_v56 }
 0x2d2   : > { %9432 = vtanh.f32 %v1613_v1  ;;  %v10044_v5 = vsub.f32 %v10017_v55, %v2673_v63  ;;  %v10047_v6 = vsub.f32 %v10022_v56, %v2676_v0  ;;  %v10095_v43 = vpack.c.bf16 %v2676_v0, %v2673_v63 }
 0x2d4   : > { %v2762_v12 = vand.u32 4294901760, %v10044_v5  ;;  %v2769_v13 = vand.u32 4294901760, %v10047_v6 }
 0x2d6   : > { %v2763_v17 = vsub.f32 %v10044_v5, %v2762_v12  ;;  %v2770_v18 = vsub.f32 %v10047_v6, %v2769_v13 }
 0x2d8   : > { %v2764_v20 = vand.u32 4294901760, %v2763_v17  ;;  %v2771_v23 = vand.u32 4294901760, %v2770_v18 }
 0x2da   : > { %v10077_v25 = vpack.c.bf16 %v2771_v23, %v2764_v20 }
 0x2dc   : > { %v9433_v34 = vpop.eup %9432 }
 0x2dd   : > { %1616 = vrot.lane.b32.xlu1 %v9433_v34, %s9608_s9 }
 0x2e1   : > { %1626 = vrot.lane.b32.xlu1 %v1613_v1, %s9609_s14  ;;  %v10036_v1 = vpack.c.bf16 %v2282_v30, %v2275_v26 }
 0x2e3   : > { %8936 = vmatpush3.bf16.msra.mxu1 %v10036_v1 }
 0x2e4   : > { %8937 = vmatprep.subr.bf16.mxu1 %v9604_v24 }
 0x2e6   : > { %8204 = vmatmul.mubr.f32.vlgmr.msra.gmra.mrb[10].mxu1 %v9963_v21 }
 0x2e7   : > { %8939 = vmatpush3.bf16.msra.mxu1 %v9959_v16  ;;  %8214 = vmatprep.mubr.msk.f32.mxu1 %vm9605_vm2, %v9606_v27 }
 0x2e8   : > { %8940 = vmatprep.subr.bf16.mxu1 %v9604_v24 }
 0x2eb   : > { %8942 = vmatpush3.bf16.msra.mxu1 %v9966_v22 }
 0x2ec   : > { %8949 = vmatprep.subr.bf16.mxu1 %v9604_v24 }
 0x2ee   : > { %8215 = vmatmul.mubr.f32.vlgmr.msra.gmra.mrb[12].mxu1 %v9963_v21  ;;  %v2254_v21 = vpop.f32.mrb[2].mxu1 }
 0x2ef   : > { %8951 = vmatpush3.bf16.msra.mxu1 %v10072_v19  ;;  %8236 = vmatprep.mubr.msk.f32.mxu1 %vm9605_vm2, %v9606_v27  ;;  %v8161_v31 = vpop.f32.mrb[3].mxu1 }
 0x2f0   : > { %8952 = vmatprep.subr.bf16.mxu1 %v9604_v24  ;;  %v2345_v32 = vpop.f32.mrb[4].mxu1 }
 0x2f1   : > { %v2346_v33 = vadd.f32 %v2345_v32, %v2254_v21  ;;  %v8172_v34 = vpop.f32.mrb[5].mxu1 }
 0x2f2   : > { %v2425_v39 = vpop.f32.mrb[6].mxu1 }
 0x2f3   : > { %8954 = vmatpush3.bf16.msra.mxu1 %v10077_v25  ;;  %v8183_v42 = vpop.f32.mrb[7].mxu1 }
 0x2f4   : > { %8961 = vmatprep.subr.bf16.mxu1 %v9604_v24  ;;  %v2502_v53 = vpop.f32.mrb[8].mxu1  ;;  %v10203_v42 = vld [vmem:[%s10784_s5 + $0x1] ss:$0 sm:$0xff] }
 0x2f5   : > { %v8194_v63 = vpop.f32.mrb[9].mxu1 }
 0x34f   : > { %v1617_v26 = vpop.permute.xlu1 %1616 }
 0x350   : > { %v1619_v28 = vmul.f32 %v9941_v58, %v1617_v26  ;;  %v2426_v58 = vadd.f32 %v2425_v39, %v2346_v33 }
 0x352   : > { %1621 = vrot.lane.b32.xlu0 %v1619_v28, %s9607_s22  ;;  %v2503_v56 = vadd.f32 %v2502_v53, %v2426_v58 }
 0x353   : > { %v1627_v30 = vpop.permute.xlu1 %1626 }
 0x354   : > { %1629 = vst.msk [vmem:[#allocation3] sm:$0xff] %vm1101_vm1, %v1627_v30 }
 0x3b9   : > { %v2585_v14 = vpop.f32.mrb[10].mxu1 }
 0x3ba   : > { %v2586_v17 = vadd.f32 %v2585_v14, %v2503_v56  ;;  %v8205_v18 = vpop.f32.mrb[11].mxu1 }
 0x3c1   : > { %v2660_v20 = vpop.f32.mrb[12].mxu1 }
 0x3c2   : > { %v10124_v23 = vadd.f32 %v2660_v20, %v2586_v17 }
 0x3c4   : > { %v1622_v35 = vpop.permute.xlu0 %1621 }
 0x3c5   : > { %1624 = vst.msk [vmem:[#allocation2] sm:$0xff] %vm1101_vm1, %v1622_v35  ;;  %v2664_v36 = vsel %vm1101_vm1, %v1622_v35, 0  ;;  %v2126_v35 = vld [vmem:[#allocation3] sm:$0xff] }
 0x3c6   : > { %v10091_v40 = vand.u32 4294901760, %v2664_v36 }
 0x3c8   : > { %8237 = vmatmul.mubr.f32.vlgmr.msra.gmra.mrb[14].mxu1 %v10091_v40  ;;  %v10100_v44 = vsub.f32 %v2664_v36, %v10091_v40  ;;  %v3153_v36 = vld [vmem:[#allocation3 + $0x8] sm:$0xff] }
 0x3c9   : > { %8963 = vmatpush3.bf16.msra.mxu1 %v10089_v37  ;;  %8258 = vmatprep.mubr.msk.f32.mxu1 %vm9605_vm2, %v9606_v27 }
 0x3ca   : > { %8964 = vmatprep.subr.bf16.mxu1 %v9604_v24  ;;  %v2737_v54 = vand.u32 4294901760, %v10100_v44 }
 0x3cc   : > { %v1630_v49 = vld [vmem:[#allocation2] sm:$0xff] }
 0x3cd   : > { %8966 = vmatpush3.bf16.msra.mxu1 %v10095_v43  ;;  %v1638_v50 = vsel %vm1101_vm1, %v1630_v49, 0 }
 0x3ce   : > { %8973 = vmatprep.subr.bf16.mxu1 %v9604_v24  ;;  %v1709_v55 = vand.u32 4294901760, %v1638_v50 }
 0x3d0   : > { %8259 = vmatmul.mubr.f32.vlgmr.msra.gmra.mrb[16].mxu1 %v2737_v54  ;;  %v1710_v0 = vsub.f32 %v1638_v50, %v1709_v55 }
 0x3d1   : > { %8975 = vmatpush3.bf16.msra.mxu1 %v10089_v37  ;;  %8280 = vmatprep.mubr.msk.f32.mxu1 %vm9605_vm2, %v9606_v27 }
 0x3d2   : > { %8976 = vmatprep.subr.bf16.mxu1 %v9604_v24  ;;  %v1711_v9 = vand.u32 4294901760, %v1710_v0 }
 0x3d4   : > { %v1712_v11 = vsub.f32 %v1710_v0, %v1711_v9 }
 0x3d5   : > { %8978 = vmatpush3.bf16.msra.mxu1 %v10095_v43 }
 0x3d6   : > { %v1713_v15 = vand.u32 4294901760, %v1712_v11  ;;  %9015 = vmatprep.subr.bf16.mxu1 %v9604_v24 }
 0x3d8   : > { %8281 = vmatmul.mubr.f32.vlgmr.msra.gmra.mrb[18].mxu1 %v10091_v40  ;;  %8094 = vmatmul.mubr.f32.vlgmr.msra.gmra.mrb[4].mxu0 %v1713_v15 }
 0x3d9   : > { %8879 = vmatpush3.bf16.msra.mxu0 %v9834_v57  ;;  %8104 = vmatprep.mubr.msk.f32.mxu0 %vm9605_vm2, %v9606_v27  ;;  %v8216_v57 = vpop.f32.mrb[13].mxu1 }
 0x3da   : > { %8880 = vmatprep.subr.bf16.mxu0 %v9604_v24  ;;  %9017 = vmatpush3.bf16.msra.mxu1 %v9959_v16 }
 0x3db   : > { %9018 = vmatprep.subr.bf16.mxu1 %v9604_v24  ;;  %8357 = vmatprep.mubr.msk.f32.mxu1 %vm9605_vm2, %v9606_v27 }
 0x3dd   : > { %8882 = vmatpush3.bf16.msra.mxu0 %v9839_v62  ;;  %v2738_v62 = vsub.f32 %v10100_v44, %v2737_v54 }
 0x3de   : > { %8883 = vmatprep.subr.bf16.mxu0 %v9604_v24  ;;  %9020 = vmatpush3.bf16.msra.mxu1 %v9966_v22 }
 0x3df   : > { %9021 = vmatprep.subr.bf16.mxu1 %v9604_v24 }
 0x3e0   : > { %8105 = vmatmul.mubr.f32.vlgmr.msra.gmra.mrb[4].mxu0 %v1709_v55 }
 0x3e1   : > { %8885 = vmatpush3.bf16.msra.mxu0 %v9849_v3  ;;  %8115 = vmatprep.mubr.msk.f32.mxu0 %vm9605_vm2, %v9606_v27  ;;  %v2739_v3 = vand.u32 4294901760, %v2738_v62 }
 0x3e2   : > { %8886 = vmatprep.subr.bf16.mxu0 %v9604_v24 }
 0x3e5   : > { %8888 = vmatpush3.bf16.msra.mxu0 %v9860_v7  ;;  %v10176_v7 = vpack.c.bf16 %v2755_v4, %v2748_v2 }
 0x3e6   : > { %8889 = vmatprep.subr.bf16.mxu0 %v9604_v24 }
 0x3e8   : > { %8116 = vmatmul.mubr.f32.vlgmr.msra.gmra.mrb[4].mxu0 %v1710_v0 }
 0x3e9   : > { %8891 = vmatpush3.bf16.msra.mxu0 %v9797_v29  ;;  %8126 = vmatprep.mubr.msk.f32.mxu0 %vm9605_vm2, %v9606_v27 }
 0x3ea   : > { %8892 = vmatprep.subr.bf16.mxu0 %v9604_v24 }
 0x3ed   : > { %8894 = vmatpush3.bf16.msra.mxu0 %v9815_v38 }
 0x3ee   : > { %8895 = vmatprep.subr.bf16.mxu0 %v9604_v24 }
 0x3f0   : > { %8127 = vmatmul.mubr.f32.vlgmr.msra.gmra.mrb[4].mxu0 %v1711_v9 }
 0x3f1   : > { %8897 = vmatpush3.bf16.msra.mxu0 %v9874_v8  ;;  %8137 = vmatprep.mubr.msk.f32.mxu0 %vm9605_vm2, %v9606_v27  ;;  %v10185_v8 = vpack.c.bf16 %v2769_v13, %v2762_v12 }
 0x3f2   : > { %8898 = vmatprep.subr.bf16.mxu0 %v9604_v24 }
 0x3f5   : > { %8900 = vmatpush3.bf16.msra.mxu0 %v9880_v10 }
 0x3f6   : > { %8901 = vmatprep.subr.bf16.mxu0 %v9604_v24 }
 0x3f8   : > { %8138 = vmatmul.mubr.f32.vlgmr.msra.gmra.mrb[4].mxu0 %v1709_v55 }
 0x3f9   : > { %8903 = vmatpush3.bf16.msra.mxu0 %v9797_v29  ;;  %8148 = vmatprep.mubr.msk.f32.mxu0 %vm9605_vm2, %v9606_v27  ;;  %v10160_v29 = vpack.c.bf16 %v10031_v61, %v10025_v59 }
 0x3fa   : > { %8904 = vmatprep.subr.bf16.mxu0 %v9604_v24 }
 0x3fd   : > { %8906 = vmatpush3.bf16.msra.mxu0 %v9815_v38  ;;  %v10166_v38 = vpack.c.bf16 %v10047_v6, %v10044_v5 }
 0x3fe   : > { %8943 = vmatprep.subr.bf16.mxu0 %v9604_v24 }
 0x400   : > { %8149 = vmatmul.mubr.f32.vlgmr.msra.gmra.mrb[4].mxu0 %v1709_v55 }
 0x401   : > { %8945 = vmatpush3.bf16.msra.mxu0 %v10089_v37  ;;  %8225 = vmatprep.mubr.msk.f32.mxu0 %vm9605_vm2, %v9606_v27 }
 0x402   : > { %8946 = vmatprep.subr.bf16.mxu0 %v9604_v24 }
 0x405   : > { %8948 = vmatpush3.bf16.msra.mxu0 %v10095_v43 }
 0x406   : > { %8955 = vmatprep.subr.bf16.mxu0 %v9604_v24 }
 0x408   : > { %8226 = vmatmul.mubr.f32.vlgmr.msra.gmra.mrb[6].mxu0 %v2739_v3 }
 0x409   : > { %8957 = vmatpush3.bf16.msra.mxu0 %v10160_v29  ;;  %8247 = vmatprep.mubr.msk.f32.mxu0 %vm9605_vm2, %v9606_v27 }
 0x40a   : > { %8958 = vmatprep.subr.bf16.mxu0 %v9604_v24 }
 0x40d   : > { %8960 = vmatpush3.bf16.msra.mxu0 %v10166_v38 }
 0x40e   : > { %8967 = vmatprep.subr.bf16.mxu0 %v9604_v24 }
 0x410   : > { %8248 = vmatmul.mubr.f32.vlgmr.msra.gmra.mrb[8].mxu0 %v10100_v44 }
 0x411   : > { %8969 = vmatpush3.bf16.msra.mxu0 %v10176_v7  ;;  %8269 = vmatprep.mubr.msk.f32.mxu0 %vm9605_vm2, %v9606_v27 }
 0x412   : > { %8970 = vmatprep.subr.bf16.mxu0 %v9604_v24 }
 0x415   : > { %8972 = vmatpush3.bf16.msra.mxu0 %v10185_v8 }
 0x416   : > { %8979 = vmatprep.subr.bf16.mxu0 %v9604_v24 }
 0x418   : > { %8270 = vmatmul.mubr.f32.vlgmr.msra.gmra.mrb[10].mxu0 %v10091_v40 }
 0x419   : > { %8291 = vmatprep.mubr.msk.f32.mxu0 %vm9605_vm2, %v9606_v27 }
 0x49b   : > { %v2832_v10 = vpop.f32.mrb[14].mxu1 }
 0x49c   : > { %v8238_v59 = vpop.f32.mrb[15].mxu1 }
 0x4a3   : > { %v2989_v61 = vpop.f32.mrb[16].mxu1 }
 0x4a4   : > { %v8260_v2 = vpop.f32.mrb[17].mxu1 }
 0x4ab   : > { %v3147_v4 = vpop.f32.mrb[18].mxu1 }
 0x4ac   : > { %v8282_v5 = vpop.f32.mrb[19].mxu1 }
 0x4ad   : > { %v3196_v5 = vld [vmem:[%s10783_s4 + $0x20] sm:$0xff] }
 0x4d3   : > { %v2121_v6 = vpop.f32.mrb[4].mxu0 }
 0x4d4   : > { %v2125_v12 = vadd.f32 %v9934_v48, %v2121_v6  ;;  %v8150_v13 = vpop.f32.mrb[5].mxu0  ;;  %v3197_v6 = vld [vmem:[%s10783_s4 + $0x28] sm:$0xff] }
 0x4d5   : > { %v3204_v13 = vand.u32 4294901760, %v3196_v5 }
 0x4d6   : > { %9434 = vtanh.f32 %v2125_v12  ;;  %v7513_v53 = vmul.f32 -1.442695, %v2125_v12  ;;  %v3198_v12 = vld [vmem:[%s10783_s4 + $0x30] sm:$0xff] }
 0x4db   : > { %v2741_v26 = vpop.f32.mrb[6].mxu0 }
 0x4dc   : > { %v2742_v28 = vadd.f32 %v2741_v26, %v10124_v23  ;;  %v8227_v30 = vpop.f32.mrb[7].mxu0  ;;  %v3207_v26 = vand.u32 4294901760, %v3197_v6 }
 0x4dd   : > { %v3210_v30 = vand.u32 4294901760, %v3198_v12 }
 0x4de   : > { %v2833_v21 = vadd.f32 %v2832_v10, %v2742_v28  ;;  %v3199_v28 = vld [vmem:[%s10783_s4 + $0x38] sm:$0xff] }
 0x4e0   : > { %v9435_v31 = vpop.eup %9434 }
 0x4e1   : > { %2140 = vrot.lane.b32.xlu0 %v9435_v31, %s9608_s9 }
 0x4e3   : > { %v2912_v32 = vpop.f32.mrb[8].mxu0 }
 0x4e4   : > { %v2913_v33 = vadd.f32 %v2912_v32, %v2833_v21  ;;  %v8249_v34 = vpop.f32.mrb[9].mxu0  ;;  %v3213_v21 = vand.u32 4294901760, %v3199_v28  ;;  %v10223_v32 = vpack.c.bf16 %v3207_v26, %v3204_v13 }
 0x4e5   : > { %2135 = vrot.lane.b32.xlu0 %v2126_v35, %s9607_s22  ;;  %v3291_v34 = vsub.f32 %v3197_v6, %v3207_v26  ;;  %v3298_v35 = vsub.f32 %v3198_v12, %v3210_v30 }
 0x4e6   : > { %v2990_v39 = vadd.f32 %v2989_v61, %v2913_v33  ;;  %v3284_v33 = vsub.f32 %v3196_v5, %v3204_v13  ;;  %8981 = vmatpush3.bf16.msra.mxu0 %v10223_v32 }
 0x4e7   : > { %8982 = vmatprep.subr.bf16.mxu0 %v9604_v24 }
 0x4e9   : > { %3162 = vrot.lane.b32.xlu0 %v3153_v36, %s9607_s22 }
 0x4eb   : > { %v3072_v48 = vpop.f32.mrb[10].mxu0 }
 0x4ec   : > { %v3073_v40 = vadd.f32 %v3072_v48, %v2990_v39  ;;  %v8271_v58 = vpop.f32.mrb[11].mxu0  ;;  %v3305_v39 = vsub.f32 %v3199_v28, %v3213_v21  ;;  %v10226_v48 = vpack.c.bf16 %v3213_v21, %v3210_v30 }
 0x4ed   : > { %v3292_v58 = vand.u32 4294901760, %v3291_v34 }
 0x4ee   : > { %v3148_v44 = vadd.f32 %v3147_v4, %v3073_v40  ;;  %v3285_v40 = vand.u32 4294901760, %v3284_v33  ;;  %8984 = vmatpush3.bf16.msra.mxu0 %v10226_v48 }
 0x4ef   : > { %8985 = vmatprep.subr.bf16.mxu0 %v9604_v24 }
 0x4f0   : > { %v3151_v49 = vadd.f32 %v10203_v42, %v3148_v44  ;;  %v3286_v44 = vsub.f32 %v3284_v33, %v3285_v40 }
 0x4f2   : > { %9436 = vtanh.f32 %v3151_v49  ;;  %v7522_v56 = vmul.f32 -1.442695, %v3151_v49  ;;  %v3293_v49 = vsub.f32 %v3291_v34, %v3292_v58 }
 0x4f3   : > { %9438 = vpow2.f32 %v7513_v53 }
 0x4f4   : > { %v3294_v53 = vand.u32 4294901760, %v3293_v49 }
 0x4fc   : > { %v9437_v50 = vpop.eup %9436 }
 0x4fd   : > { %3167 = vrot.lane.b32.xlu1 %v9437_v50, %s9608_s9  ;;  %v9439_v54 = vpop.eup %9438  ;;  %v3287_v50 = vand.u32 4294901760, %v3286_v44 }
 0x4fe   : > { %v2130_v55 = vadd.f32 1.0, %v9439_v54  ;;  %v3299_v54 = vand.u32 4294901760, %v3298_v35 }
 0x500   : > { %9440 = vrcp.f32 %v2130_v55  ;;  %v3306_v55 = vand.u32 4294901760, %v3305_v39 }
 0x501   : > { %9442 = vpow2.f32 %v7522_v56  ;;  %v10233_v56 = vpack.c.bf16 %v3294_v53, %v3287_v50 }
 0x50a   : > { %v9441_v63 = vpop.eup %9440 }
 0x50b   : > { %v9443_v11 = vpop.eup %9442 }
 0x50c   : > { %v3157_v14 = vadd.f32 1.0, %v9443_v11 }
 0x50e   : > { %9444 = vrcp.f32 %v3157_v14 }
 0x518   : > { %v9445_v15 = vpop.eup %9444 }
 0x553   : > { %v2141_v0 = vpop.permute.xlu0 %2140 }
 0x554   : > { %v2143_v9 = vmul.f32 %v9441_v63, %v2141_v0  ;;  %v3307_v0 = vsub.f32 %v3305_v39, %v3306_v55 }
 0x556   : > { %2145 = vrot.lane.b32.xlu1 %v2143_v9, %s9607_s22  ;;  %v3308_v11 = vand.u32 4294901760, %v3307_v0 }
 0x557   : > { %v2136_v20 = vpop.permute.xlu0 %2135 }
 0x558   : > { %v2138_v23 = vmul.f32 %v9441_v63, %v2136_v20 }
 0x55b   : > { %v3163_v10 = vpop.permute.xlu0 %3162 }
 0x55c   : > { %v3165_v59 = vmul.f32 %v9445_v15, %v3163_v10 }
 0x56f   : > { %v3168_v17 = vpop.permute.xlu1 %3167 }
 0x570   : > { %v3170_v18 = vmul.f32 %v9445_v15, %v3168_v17  ;;  %v10237_v17 = vpack.c.bf16 %v3291_v34, %v3284_v33 }
 0x572   : > { %3172 = vrot.lane.b32.xlu1 %v3170_v18, %s9607_s22  ;;  %v10239_v18 = vpack.c.bf16 %v3305_v39, %v3298_v35 }
 0x5c8   : > { %v2146_v57 = vpop.permute.xlu1 %2145 }
 0x5c9   : > { %v2148_v62 = vadd.f32 %v2146_v57, %v2138_v23  ;;  %v10242_v57 = vpack.c.bf16 %v3292_v58, %v3285_v40 }
 0x5cb   : > { %9446 = vtanh.f32 %v2148_v62 }
 0x5d5   : > { %v9447_v3 = vpop.eup %9446 }
 0x5d6   : > { %2151 = vrot.lane.b32.xlu0 %v9447_v3, %s9608_s9 }
 0x5e4   : > { %v3173_v61 = vpop.permute.xlu1 %3172 }
 0x5e5   : > { %v3175_v2 = vadd.f32 %v3173_v61, %v3165_v59 }
 0x5e7   : > { %9448 = vtanh.f32 %v3175_v2 }
 0x5f1   : > { %v9449_v4 = vpop.eup %9448 }
 0x5f2   : > { %3178 = vrot.lane.b32.xlu1 %v9449_v4, %s9608_s9 }
 0x648   : > { %v2152_v31 = vpop.permute.xlu0 %2151 }
 0x649   : > { %v2154_v36 = vmul.f32 %v9441_v63, %v2152_v31  ;;  %v3300_v63 = vsub.f32 %v3298_v35, %v3299_v54 }
 0x64b   : > { %2156 = vrot.lane.b32.xlu0 %v2154_v36, %s9607_s22  ;;  %v3301_v9 = vand.u32 4294901760, %v3300_v63 }
 0x64d   : > { %v10235_v14 = vpack.c.bf16 %v3308_v11, %v3301_v9 }
 0x64f   : > { %2161 = vrot.lane.b32.xlu0 %v2148_v62, %s9609_s14  ;;  %v10245_v62 = vpack.c.bf16 %v3306_v55, %v3299_v54 }
 0x664   : > { %v3179_v20 = vpop.permute.xlu1 %3178 }
 0x665   : > { %v3181_v23 = vmul.f32 %v9445_v15, %v3179_v20 }
 0x667   : > { %3183 = vrot.lane.b32.xlu1 %v3181_v23, %s9607_s22 }
 0x66b   : > { %3188 = vrot.lane.b32.xlu1 %v3175_v2, %s9609_s14 }
 0x6bd   : > { %v2157_v3 = vpop.permute.xlu0 %2156 }
 0x6be   : > { %2159 = vst.msk [vmem:[#allocation2] sm:$0xff] %vm1101_vm1, %v2157_v3  ;;  %v4225_v35 = vsel %vm1101_vm1, %v2157_v3, 0 }
 0x6bf   : > { %v10283_v36 = vand.u32 4294901760, %v4225_v35 }
 0x6c1   : > { %v2162_v10 = vpop.permute.xlu0 %2161  ;;  %v10292_v39 = vsub.f32 %v4225_v35, %v10283_v36 }
 0x6c2   : > { %2164 = vst.msk [vmem:[#allocation3] sm:$0xff] %vm1101_vm1, %v2162_v10 }
 0x6c5   : > { %v3193_v59 = vld [vmem:[#allocation2] sm:$0xff] }
 0x6c6   : > { %v3201_v61 = vsel %vm1101_vm1, %v3193_v59, 0 }
 0x6c7   : > { %v3272_v4 = vand.u32 4294901760, %v3201_v61 }
 0x6c9   : > { %v3273_v15 = vsub.f32 %v3201_v61, %v3272_v4  ;;  %v3689_v54 = vld [vmem:[#allocation3] sm:$0xff] }
 0x6cb   : > { %v3274_v5 = vand.u32 4294901760, %v3273_v15 }
 0x6cd   : > { %v3275_v6 = vsub.f32 %v3273_v15, %v3274_v5 }
 0x6cf   : > { %v3276_v12 = vand.u32 4294901760, %v3275_v6 }
 0x6d1   : > { %8292 = vmatmul.mubr.f32.vlgmr.msra.gmra.mrb[12].mxu0 %v3276_v12 }
 0x6d2   : > { %8987 = vmatpush3.bf16.msra.mxu0 %v10233_v56  ;;  %8302 = vmatprep.mubr.msk.f32.mxu0 %vm9605_vm2, %v9606_v27 }
 0x6d3   : > { %8988 = vmatprep.subr.bf16.mxu0 %v9604_v24 }
 0x6d6   : > { %8990 = vmatpush3.bf16.msra.mxu0 %v10235_v14 }
 0x6d7   : > { %8991 = vmatprep.subr.bf16.mxu0 %v9604_v24 }
 0x6d9   : > { %v3184_v2 = vpop.permute.xlu1 %3183  ;;  %8303 = vmatmul.mubr.f32.vlgmr.msra.gmra.mrb[12].mxu0 %v3272_v4 }
 0x6da   : > { %3186 = vst.msk [vmem:[#allocation2 + $0x8] sm:$0xff] %vm1101_vm1, %v3184_v2  ;;  %3192 = vst.msk [vmem:[%s9774_s8] sm:$0xff] %vm1101_vm1, %v3184_v2  ;;  %8993 = vmatpush3.bf16.msra.mxu0 %v10237_v17  ;;  %8313 = vmatprep.mubr.msk.f32.mxu0 %vm9605_vm2, %v9606_v27 }
 0x6db   : > { %8994 = vmatprep.subr.bf16.mxu0 %v9604_v24 }
 0x6dd   : > { %v3189_v13 = vpop.permute.xlu1 %3188 }
 0x6de   : > { %3191 = vst.msk [vmem:[#allocation3 + $0x8] sm:$0xff] %vm1101_vm1, %v3189_v13  ;;  %8996 = vmatpush3.bf16.msra.mxu0 %v10239_v18 }
 0x6df   : > { %8997 = vmatprep.subr.bf16.mxu0 %v9604_v24 }
 0x6e1   : > { %8314 = vmatmul.mubr.f32.vlgmr.msra.gmra.mrb[12].mxu0 %v3273_v15  ;;  %v3728_v26 = vld [vmem:[#allocation2 + $0x8] sm:$0xff] }
 0x6e2   : > { %8999 = vmatpush3.bf16.msra.mxu0 %v10223_v32  ;;  %8324 = vmatprep.mubr.msk.f32.mxu0 %vm9605_vm2, %v9606_v27  ;;  %v3738_v28 = vsel %vm1101_vm1, %v3728_v26, 0 }
 0x6e3   : > { %9000 = vmatprep.subr.bf16.mxu0 %v9604_v24  ;;  %v10271_v30 = vand.u32 4294901760, %v3738_v28 }
 0x6e5   : > { %v3810_v21 = vsub.f32 %v3738_v28, %v10271_v30  ;;  %v4713_v0 = vld [vmem:[#allocation3 + $0x8] sm:$0xff] }
 0x6e6   : > { %9002 = vmatpush3.bf16.msra.mxu0 %v10226_v48 }
 0x6e7   : > { %9003 = vmatprep.subr.bf16.mxu0 %v9604_v24  ;;  %v3811_v31 = vand.u32 4294901760, %v3810_v21 }
 0x6e9   : > { %8325 = vmatmul.mubr.f32.vlgmr.msra.gmra.mrb[12].mxu0 %v3274_v5  ;;  %v3812_v33 = vsub.f32 %v3810_v21, %v3811_v31 }
 0x6ea   : > { %9005 = vmatpush3.bf16.msra.mxu0 %v10242_v57  ;;  %8335 = vmatprep.mubr.msk.f32.mxu0 %vm9605_vm2, %v9606_v27 }
 0x6eb   : > { %9006 = vmatprep.subr.bf16.mxu0 %v9604_v24  ;;  %v3813_v34 = vand.u32 4294901760, %v3812_v33 }
 0x6ed   : > { %8358 = vmatmul.mubr.f32.vlgmr.msra.gmra.mrb[20].mxu1 %v3813_v34 }
 0x6ee   : > { %9023 = vmatpush3.bf16.msra.mxu1 %v9975_v41  ;;  %9008 = vmatpush3.bf16.msra.mxu0 %v10245_v62  ;;  %v4298_v41 = vand.u32 4294901760, %v10292_v39 }
 0x6ef   : > { %9024 = vmatprep.subr.bf16.mxu1 %v9604_v24  ;;  %9009 = vmatprep.subr.bf16.mxu0 %v9604_v24 }
 0x6f0   : > { %8368 = vmatprep.mubr.msk.f32.mxu1 %vm9605_vm2, %v9606_v27 }
 0x6f1   : > { %8336 = vmatmul.mubr.f32.vlgmr.msra.gmra.mrb[12].mxu0 %v3272_v4 }
 0x6f2   : > { %9026 = vmatpush3.bf16.msra.mxu1 %v9979_v45  ;;  %9011 = vmatpush3.bf16.msra.mxu0 %v10223_v32  ;;  %v4299_v45 = vsub.f32 %v10292_v39, %v4298_v41 }
 0x6f3   : > { %9027 = vmatprep.subr.bf16.mxu1 %v9604_v24  ;;  %9012 = vmatprep.subr.bf16.mxu0 %v9604_v24 }
 0x6f4   : > { %8346 = vmatprep.mubr.msk.f32.mxu0 %vm9605_vm2, %v9606_v27 }
 0x6f5   : > { %8369 = vmatmul.mubr.f32.vlgmr.msra.gmra.mrb[22].mxu1 %v10271_v30 }
 0x6f6   : > { %9029 = vmatpush3.bf16.msra.mxu1 %v9985_v46  ;;  %9014 = vmatpush3.bf16.msra.mxu0 %v10226_v48  ;;  %v4300_v46 = vand.u32 4294901760, %v4299_v45 }
 0x6f7   : > { %9030 = vmatprep.subr.bf16.mxu1 %v9604_v24  ;;  %9051 = vmatprep.subr.bf16.mxu0 %v9604_v24 }
 0x6f8   : > { %8379 = vmatprep.mubr.msk.f32.mxu1 %vm9605_vm2, %v9606_v27 }
 0x6f9   : > { %8347 = vmatmul.mubr.f32.vlgmr.msra.gmra.mrb[12].mxu0 %v3272_v4 }
 0x6fa   : > { %9032 = vmatpush3.bf16.msra.mxu1 %v9991_v47  ;;  %9053 = vmatpush3.bf16.msra.mxu0 %v10089_v37 }
 0x6fb   : > { %9033 = vmatprep.subr.bf16.mxu1 %v9604_v24  ;;  %9054 = vmatprep.subr.bf16.mxu0 %v9604_v24 }
 0x6fc   : > { %8423 = vmatprep.mubr.msk.f32.mxu0 %vm9605_vm2, %v9606_v27 }
 0x6fd   : > { %8380 = vmatmul.mubr.f32.vlgmr.msra.gmra.mrb[24].mxu1 %v3810_v21 }
 0x6fe   : > { %9035 = vmatpush3.bf16.msra.mxu1 %v9959_v16  ;;  %9056 = vmatpush3.bf16.msra.mxu0 %v10095_v43 }
 0x6ff   : > { %9036 = vmatprep.subr.bf16.mxu1 %v9604_v24  ;;  %9063 = vmatprep.subr.bf16.mxu0 %v9604_v24 }
 0x700   : > { %8390 = vmatprep.mubr.msk.f32.mxu1 %vm9605_vm2, %v9606_v27 }
 0x701   : > { %8424 = vmatmul.mubr.f32.vlgmr.msra.gmra.mrb[14].mxu0 %v4300_v46 }
 0x702   : > { %9038 = vmatpush3.bf16.msra.mxu1 %v9966_v22  ;;  %9065 = vmatpush3.bf16.msra.mxu0 %v10160_v29 }
 0x703   : > { %9039 = vmatprep.subr.bf16.mxu1 %v9604_v24  ;;  %9066 = vmatprep.subr.bf16.mxu0 %v9604_v24 }
 0x704   : > { %8445 = vmatprep.mubr.msk.f32.mxu0 %vm9605_vm2, %v9606_v27 }
 0x705   : > { %8391 = vmatmul.mubr.f32.vlgmr.msra.gmra.mrb[26].mxu1 %v3811_v31 }
 0x706   : > { %9041 = vmatpush3.bf16.msra.mxu1 %v10028_v60  ;;  %9068 = vmatpush3.bf16.msra.mxu0 %v10166_v38 }
 0x707   : > { %9042 = vmatprep.subr.bf16.mxu1 %v9604_v24  ;;  %9075 = vmatprep.subr.bf16.mxu0 %v9604_v24 }
 0x708   : > { %8401 = vmatprep.mubr.msk.f32.mxu1 %vm9605_vm2, %v9606_v27 }
 0x709   : > { %8446 = vmatmul.mubr.f32.vlgmr.msra.gmra.mrb[16].mxu0 %v10292_v39 }
 0x70a   : > { %9044 = vmatpush3.bf16.msra.mxu1 %v10036_v1  ;;  %9077 = vmatpush3.bf16.msra.mxu0 %v10176_v7 }
 0x70b   : > { %9045 = vmatprep.subr.bf16.mxu1 %v9604_v24  ;;  %9078 = vmatprep.subr.bf16.mxu0 %v9604_v24 }
 0x70c   : > { %8467 = vmatprep.mubr.msk.f32.mxu0 %vm9605_vm2, %v9606_v27 }
 0x70d   : > { %8402 = vmatmul.mubr.f32.vlgmr.msra.gmra.mrb[28].mxu1 %v10271_v30 }
 0x70e   : > { %9047 = vmatpush3.bf16.msra.mxu1 %v9959_v16  ;;  %9080 = vmatpush3.bf16.msra.mxu0 %v10185_v8 }
 0x70f   : > { %9048 = vmatprep.subr.bf16.mxu1 %v9604_v24  ;;  %8412 = vmatprep.mubr.msk.f32.mxu1 %vm9605_vm2, %v9606_v27 }
 0x710   : > { %9087 = vmatprep.subr.bf16.mxu0 %v9604_v24 }
 0x711   : > { %8468 = vmatmul.mubr.f32.vlgmr.msra.gmra.mrb[18].mxu0 %v10283_v36 }
 0x712   : > { %9050 = vmatpush3.bf16.msra.mxu1 %v9966_v22  ;;  %9089 = vmatpush3.bf16.msra.mxu0 %v10223_v32 }
 0x713   : > { %9057 = vmatprep.subr.bf16.mxu1 %v9604_v24  ;;  %9090 = vmatprep.subr.bf16.mxu0 %v9604_v24 }
 0x714   : > { %8489 = vmatprep.mubr.msk.f32.mxu0 %vm9605_vm2, %v9606_v27 }
 0x715   : > { %8413 = vmatmul.mubr.f32.vlgmr.msra.gmra.mrb[30].mxu1 %v10271_v30 }
 0x716   : > { %9059 = vmatpush3.bf16.msra.mxu1 %v10072_v19  ;;  %8434 = vmatprep.mubr.msk.f32.mxu1 %vm9605_vm2, %v9606_v27 }
 0x717   : > { %9060 = vmatprep.subr.bf16.mxu1 %v9604_v24  ;;  %9092 = vmatpush3.bf16.msra.mxu0 %v10226_v48 }
 0x718   : > { %9093 = vmatprep.subr.bf16.mxu0 %v9604_v24 }
 0x71a   : > { %9062 = vmatpush3.bf16.msra.mxu1 %v10077_v25 }
 0x71b   : > { %9069 = vmatprep.subr.bf16.mxu1 %v9604_v24 }
 0x71d   : > { %8435 = vmatmul.mubr.f32.vlgmr.msra.gmra.mrb[32].mxu1 %v10283_v36 }
 0x71e   : > { %9071 = vmatpush3.bf16.msra.mxu1 %v10089_v37  ;;  %8456 = vmatprep.mubr.msk.f32.mxu1 %vm9605_vm2, %v9606_v27 }
 0x71f   : > { %9072 = vmatprep.subr.bf16.mxu1 %v9604_v24 }
 0x722   : > { %9074 = vmatpush3.bf16.msra.mxu1 %v10095_v43 }
 0x723   : > { %9081 = vmatprep.subr.bf16.mxu1 %v9604_v24 }
 0x725   : > { %8457 = vmatmul.mubr.f32.vlgmr.msra.gmra.mrb[34].mxu1 %v4298_v41 }
 0x726   : > { %9083 = vmatpush3.bf16.msra.mxu1 %v10089_v37  ;;  %8478 = vmatprep.mubr.msk.f32.mxu1 %vm9605_vm2, %v9606_v27 }
 0x727   : > { %9084 = vmatprep.subr.bf16.mxu1 %v9604_v24 }
 0x72a   : > { %9086 = vmatpush3.bf16.msra.mxu1 %v10095_v43 }
 0x72b   : > { %9123 = vmatprep.subr.bf16.mxu1 %v9604_v24 }
 0x72d   : > { %8479 = vmatmul.mubr.f32.vlgmr.msra.gmra.mrb[36].mxu1 %v10283_v36 }
 0x72e   : > { %8555 = vmatprep.mubr.msk.f32.mxu1 %vm9605_vm2, %v9606_v27 }
 0x7c0   : > { %v3815_v16 = vpop.f32.mrb[20].mxu1 }
 0x7c1   : > { %v8359_v22 = vpop.f32.mrb[21].mxu1 }
 0x7c8   : > { %v3906_v47 = vpop.f32.mrb[22].mxu1 }
 0x7c9   : > { %v3907_v60 = vadd.f32 %v3906_v47, %v3815_v16  ;;  %v8370_v1 = vpop.f32.mrb[23].mxu1 }
 0x7cc   : > { %v3684_v19 = vpop.f32.mrb[12].mxu0 }
 0x7cd   : > { %v3688_v25 = vadd.f32 %v3684_v19, %v9938_v52  ;;  %v8348_v37 = vpop.f32.mrb[13].mxu0 }
 0x7cf   : > { %9450 = vtanh.f32 %v3688_v25  ;;  %v7523_v31 = vmul.f32 -1.442695, %v3688_v25 }
 0x7d0   : > { %v3986_v29 = vpop.f32.mrb[24].mxu1 }
 0x7d1   : > { %v3987_v38 = vadd.f32 %v3986_v29, %v3907_v60  ;;  %v8381_v43 = vpop.f32.mrb[25].mxu1 }
 0x7d4   : > { %v4302_v7 = vpop.f32.mrb[14].mxu0 }
 0x7d5   : > { %v8425_v8 = vpop.f32.mrb[15].mxu0 }
 0x7d8   : > { %v4063_v40 = vpop.f32.mrb[26].mxu1 }
 0x7d9   : > { %v9451_v58 = vpop.eup %9450  ;;  %v4064_v44 = vadd.f32 %v4063_v40, %v3987_v38  ;;  %v8392_v49 = vpop.f32.mrb[27].mxu1 }
 0x7da   : > { %3703 = vrot.lane.b32.xlu0 %v9451_v58, %s9608_s9  ;;  %v7539_v58 = vld [vmem:[%s10783_s4 + $0x60] sm:$0xff] }
 0x7db   : > { %v5302_v49 = vand.u32 4294901760, %v7539_v58 }
 0x7dc   : > { %v4473_v50 = vpop.f32.mrb[16].mxu0 }
 0x7dd   : > { %v8447_v53 = vpop.f32.mrb[17].mxu0 }
 0x7de   : > { %3698 = vrot.lane.b32.xlu0 %v3689_v54, %s9607_s22  ;;  %v5382_v54 = vsub.f32 %v7539_v58, %v5302_v49 }
 0x7e0   : > { %v4146_v55 = vpop.f32.mrb[28].mxu1 }
 0x7e1   : > { %v4147_v52 = vadd.f32 %v4146_v55, %v4064_v44  ;;  %v8403_v63 = vpop.f32.mrb[29].mxu1  ;;  %v7540_v44 = vld [vmem:[%s10783_s4 + $0x68] sm:$0xff] }
 0x7e2   : > { %4722 = vrot.lane.b32.xlu0 %v4713_v0, %s9607_s22  ;;  %v7541_v63 = vld [vmem:[%s10783_s4 + $0x70] sm:$0xff]  ;;  %v7542_v0 = vld [vmem:[%s10783_s4 + $0x78] sm:$0xff] }
 0x7e4   : > { %v4633_v9 = vpop.f32.mrb[18].mxu0 }
 0x7e5   : > { %v8469_v11 = vpop.f32.mrb[19].mxu0 }
 0x7e6   : > { %v5308_v11 = vand.u32 4294901760, %v7541_v63 }
 0x7e8   : > { %v4221_v20 = vpop.f32.mrb[30].mxu1 }
 0x7e9   : > { %v4222_v23 = vadd.f32 %v4221_v20, %v4147_v52  ;;  %v8414_v3 = vpop.f32.mrb[31].mxu1  ;;  %v5311_v20 = vand.u32 4294901760, %v7542_v0 }
 0x7eb   : > { %v4303_v10 = vadd.f32 %v4302_v7, %v4222_v23  ;;  %v5383_v23 = vand.u32 4294901760, %v5382_v54 }
 0x7f0   : > { %v4393_v59 = vpop.f32.mrb[32].mxu1 }
 0x7f1   : > { %v4394_v61 = vadd.f32 %v4393_v59, %v4303_v10  ;;  %v8436_v4 = vpop.f32.mrb[33].mxu1  ;;  %v10407_v10 = vpack.c.bf16 %v5311_v20, %v5308_v11  ;;  %v5396_v59 = vsub.f32 %v7541_v63, %v5308_v11 }
 0x7f2   : > { %v5384_v4 = vsub.f32 %v5382_v54, %v5383_v23 }
 0x7f3   : > { %v4474_v15 = vadd.f32 %v4473_v50, %v4394_v61  ;;  %v5305_v50 = vand.u32 4294901760, %v7540_v44  ;;  %v5403_v61 = vsub.f32 %v7542_v0, %v5311_v20 }
 0x7f5   : > { %v10396_v53 = vpack.c.bf16 %v5305_v50, %v5302_v49  ;;  %v5389_v55 = vsub.f32 %v7540_v44, %v5305_v50 }
 0x7f7   : > { %9125 = vmatpush3.bf16.msra.mxu1 %v10396_v53  ;;  %v5390_v3 = vand.u32 4294901760, %v5389_v55 }
 0x7f8   : > { %v4550_v5 = vpop.f32.mrb[34].mxu1  ;;  %9126 = vmatprep.subr.bf16.mxu1 %v9604_v24 }
 0x7f9   : > { %v4551_v6 = vadd.f32 %v4550_v5, %v4474_v15  ;;  %v8458_v12 = vpop.f32.mrb[35].mxu1  ;;  %v5391_v15 = vsub.f32 %v5389_v55, %v5390_v3  ;;  %v5385_v5 = vand.u32 4294901760, %v5384_v4 }
 0x7fa   : > { %v5397_v12 = vand.u32 4294901760, %v5396_v59 }
 0x7fb   : > { %v4634_v2 = vadd.f32 %v4633_v9, %v4551_v6  ;;  %9128 = vmatpush3.bf16.msra.mxu1 %v10407_v10  ;;  %v5392_v6 = vand.u32 4294901760, %v5391_v15 }
 0x7fc   : > { %9129 = vmatprep.subr.bf16.mxu1 %v9604_v24 }
 0x800   : > { %v4708_v13 = vpop.f32.mrb[36].mxu1 }
 0x801   : > { %v4709_v26 = vadd.f32 %v4708_v13, %v4634_v2  ;;  %v8480_v28 = vpop.f32.mrb[37].mxu1  ;;  %v5404_v2 = vand.u32 4294901760, %v5403_v61  ;;  %v10411_v13 = vpack.c.bf16 %v5392_v6, %v5385_v5 }
 0x803   : > { %v4712_v30 = vadd.f32 %v10203_v42, %v4709_v26  ;;  %v5398_v26 = vsub.f32 %v5396_v59, %v5397_v12  ;;  %v5405_v28 = vsub.f32 %v5403_v61, %v5404_v2 }
 0x805   : > { %9452 = vtanh.f32 %v4712_v30  ;;  %v7532_v41 = vmul.f32 -1.442695, %v4712_v30  ;;  %v5399_v30 = vand.u32 4294901760, %v5398_v26 }
 0x806   : > { %9454 = vpow2.f32 %v7523_v31 }
 0x80f   : > { %v9453_v21 = vpop.eup %9452 }
 0x810   : > { %4727 = vrot.lane.b32.xlu1 %v9453_v21, %s9608_s9  ;;  %v9455_v33 = vpop.eup %9454  ;;  %v5406_v21 = vand.u32 4294901760, %v5405_v28 }
 0x811   : > { %v3693_v34 = vadd.f32 1.0, %v9455_v33  ;;  %v10415_v33 = vpack.c.bf16 %v5389_v55, %v5382_v54 }
 0x812   : > { %v10413_v31 = vpack.c.bf16 %v5406_v21, %v5399_v30 }
 0x813   : > { %9456 = vrcp.f32 %v3693_v34  ;;  %v10417_v34 = vpack.c.bf16 %v5403_v61, %v5396_v59 }
 0x814   : > { %9458 = vpow2.f32 %v7532_v41 }
 0x81d   : > { %v9457_v35 = vpop.eup %9456 }
 0x81e   : > { %v9459_v45 = vpop.eup %9458 }
 0x81f   : > { %v4717_v46 = vadd.f32 1.0, %v9459_v45 }
 0x821   : > { %9460 = vrcp.f32 %v4717_v46 }
 0x82b   : > { %v9461_v42 = vpop.eup %9460 }
 0x84c   : > { %v3704_v36 = vpop.permute.xlu0 %3703 }
 0x84d   : > { %v3706_v39 = vmul.f32 %v9457_v35, %v3704_v36  ;;  %v10421_v36 = vpack.c.bf16 %v5404_v2, %v5397_v12 }
 0x84f   : > { %3708 = vrot.lane.b32.xlu1 %v3706_v39, %s9607_s22 }
 0x850   : > { %v3699_v47 = vpop.permute.xlu0 %3698 }
 0x851   : > { %v3701_v60 = vmul.f32 %v9457_v35, %v3699_v47 }
 0x854   : > { %v4723_v37 = vpop.permute.xlu0 %4722 }
 0x855   : > { %v4725_v29 = vmul.f32 %v9461_v42, %v4723_v37 }
 0x882   : > { %v4728_v16 = vpop.permute.xlu1 %4727 }
 0x883   : > { %v4730_v22 = vmul.f32 %v9461_v42, %v4728_v16 }
 0x885   : > { %4732 = vrot.lane.b32.xlu1 %v4730_v22, %s9607_s22 }
 0x8c1   : > { %v3709_v1 = vpop.permute.xlu1 %3708 }
 0x8c2   : > { %v3711_v19 = vadd.f32 %v3709_v1, %v3701_v60 }
 0x8c4   : > { %9462 = vtanh.f32 %v3711_v19 }
 0x8ce   : > { %v9463_v25 = vpop.eup %9462 }
 0x8cf   : > { %3714 = vrot.lane.b32.xlu0 %v9463_v25, %s9608_s9 }
 0x8f7   : > { %v4733_v38 = vpop.permute.xlu1 %4732 }
 0x8f8   : > { %v4735_v43 = vadd.f32 %v4733_v38, %v4725_v29  ;;  %v7537_v38 = vld [vmem:[%s10783_s4 + $0x50] sm:$0xff] }
 0x8fa   : > { %9464 = vtanh.f32 %v4735_v43 }
 0x904   : > { %v9465_v7 = vpop.eup %9464 }
 0x905   : > { %4738 = vrot.lane.b32.xlu1 %v9465_v7, %s9608_s9  ;;  %v5795_v7 = vand.u32 4294901760, %v7537_v38 }
 0x941   : > { %v3715_v8 = vpop.permute.xlu0 %3714 }
 0x942   : > { %v3717_v40 = vmul.f32 %v9457_v35, %v3715_v8  ;;  %v10419_v35 = vpack.c.bf16 %v5390_v3, %v5383_v23 }
 0x944   : > { %3719 = vrot.lane.b32.xlu0 %v3717_v40, %s9607_s22 }
 0x948   : > { %4748 = vrot.lane.b32.xlu0 %v4735_v43, %s9609_s14  ;;  %v7538_v43 = vld [vmem:[%s10783_s4 + $0x58] sm:$0xff] }
 0x949   : > { %v5798_v8 = vand.u32 4294901760, %v7538_v43 }
 0x94b   : > { %v10488_v49 = vpack.c.bf16 %v5798_v8, %v5795_v7  ;;  %v10502_v63 = vsub.f32 %v7538_v43, %v5798_v8 }
 0x94c   : > { %3724 = vrot.lane.b32.xlu0 %v3711_v19, %s9609_s14 }
 0x94d   : > { %v5891_v6 = vand.u32 4294901760, %v10502_v63 }
 0x977   : > { %v4739_v52 = vpop.permute.xlu1 %4738 }
 0x978   : > { %v4741_v9 = vmul.f32 %v9461_v42, %v4739_v52  ;;  %v10500_v52 = vsub.f32 %v7537_v38, %v5795_v7 }
 0x97a   : > { %4743 = vrot.lane.b32.xlu1 %v4741_v9, %s9607_s22  ;;  %v10513_v23 = vpack.c.bf16 %v10502_v63, %v10500_v52  ;;  %v5884_v5 = vand.u32 4294901760, %v10500_v52 }
 0x97c   : > { %v10532_v12 = vpack.c.bf16 %v5891_v6, %v5884_v5  ;;  %v5885_v21 = vsub.f32 %v10500_v52, %v5884_v5  ;;  %v10615_v5 = vld [vmem:[%s10784_s5 + $0x1] ss:$0 sm:$0xff] }
 0x9b6   : > { %v3720_v39 = vpop.permute.xlu0 %3719 }
 0x9b7   : > { %3722 = vst.msk [vmem:[#allocation2] sm:$0xff] %vm1101_vm1, %v3720_v39 }
 0x9ba   : > { %v4749_v41 = vpop.permute.xlu0 %4748 }
 0x9bb   : > { %4751 = vst.msk [vmem:[#allocation3 + $0x8] sm:$0xff] %vm1101_vm1, %v4749_v41 }
 0x9be   : > { %v3725_v45 = vpop.permute.xlu0 %3724  ;;  %v4754_v46 = vld [vmem:[#allocation2] sm:$0xff] }
 0x9bf   : > { %3727 = vst.msk [vmem:[#allocation3] sm:$0xff] %vm1101_vm1, %v3725_v45  ;;  %v4762_v42 = vsel %vm1101_vm1, %v4754_v46, 0  ;;  %v5886_v45 = vand.u32 4294901760, %v5885_v21 }
 0x9c0   : > { %v4833_v16 = vand.u32 4294901760, %v4762_v42 }
 0x9c2   : > { %v6274_v22 = vld [vmem:[#allocation3 + $0x8] sm:$0xff]  ;;  %v4834_v47 = vsub.f32 %v4762_v42, %v4833_v16 }
 0x9c3   : > { %6283 = vrot.lane.b32.xlu0 %v6274_v22, %s9607_s22 }
 0x9c4   : > { %v4835_v60 = vand.u32 4294901760, %v4834_v47 }
 0x9c6   : > { %v5250_v1 = vld [vmem:[#allocation3] sm:$0xff]  ;;  %v4836_v19 = vsub.f32 %v4834_v47, %v4835_v60 }
 0x9c7   : > { %5259 = vrot.lane.b32.xlu0 %v5250_v1, %s9607_s22 }
 0x9c8   : > { %v4837_v25 = vand.u32 4294901760, %v4836_v19 }
 0x9ca   : > { %8490 = vmatmul.mubr.f32.vlgmr.msra.gmra.mrb[20].mxu0 %v4837_v25 }
 0x9cb   : > { %9095 = vmatpush3.bf16.msra.mxu0 %v10233_v56  ;;  %8500 = vmatprep.mubr.msk.f32.mxu0 %vm9605_vm2, %v9606_v27  ;;  %v5786_v56 = vsel %vm1101_vm1, %v3720_v39, 0  ;;  %v5892_v39 = vsub.f32 %v10502_v63, %v5891_v6 }
 0x9cc   : > { %9096 = vmatprep.subr.bf16.mxu0 %v9604_v24 }
 0x9cd   : > { %v5893_v46 = vand.u32 4294901760, %v5892_v39 }
 0x9cf   : > { %9098 = vmatpush3.bf16.msra.mxu0 %v10235_v14  ;;  %v10453_v14 = vand.u32 4294901760, %v5786_v56  ;;  %v10582_v42 = vpack.c.bf16 %v5893_v46, %v5886_v45 }
 0x9d0   : > { %9099 = vmatprep.subr.bf16.mxu0 %v9604_v24 }
 0x9d1   : > { %v10466_v37 = vsub.f32 %v5786_v56, %v10453_v14 }
 0x9d2   : > { %8501 = vmatmul.mubr.f32.vlgmr.msra.gmra.mrb[20].mxu0 %v4833_v16 }
 0x9d3   : > { %9101 = vmatpush3.bf16.msra.mxu0 %v10237_v17  ;;  %8511 = vmatprep.mubr.msk.f32.mxu0 %vm9605_vm2, %v9606_v27  ;;  %v7535_v17 = vld [vmem:[%s10783_s4 + $0x40] sm:$0xff]  ;;  %v5859_v40 = vand.u32 4294901760, %v10466_v37 }
 0x9d4   : > { %9102 = vmatprep.subr.bf16.mxu0 %v9604_v24 }
 0x9d7   : > { %9104 = vmatpush3.bf16.msra.mxu0 %v10239_v18  ;;  %v7536_v18 = vld [vmem:[%s10783_s4 + $0x48] sm:$0xff] }
 0x9d8   : > { %9105 = vmatprep.subr.bf16.mxu0 %v9604_v24 }
 0x9da   : > { %8512 = vmatmul.mubr.f32.vlgmr.msra.gmra.mrb[20].mxu0 %v4834_v47 }
 0x9db   : > { %9107 = vmatpush3.bf16.msra.mxu0 %v10223_v32  ;;  %8522 = vmatprep.mubr.msk.f32.mxu0 %vm9605_vm2, %v9606_v27 }
 0x9dc   : > { %9108 = vmatprep.subr.bf16.mxu0 %v9604_v24 }
 0x9df   : > { %9110 = vmatpush3.bf16.msra.mxu0 %v10226_v48 }
 0x9e0   : > { %9111 = vmatprep.subr.bf16.mxu0 %v9604_v24 }
 0x9e2   : > { %8523 = vmatmul.mubr.f32.vlgmr.msra.gmra.mrb[20].mxu0 %v4835_v60 }
 0x9e3   : > { %9113 = vmatpush3.bf16.msra.mxu0 %v10242_v57  ;;  %8533 = vmatprep.mubr.msk.f32.mxu0 %vm9605_vm2, %v9606_v27  ;;  %v5789_v57 = vand.u32 4294901760, %v7535_v17 }
 0x9e4   : > { %9114 = vmatprep.subr.bf16.mxu0 %v9604_v24 }
 0x9e5   : > { %v10484_v58 = vsub.f32 %v7535_v17, %v5789_v57 }
 0x9e7   : > { %9116 = vmatpush3.bf16.msra.mxu0 %v10245_v62  ;;  %v5792_v62 = vand.u32 4294901760, %v7536_v18  ;;  %v5870_v3 = vand.u32 4294901760, %v10484_v58 }
 0x9e8   : > { %9117 = vmatprep.subr.bf16.mxu0 %v9604_v24 }
 0x9e9   : > { %v10486_v44 = vsub.f32 %v7536_v18, %v5792_v62  ;;  %v5871_v2 = vsub.f32 %v10484_v58, %v5870_v3 }
 0x9ea   : > { %8534 = vmatmul.mubr.f32.vlgmr.msra.gmra.mrb[20].mxu0 %v4833_v16 }
 0x9eb   : > { %9119 = vmatpush3.bf16.msra.mxu0 %v10223_v32  ;;  %8544 = vmatprep.mubr.msk.f32.mxu0 %vm9605_vm2, %v9606_v27  ;;  %v10479_v32 = vpack.c.bf16 %v5792_v62, %v5789_v57  ;;  %v10506_v0 = vpack.c.bf16 %v10486_v44, %v10484_v58  ;;  %v5877_v59 = vand.u32 4294901760, %v10486_v44  ;;  %v5872_v28 = vand.u32 4294901760, %v5871_v2 }
 0x9ec   : > { %v4744_v29 = vpop.permute.xlu1 %4743  ;;  %9120 = vmatprep.subr.bf16.mxu0 %v9604_v24 }
 0x9ed   : > { %4746 = vst.msk [vmem:[#allocation2 + $0x8] sm:$0xff] %vm1101_vm1, %v4744_v29  ;;  %7533 = vst.msk [vmem:[%s9774_s8 + $0x8] sm:$0xff] %vm1101_vm1, %v4744_v29  ;;  %v10521_v15 = vpack.c.bf16 %v5877_v59, %v5870_v3  ;;  %v5878_v26 = vsub.f32 %v10486_v44, %v5877_v59 }
 0x9ef   : > { %9122 = vmatpush3.bf16.msra.mxu0 %v10226_v48  ;;  %v5860_v48 = vsub.f32 %v10466_v37, %v5859_v40  ;;  %v5879_v30 = vand.u32 4294901760, %v5878_v26 }
 0x9f0   : > { %9159 = vmatprep.subr.bf16.mxu0 %v9604_v24 }
 0x9f1   : > { %v5861_v9 = vand.u32 4294901760, %v5860_v48  ;;  %v10577_v41 = vpack.c.bf16 %v5879_v30, %v5872_v28 }
 0x9f2   : > { %8545 = vmatmul.mubr.f32.vlgmr.msra.gmra.mrb[20].mxu0 %v4833_v16 }
 0x9f3   : > { %9161 = vmatpush3.bf16.msra.mxu0 %v10479_v32  ;;  %8621 = vmatprep.mubr.msk.f32.mxu0 %vm9605_vm2, %v9606_v27 }
 0x9f4   : > { %9162 = vmatprep.subr.bf16.mxu0 %v9604_v24  ;;  %v5289_v50 = vld [vmem:[#allocation2 + $0x8] sm:$0xff] }
 0x9f5   : > { %v5299_v54 = vsel %vm1101_vm1, %v5289_v50, 0 }
 0x9f6   : > { %v10497_v55 = vand.u32 4294901760, %v5299_v54 }
 0x9f7   : > { %9164 = vmatpush3.bf16.msra.mxu0 %v10488_v49 }
 0x9f8   : > { %9171 = vmatprep.subr.bf16.mxu0 %v9604_v24  ;;  %v5371_v11 = vsub.f32 %v5299_v54, %v10497_v55 }
 0x9fa   : > { %8622 = vmatmul.mubr.f32.vlgmr.msra.gmra.mrb[22].mxu0 %v5861_v9  ;;  %v5372_v20 = vand.u32 4294901760, %v5371_v11 }
 0x9fb   : > { %9173 = vmatpush3.bf16.msra.mxu0 %v10506_v0  ;;  %8643 = vmatprep.mubr.msk.f32.mxu0 %vm9605_vm2, %v9606_v27 }
 0x9fc   : > { %9174 = vmatprep.subr.bf16.mxu0 %v9604_v24  ;;  %v5373_v61 = vsub.f32 %v5371_v11, %v5372_v20 }
 0x9fe   : > { %v5374_v4 = vand.u32 4294901760, %v5373_v61 }
 0x9ff   : > { %9176 = vmatpush3.bf16.msra.mxu0 %v10513_v23 }
 0xa00   : > { %8556 = vmatmul.mubr.f32.vlgmr.msra.gmra.mrb[38].mxu1 %v5374_v4  ;;  %9183 = vmatprep.subr.bf16.mxu0 %v9604_v24 }
 0xa01   : > { %9131 = vmatpush3.bf16.msra.mxu1 %v10411_v13  ;;  %8566 = vmatprep.mubr.msk.f32.mxu1 %vm9605_vm2, %v9606_v27 }
 0xa02   : > { %9132 = vmatprep.subr.bf16.mxu1 %v9604_v24  ;;  %8644 = vmatmul.mubr.f32.vlgmr.msra.gmra.mrb[24].mxu0 %v10466_v37 }
 0xa03   : > { %9185 = vmatpush3.bf16.msra.mxu0 %v10521_v15  ;;  %8665 = vmatprep.mubr.msk.f32.mxu0 %vm9605_vm2, %v9606_v27 }
 0xa04   : > { %9186 = vmatprep.subr.bf16.mxu0 %v9604_v24 }
 0xa05   : > { %9134 = vmatpush3.bf16.msra.mxu1 %v10413_v31 }
 0xa06   : > { %9135 = vmatprep.subr.bf16.mxu1 %v9604_v24 }
 0xa07   : > { %9188 = vmatpush3.bf16.msra.mxu0 %v10532_v12 }
 0xa08   : > { %8567 = vmatmul.mubr.f32.vlgmr.msra.gmra.mrb[40].mxu1 %v10497_v55  ;;  %9195 = vmatprep.subr.bf16.mxu0 %v9604_v24 }
 0xa09   : > { %9137 = vmatpush3.bf16.msra.mxu1 %v10415_v33  ;;  %8577 = vmatprep.mubr.msk.f32.mxu1 %vm9605_vm2, %v9606_v27 }
 0xa0a   : > { %9138 = vmatprep.subr.bf16.mxu1 %v9604_v24  ;;  %8666 = vmatmul.mubr.f32.vlgmr.msra.gmra.mrb[26].mxu0 %v10453_v14 }
 0xa0b   : > { %9197 = vmatpush3.bf16.msra.mxu0 %v10396_v53  ;;  %8687 = vmatprep.mubr.msk.f32.mxu0 %vm9605_vm2, %v9606_v27 }
 0xa0c   : > { %9198 = vmatprep.subr.bf16.mxu0 %v9604_v24 }
 0xa0d   : > { %9140 = vmatpush3.bf16.msra.mxu1 %v10417_v34 }
 0xa0e   : > { %9141 = vmatprep.subr.bf16.mxu1 %v9604_v24 }
 0xa0f   : > { %9200 = vmatpush3.bf16.msra.mxu0 %v10407_v10 }
 0xa10   : > { %8578 = vmatmul.mubr.f32.vlgmr.msra.gmra.mrb[42].mxu1 %v5371_v11  ;;  %9207 = vmatprep.subr.bf16.mxu0 %v9604_v24 }
 0xa11   : > { %9143 = vmatpush3.bf16.msra.mxu1 %v10396_v53  ;;  %8588 = vmatprep.mubr.msk.f32.mxu1 %vm9605_vm2, %v9606_v27 }
 0xa12   : > { %9144 = vmatprep.subr.bf16.mxu1 %v9604_v24 }
 0xa15   : > { %9146 = vmatpush3.bf16.msra.mxu1 %v10407_v10 }
 0xa16   : > { %9147 = vmatprep.subr.bf16.mxu1 %v9604_v24 }
 0xa18   : > { %8589 = vmatmul.mubr.f32.vlgmr.msra.gmra.mrb[44].mxu1 %v5372_v20 }
 0xa19   : > { %9149 = vmatpush3.bf16.msra.mxu1 %v10419_v35  ;;  %8599 = vmatprep.mubr.msk.f32.mxu1 %vm9605_vm2, %v9606_v27 }
 0xa1a   : > { %9150 = vmatprep.subr.bf16.mxu1 %v9604_v24 }
 0xa1d   : > { %9152 = vmatpush3.bf16.msra.mxu1 %v10421_v36 }
 0xa1e   : > { %9153 = vmatprep.subr.bf16.mxu1 %v9604_v24 }
 0xa20   : > { %8600 = vmatmul.mubr.f32.vlgmr.msra.gmra.mrb[46].mxu1 %v10497_v55 }
 0xa21   : > { %9155 = vmatpush3.bf16.msra.mxu1 %v10396_v53  ;;  %8610 = vmatprep.mubr.msk.f32.mxu1 %vm9605_vm2, %v9606_v27 }
 0xa22   : > { %9156 = vmatprep.subr.bf16.mxu1 %v9604_v24 }
 0xa25   : > { %9158 = vmatpush3.bf16.msra.mxu1 %v10407_v10 }
 0xa26   : > { %9165 = vmatprep.subr.bf16.mxu1 %v9604_v24 }
 0xa28   : > { %8611 = vmatmul.mubr.f32.vlgmr.msra.gmra.mrb[48].mxu1 %v10497_v55 }
 0xa29   : > { %9167 = vmatpush3.bf16.msra.mxu1 %v10577_v41  ;;  %8632 = vmatprep.mubr.msk.f32.mxu1 %vm9605_vm2, %v9606_v27 }
 0xa2a   : > { %9168 = vmatprep.subr.bf16.mxu1 %v9604_v24 }
 0xa2d   : > { %9170 = vmatpush3.bf16.msra.mxu1 %v10582_v42 }
 0xa2e   : > { %9177 = vmatprep.subr.bf16.mxu1 %v9604_v24 }
 0xa30   : > { %8633 = vmatmul.mubr.f32.vlgmr.msra.gmra.mrb[50].mxu1 %v10453_v14 }
 0xa31   : > { %9179 = vmatpush3.bf16.msra.mxu1 %v10479_v32  ;;  %8654 = vmatprep.mubr.msk.f32.mxu1 %vm9605_vm2, %v9606_v27 }
 0xa32   : > { %9180 = vmatprep.subr.bf16.mxu1 %v9604_v24 }
 0xa35   : > { %9182 = vmatpush3.bf16.msra.mxu1 %v10488_v49 }
 0xa36   : > { %9189 = vmatprep.subr.bf16.mxu1 %v9604_v24 }
 0xa38   : > { %8655 = vmatmul.mubr.f32.vlgmr.msra.gmra.mrb[52].mxu1 %v5859_v40 }
 0xa39   : > { %9191 = vmatpush3.bf16.msra.mxu1 %v10479_v32  ;;  %8676 = vmatprep.mubr.msk.f32.mxu1 %vm9605_vm2, %v9606_v27 }
 0xa3a   : > { %9192 = vmatprep.subr.bf16.mxu1 %v9604_v24 }
 0xa3d   : > { %9194 = vmatpush3.bf16.msra.mxu1 %v10488_v49 }
 0xa3e   : > { %9201 = vmatprep.subr.bf16.mxu1 %v9604_v24 }
 0xa40   : > { %8677 = vmatmul.mubr.f32.vlgmr.msra.gmra.mrb[54].mxu1 %v10453_v14 }
 0xa41   : > { %9203 = vmatpush3.bf16.msra.mxu1 %v10411_v13  ;;  %8698 = vmatprep.mubr.msk.f32.mxu1 %vm9605_vm2, %v9606_v27 }
 0xa42   : > { %9204 = vmatprep.subr.bf16.mxu1 %v9604_v24 }
 0xa45   : > { %9206 = vmatpush3.bf16.msra.mxu1 %v10413_v31 }
 0xa46   : > { %9213 = vmatprep.subr.bf16.mxu1 %v9604_v24 }
 0xac5   : > { %v5245_v16 = vpop.f32.mrb[20].mxu0 }
 0xac6   : > { %v5249_v22 = vadd.f32 %v9936_v51, %v5245_v16  ;;  %v8546_v47 = vpop.f32.mrb[21].mxu0 }
 0xac8   : > { %v7534_v30 = vmul.f32 -1.442695, %v5249_v22 }
 0xacd   : > { %v5863_v60 = vpop.f32.mrb[22].mxu0 }
 0xace   : > { %v8623_v1 = vpop.f32.mrb[23].mxu0 }
 0xad3   : > { %v5376_v19 = vpop.f32.mrb[38].mxu1 }
 0xad4   : > { %v8557_v25 = vpop.f32.mrb[39].mxu1 }
 0xad5   : > { %v6034_v56 = vpop.f32.mrb[24].mxu0 }
 0xad6   : > { %v8645_v14 = vpop.f32.mrb[25].mxu0 }
 0xadb   : > { %v5467_v13 = vpop.f32.mrb[40].mxu1 }
 0xadc   : > { %v5468_v17 = vadd.f32 %v5467_v13, %v5376_v19  ;;  %v8568_v18 = vpop.f32.mrb[41].mxu1 }
 0xadd   : > { %v6194_v57 = vpop.f32.mrb[26].mxu0 }
 0xade   : > { %v8667_v62 = vpop.f32.mrb[27].mxu0 }
 0xae3   : > { %v5547_v37 = vpop.f32.mrb[42].mxu1 }
 0xae4   : > { %v5548_v29 = vadd.f32 %v5547_v37, %v5468_v17  ;;  %v8579_v31 = vpop.f32.mrb[43].mxu1 }
 0xaeb   : > { %v5624_v38 = vpop.f32.mrb[44].mxu1 }
 0xaec   : > { %v5625_v43 = vadd.f32 %v5624_v38, %v5548_v29  ;;  %v8590_v7 = vpop.f32.mrb[45].mxu1 }
 0xaf3   : > { %v5707_v8 = vpop.f32.mrb[46].mxu1 }
 0xaf4   : > { %v5708_v51 = vadd.f32 %v5707_v8, %v5625_v43  ;;  %v8601_v40 = vpop.f32.mrb[47].mxu1 }
 0xafb   : > { %v5782_v58 = vpop.f32.mrb[48].mxu1 }
 0xafc   : > { %v5783_v44 = vadd.f32 %v5782_v58, %v5708_v51  ;;  %v8612_v48 = vpop.f32.mrb[49].mxu1 }
 0xafe   : > { %v5864_v50 = vadd.f32 %v5863_v60, %v5783_v44 }
 0xb03   : > { %v5954_v54 = vpop.f32.mrb[50].mxu1 }
 0xb04   : > { %v5955_v55 = vadd.f32 %v5954_v54, %v5864_v50  ;;  %v8634_v52 = vpop.f32.mrb[51].mxu1 }
 0xb06   : > { %v6035_v63 = vadd.f32 %v6034_v56, %v5955_v55  ;;  %v6284_v56 = vpop.permute.xlu0 %6283 }
 0xb0a   : > { %v5260_v17 = vpop.permute.xlu0 %5259 }
 0xb0b   : > { %v6111_v9 = vpop.f32.mrb[52].mxu1 }
 0xb0c   : > { %v6112_v11 = vadd.f32 %v6111_v9, %v6035_v63  ;;  %v8656_v20 = vpop.f32.mrb[53].mxu1 }
 0xb0e   : > { %v6195_v3 = vadd.f32 %v6194_v57, %v6112_v11 }
 0xb13   : > { %v6269_v59 = vpop.f32.mrb[54].mxu1 }
 0xb14   : > { %v6270_v61 = vadd.f32 %v6269_v59, %v6195_v3  ;;  %v8678_v4 = vpop.f32.mrb[55].mxu1 }
 0xb16   : > { %v6273_v6 = vadd.f32 %v10615_v5, %v6270_v61 }
 0xb18   : > { %9466 = vtanh.f32 %v6273_v6  ;;  %v7543_v28 = vmul.f32 -1.442695, %v6273_v6 }
 0xb19   : > { %9468 = vtanh.f32 %v5249_v22 }
 0xb1a   : > { %9470 = vpow2.f32 %v7543_v28 }
 0xb1b   : > { %9472 = vpow2.f32 %v7534_v30 }
 0xb22   : > { %v9467_v2 = vpop.eup %9466 }
 0xb23   : > { %6288 = vrot.lane.b32.xlu1 %v9467_v2, %s9608_s9  ;;  %v9469_v26 = vpop.eup %9468 }
 0xb24   : > { %v9471_v21 = vpop.eup %9470 }
 0xb25   : > { %v6278_v39 = vadd.f32 1.0, %v9471_v21  ;;  %v9473_v45 = vpop.eup %9472 }
 0xb26   : > { %v5254_v46 = vadd.f32 1.0, %v9473_v45 }
 0xb27   : > { %5264 = vrot.lane.b32.xlu1 %v9469_v26, %s9608_s9  ;;  %9474 = vrcp.f32 %v6278_v39 }
 0xb28   : > { %9476 = vrcp.f32 %v5254_v46 }
 0xb31   : > { %v9475_v16 = vpop.eup %9474 }
 0xb32   : > { %v9477_v1 = vpop.eup %9476  ;;  %v6286_v22 = vmul.f32 %v9475_v16, %v6284_v56 }
 0xb33   : > { %v5262_v18 = vmul.f32 %v9477_v1, %v5260_v17 }
 0xb95   : > { %v6289_v47 = vpop.permute.xlu1 %6288 }
 0xb96   : > { %v6291_v60 = vmul.f32 %v9475_v16, %v6289_v47 }
 0xb98   : > { %6293 = vrot.lane.b32.xlu1 %v6291_v60, %s9607_s22 }
 0xb99   : > { %v5265_v19 = vpop.permute.xlu1 %5264 }
 0xb9a   : > { %v5267_v25 = vmul.f32 %v9477_v1, %v5265_v19 }
 0xb9c   : > { %5269 = vrot.lane.b32.xlu1 %v5267_v25, %s9607_s22 }
 0xc0a   : > { %v6294_v14 = vpop.permute.xlu1 %6293 }
 0xc0b   : > { %v6296_v13 = vadd.f32 %v6294_v14, %v6286_v22 }
 0xc0d   : > { %9478 = vtanh.f32 %v6296_v13 }
 0xc0e   : > { %v5270_v57 = vpop.permute.xlu1 %5269 }
 0xc0f   : > { %v10622_v62 = vadd.f32 %v5270_v57, %v5262_v18 }
 0xc11   : > { %9480 = vtanh.f32 %v10622_v62 }
 0xc17   : > { %v9479_v37 = vpop.eup %9478 }
 0xc18   : > { %6299 = vrot.lane.b32.xlu0 %v9479_v37, %s9608_s9 }
 0xc1b   : > { %v9481_v29 = vpop.eup %9480 }
 0xc1c   : > { %5275 = vrot.lane.b32.xlu1 %v9481_v29, %s9608_s9 }
 0xc8a   : > { %v6300_v31 = vpop.permute.xlu0 %6299 }
 0xc8b   : > { %v6302_v38 = vmul.f32 %v9475_v16, %v6300_v31 }
 0xc8d   : > { %6304 = vrot.lane.b32.xlu0 %v6302_v38, %s9607_s22 }
 0xc8e   : > { %v5276_v43 = vpop.permute.xlu1 %5275 }
 0xc8f   : > { %v5278_v7 = vmul.f32 %v9477_v1, %v5276_v43 }
 0xc91   : > { %5280 = vrot.lane.b32.xlu1 %v5278_v7, %s9607_s22  ;;  %6309 = vrot.lane.b32.xlu0 %v6296_v13, %s9609_s14 }
 0xcff   : > { %v6305_v8 = vpop.permute.xlu0 %6304 }
 0xd00   : > { %6307 = vst.msk [vmem:[#allocation2 + $0x8] sm:$0xff] %vm1101_vm1, %v6305_v8  ;;  %7544 = vst.msk [vmem:[%s9774_s8 + $0x10] sm:$0xff] %vm1101_vm1, %v6305_v8 }
 0xd03   : > { %v5281_v51 = vpop.permute.xlu1 %5280  ;;  %v6310_v40 = vpop.permute.xlu0 %6309 }
 0xd04   : > { %5283 = vst.msk [vmem:[#allocation2] sm:$0xff] %vm1101_vm1, %v5281_v51  ;;  %6312 = vst.msk [vmem:[#allocation3 + $0x8] sm:$0xff] %vm1101_vm1, %v6310_v40  ;;  %v6812_v9 = vsel %vm1101_vm1, %v5281_v51, 0 }
 0xd05   : > { %v6883_v11 = vand.u32 4294901760, %v6812_v9 }
 0xd07   : > { %v6315_v58 = vld [vmem:[#allocation2 + $0x8] sm:$0xff] }
 0xd08   : > { %v6325_v44 = vsel %vm1101_vm1, %v6315_v58, 0 }
 0xd09   : > { %v6396_v48 = vand.u32 4294901760, %v6325_v44 }
 0xd0b   : > { %v6397_v50 = vsub.f32 %v6325_v44, %v6396_v48  ;;  %8699 = vmatmul.mubr.f32.vlgmr.msra.gmra.mrb[56].mxu1 %v6396_v48  ;;  %v7300_v54 = vld [vmem:[#allocation3 + $0x8] sm:$0xff] }
 0xd0c   : > { %9215 = vmatpush3.bf16.msra.mxu1 %v10396_v53  ;;  %7309 = vrot.lane.b32.xlu0 %v7300_v54, %s9607_s22 }
 0xd0d   : > { %9216 = vmatprep.subr.bf16.mxu1 %v9604_v24  ;;  %8720 = vmatprep.mubr.msk.f32.mxu1 %vm9605_vm2, %v9606_v27  ;;  %v6398_v55 = vand.u32 4294901760, %v6397_v50 }
 0xd0f   : > { %v6399_v52 = vsub.f32 %v6397_v50, %v6398_v55 }
 0xd10   : > { %9218 = vmatpush3.bf16.msra.mxu1 %v10407_v10 }
 0xd11   : > { %9225 = vmatprep.subr.bf16.mxu1 %v9604_v24  ;;  %v6400_v63 = vand.u32 4294901760, %v6399_v52 }
 0xd13   : > { %8721 = vmatmul.mubr.f32.vlgmr.msra.gmra.mrb[58].mxu1 %v6398_v55  ;;  %8688 = vmatmul.mubr.f32.vlgmr.msra.gmra.mrb[28].mxu0 %v6400_v63 }
 0xd14   : > { %9209 = vmatpush3.bf16.msra.mxu0 %v10415_v33  ;;  %9227 = vmatpush3.bf16.msra.mxu1 %v10396_v53  ;;  %v6884_v53 = vsub.f32 %v6812_v9, %v6883_v11 }
 0xd15   : > { %9210 = vmatprep.subr.bf16.mxu0 %v9604_v24  ;;  %9228 = vmatprep.subr.bf16.mxu1 %v9604_v24 }
 0xd16   : > { %8709 = vmatprep.mubr.msk.f32.mxu0 %vm9605_vm2, %v9606_v27  ;;  %8742 = vmatprep.mubr.msk.f32.mxu1 %vm9605_vm2, %v9606_v27 }
 0xd18   : > { %9212 = vmatpush3.bf16.msra.mxu0 %v10417_v34  ;;  %9230 = vmatpush3.bf16.msra.mxu1 %v10407_v10  ;;  %v6885_v10 = vand.u32 4294901760, %v6884_v53 }
 0xd19   : > { %9219 = vmatprep.subr.bf16.mxu0 %v9604_v24  ;;  %9237 = vmatprep.subr.bf16.mxu1 %v9604_v24 }
 0xd1a   : > { %v6886_v33 = vsub.f32 %v6884_v53, %v6885_v10 }
 0xd1b   : > { %8710 = vmatmul.mubr.f32.vlgmr.msra.gmra.mrb[30].mxu0 %v6397_v50  ;;  %8743 = vmatmul.mubr.f32.vlgmr.msra.gmra.mrb[60].mxu1 %v6396_v48 }
 0xd1c   : > { %9221 = vmatpush3.bf16.msra.mxu0 %v10419_v35  ;;  %9239 = vmatpush3.bf16.msra.mxu1 %v10577_v41  ;;  %v6887_v34 = vand.u32 4294901760, %v6886_v33 }
 0xd1d   : > { %9222 = vmatprep.subr.bf16.mxu0 %v9604_v24  ;;  %9240 = vmatprep.subr.bf16.mxu1 %v9604_v24 }
 0xd1e   : > { %8731 = vmatprep.mubr.msk.f32.mxu0 %vm9605_vm2, %v9606_v27  ;;  %8764 = vmatprep.mubr.msk.f32.mxu1 %vm9605_vm2, %v9606_v27 }
 0xd20   : > { %9224 = vmatpush3.bf16.msra.mxu0 %v10421_v36  ;;  %9242 = vmatpush3.bf16.msra.mxu1 %v10582_v42 }
 0xd21   : > { %9231 = vmatprep.subr.bf16.mxu0 %v9604_v24  ;;  %9249 = vmatprep.subr.bf16.mxu1 %v9604_v24 }
 0xd23   : > { %8732 = vmatmul.mubr.f32.vlgmr.msra.gmra.mrb[32].mxu0 %v6396_v48  ;;  %8765 = vmatmul.mubr.f32.vlgmr.msra.gmra.mrb[62].mxu1 %v6883_v11 }
 0xd24   : > { %9233 = vmatpush3.bf16.msra.mxu0 %v10479_v32  ;;  %9251 = vmatpush3.bf16.msra.mxu1 %v10479_v32 }
 0xd25   : > { %9234 = vmatprep.subr.bf16.mxu0 %v9604_v24  ;;  %9252 = vmatprep.subr.bf16.mxu1 %v9604_v24 }
 0xd26   : > { %8753 = vmatprep.mubr.msk.f32.mxu0 %vm9605_vm2, %v9606_v27  ;;  %8786 = vmatprep.mubr.msk.f32.mxu1 %vm9605_vm2, %v9606_v27 }
 0xd28   : > { %9236 = vmatpush3.bf16.msra.mxu0 %v10488_v49  ;;  %9254 = vmatpush3.bf16.msra.mxu1 %v10488_v49 }
 0xd29   : > { %9243 = vmatprep.subr.bf16.mxu0 %v9604_v24  ;;  %9261 = vmatprep.subr.bf16.mxu1 %v9604_v24 }
 0xd2b   : > { %8754 = vmatmul.mubr.f32.vlgmr.msra.gmra.mrb[34].mxu0 %v6887_v34  ;;  %8787 = vmatmul.mubr.f32.vlgmr.msra.gmra.mrb[64].mxu1 %v6885_v10 }
 0xd2c   : > { %9245 = vmatpush3.bf16.msra.mxu0 %v10506_v0  ;;  %9263 = vmatpush3.bf16.msra.mxu1 %v10479_v32 }
 0xd2d   : > { %9246 = vmatprep.subr.bf16.mxu0 %v9604_v24  ;;  %9264 = vmatprep.subr.bf16.mxu1 %v9604_v24 }
 0xd2e   : > { %8775 = vmatprep.mubr.msk.f32.mxu0 %vm9605_vm2, %v9606_v27  ;;  %8808 = vmatprep.mubr.msk.f32.mxu1 %vm9605_vm2, %v9606_v27 }
 0xd30   : > { %9248 = vmatpush3.bf16.msra.mxu0 %v10513_v23  ;;  %9266 = vmatpush3.bf16.msra.mxu1 %v10488_v49 }
 0xd31   : > { %9255 = vmatprep.subr.bf16.mxu0 %v9604_v24 }
 0xd33   : > { %8776 = vmatmul.mubr.f32.vlgmr.msra.gmra.mrb[36].mxu0 %v6884_v53  ;;  %8809 = vmatmul.mubr.f32.vlgmr.msra.gmra.mrb[66].mxu1 %v6883_v11 }
 0xd34   : > { %9257 = vmatpush3.bf16.msra.mxu0 %v10521_v15  ;;  %8797 = vmatprep.mubr.msk.f32.mxu0 %vm9605_vm2, %v9606_v27 }
 0xd35   : > { %9258 = vmatprep.subr.bf16.mxu0 %v9604_v24 }
 0xd38   : > { %9260 = vmatpush3.bf16.msra.mxu0 %v10532_v12 }
 0xd3b   : > { %8798 = vmatmul.mubr.f32.vlgmr.msra.gmra.mrb[38].mxu0 %v6883_v11 }
 0xd7e   : > { %v7310_v43 = vpop.permute.xlu0 %7309 }
 0xdde   : > { %v6493_v35 = vpop.f32.mrb[56].mxu1 }
 0xddf   : > { %v8700_v36 = vpop.f32.mrb[57].mxu1 }
 0xde6   : > { %v6650_v32 = vpop.f32.mrb[58].mxu1  ;;  %v6402_v0 = vpop.f32.mrb[28].mxu0 }
 0xde7   : > { %v6494_v23 = vadd.f32 %v6493_v35, %v6402_v0  ;;  %v8722_v49 = vpop.f32.mrb[59].mxu1  ;;  %v8689_v41 = vpop.f32.mrb[29].mxu0 }
 0xdee   : > { %v6573_v42 = vpop.f32.mrb[30].mxu0  ;;  %v6808_v20 = vpop.f32.mrb[60].mxu1 }
 0xdef   : > { %v6574_v3 = vadd.f32 %v6573_v42, %v6494_v23  ;;  %v8711_v59 = vpop.f32.mrb[31].mxu0  ;;  %v8744_v15 = vpop.f32.mrb[61].mxu1 }
 0xdf1   : > { %v6651_v61 = vadd.f32 %v6650_v32, %v6574_v3 }
 0xdf6   : > { %v6733_v4 = vpop.f32.mrb[32].mxu0  ;;  %v6980_v27 = vpop.f32.mrb[62].mxu1 }
 0xdf7   : > { %v6734_v6 = vadd.f32 %v6733_v4, %v6651_v61  ;;  %v8733_v24 = vpop.f32.mrb[33].mxu0  ;;  %v8766_v2 = vpop.f32.mrb[63].mxu1 }
 0xdf9   : > { %v6809_v12 = vadd.f32 %v6808_v20, %v6734_v6 }
 0xdfe   : > { %v6889_v26 = vpop.f32.mrb[34].mxu0  ;;  %v7137_v28 = vpop.f32.mrb[64].mxu1 }
 0xdff   : > { %v6890_v30 = vadd.f32 %v6889_v26, %v6809_v12  ;;  %v8755_v21 = vpop.f32.mrb[35].mxu0  ;;  %v8788_v39 = vpop.f32.mrb[65].mxu1 }
 0xe01   : > { %v6981_v45 = vadd.f32 %v6980_v27, %v6890_v30 }
 0xe06   : > { %v7060_v46 = vpop.f32.mrb[36].mxu0  ;;  %v7295_v16 = vpop.f32.mrb[66].mxu1 }
 0xe07   : > { %v7061_v47 = vadd.f32 %v7060_v46, %v6981_v45  ;;  %v8777_v60 = vpop.f32.mrb[37].mxu0  ;;  %v8810_v1 = vpop.f32.mrb[67].mxu1 }
 0xe09   : > { %v7138_v19 = vadd.f32 %v7137_v28, %v7061_v47 }
 0xe0e   : > { %v7220_v25 = vpop.f32.mrb[38].mxu0 }
 0xe0f   : > { %v7221_v56 = vadd.f32 %v7220_v25, %v7138_v19  ;;  %v8799_v22 = vpop.f32.mrb[39].mxu0 }
 0xe11   : > { %v7296_v14 = vadd.f32 %v7295_v16, %v7221_v56 }
 0xe13   : > { %v7299_v13 = vadd.f32 %v10615_v5, %v7296_v14 }
 0xe15   : > { %9482 = vtanh.f32 %v7299_v13  ;;  %v7553_v18 = vmul.f32 -1.442695, %v7299_v13 }
 0xe17   : > { %9484 = vpow2.f32 %v7553_v18 }
 0xe1f   : > { %v9483_v17 = vpop.eup %9482 }
 0xe20   : > { %7314 = vrot.lane.b32.xlu1 %v9483_v17, %s9608_s9 }
 0xe21   : > { %v9485_v57 = vpop.eup %9484 }
 0xe22   : > { %v7304_v37 = vadd.f32 1.0, %v9485_v57 }
 0xe24   : > { %9486 = vrcp.f32 %v7304_v37 }
 0xe2e   : > { %v9487_v29 = vpop.eup %9486 }
 0xe2f   : > { %v7312_v7 = vmul.f32 %v9487_v29, %v7310_v43 }
 0xe92   : > { %v7315_v31 = vpop.permute.xlu1 %7314 }
 0xe93   : > { %v7317_v38 = vmul.f32 %v9487_v29, %v7315_v31 }
 0xe95   : > { %7319 = vrot.lane.b32.xlu1 %v7317_v38, %s9607_s22 }
 0xf07   : > { %v7320_v5 = vpop.permute.xlu1 %7319 }
 0xf08   : > { %v7322_v8 = vadd.f32 %v7320_v5, %v7312_v7 }
 0xf0a   : > { %9488 = vtanh.f32 %v7322_v8 }
 0xf14   : > { %v9489_v51 = vpop.eup %9488 }
 0xf15   : > { %7325 = vrot.lane.b32.xlu0 %v9489_v51, %s9608_s9 }
 0xf19   : > { %5285 = vrot.lane.b32.xlu0 %v10622_v62, %s9609_s14 }
 0xf87   : > { %v7326_v40 = vpop.permute.xlu0 %7325 }
 0xf88   : > { %v7328_v58 = vmul.f32 %v9487_v29, %v7326_v40 }
 0xf8a   : > { %7330 = vrot.lane.b32.xlu1 %v7328_v58, %s9607_s22  ;;  %s9610_s22 = smov [#allocation8]  }
 0xf8b   : > { %v5286_v44 = vpop.permute.xlu0 %5285 }
 0xf8c   : > { %5288 = vst.msk [vmem:[#allocation3] sm:$0xff] %vm1101_vm1, %v5286_v44 }
 0xf8e   : > { %7335 = vrot.lane.b32.xlu1 %v7322_v8, %s9609_s14  ;;  %s9495_s14 = sshll.u32 %s9610_s22, 4  ;;  %s9496_s14 = int_to_ptr.vmem [resolvable:$false] %s9495_s14 }
 0xf8f   : > { %s9497_s0 = scalar_lea.vmem %s9496_s14, 1024  ;;  %p9498_p9 = scmp.lt.s32.totalorder %s10713_s13, %s9496_s14 }
 0xf90   : > { %p9499_p10 = scmp.lt.s32.totalorder %s9497_s0, %s9491_s27 }
 0xf92   : > { %p9500_p11 = por %p9499_p10, %p9498_p9 }
 0xf94   : > { %p9501_p12 = pnand %p9500_p11, %p9494_p7 }
 0xffc   : > { %v7331_v62 = vpop.permute.xlu1 %7330 }
 0xffd   : > { %7333 = vst.msk [vmem:[#allocation2 + $0x8] sm:$0xff] %vm1101_vm1, %v7331_v62  ;;  %7554 = vst.msk [vmem:[%s9774_s8 + $0x18] sm:$0xff] %vm1101_vm1, %v7331_v62 }
 0xffe   : > { %9504 = shalt.err (!%p9501_p12)
}
 0xfff   : > { %s9505_s15 = scalar_lea.hbm %s10711_s17, 512  ;;  %s9509_s28 = scalar_lea.hbm %s10785_s6, 3072 }
0x1000   : > { %p9506_p0 = scmp.ne.s32.totalorder %s10711_s17, %s9505_s15  ;;  %p9510_p3 = scmp.lt.u32.totalorder %s10711_s17, %s10785_s6 }
0x1001   : > { %p9511_p4 = scmp.lt.u32.totalorder %s9509_s28, %s9505_s15  ;;  %p9513_p6 = scmp.lt.u32.totalorder %s9505_s15, %s10711_s17 }
0x1002   : > { %p9507_p1 = pnand %p9506_p0, %p9725_p8 }
0x1003   : > { %p9512_p5 = por %p9511_p4, %p9510_p3 }
0x1004   : > { %p9508_p2 = pneg %p9507_p1 }
0x1005   : > { %p9514_p7 = por %p9513_p6, %p9512_p5 }
0x1007   : > { %p9515_p9 = pnand %p9514_p7, %p9508_p2 }
0x1009   : > { %9518 = shalt.err (!%p9515_p9)
}
0x100a   : > { %s9611_s11 = smov 128   ;;  %s9612_s9 = smov 256   ;;  %v7336_v48 = vpop.permute.xlu1 %7335 }
0x100b   : > { %s9613_s12 = smov 8   ;;  %7338 = vst.msk [vmem:[#allocation3 + $0x8] sm:$0xff] %vm1101_vm1, %v7336_v48 }
0x100c   : > { %9327 = dma.vmem_to_hbm [thread:$0]  (%p9725_p8), %s10713_s13, 512, %s10711_s17, %s10720_s26, %s9611_s11, %s9612_s9, %s9613_s12  }
0x100d PF: > { %p9333_p10 = scmp.ge.s32.totalorder %s9601_s30, 2  ;;  %s7372_s27 = sand.u32 1, %s9565_s21  }
0x100e   : > { %s7373_s22 = scalar_lea.sflag [#allocation9], %s7372_s27 }
0x100f   : > { %p9330_p11 = pnand %p9333_p10, %p9739_p13 }
0x1011   : > { %9560 = dma.done.wait (!%p9330_p11), %s7373_s22, 512  }
0x1012   : > { %9562 = vsyncadd (!%p9330_p11), %s7373_s22, 4294966784  ;;  %s19_s30 = sadd.s32 1, %s9601_s30   ;;  %s10799_s16 = sld [smem:[#allocation14_spill]] }
0x1013   : > { %p16_p12 = scmp.ge.s32.totalorder %s19_s30, 8   ;;  %s10800_s26 = sld [smem:[#allocation11_spill]] }
0x1014   : > { %s10801_s28 = sld [smem:[#allocation12_spill]]  ;;  %s10802_s13 = sld [smem:[#allocation13_spill]] }
0x1015   : > { %s10803_s21 = smov %s9577_s24  ;;  %s10804_s22 = smov %s9573_s23 }
0x1016   : > { %s10805_s23 = smov %s9734_s19  ;;  %s10806_s24 = smov %s9581_s25 }
0x1017   : > { %s10808_s27 = smov %s9597_s29  ;;  %18 = sbr.rel (!%p16_p12) target bundleno = 8 (0x8), region = 228 }
0x1018   : > { %s10807_s25 = smov %s10799_s16 }
0x101a   : > { %s10809_s29 = smov %s10802_s13 }
0x101e   :  { %7378 = vsyncpa [#allocation9], 1 }
0x101f   :  { %7380 = vsyncpa [#allocation9 + $0x1], 1 }

</bundles_post_ra>
